<compile_context>
chip_gen: v6e
topology: v6e:2x2x1
jax: 0.10.0
libtpu: 0.0.40
codegen_flags: <defaults>
</compile_context>

<pallas_src>
import functools
import math

import jax
import jax.numpy as jnp
from jax import lax
from jax.experimental import pallas as pl
from jax.experimental.pallas import tpu as pltpu


_LEAKY_SLOPE = 0.01  # torch.nn.LeakyReLU default negative_slope


def _leaky_relu(x):
    return jnp.where(x > 0, x, x * _LEAKY_SLOPE)


def _const_index_map(ndim, i):
    return (0,) * ndim


def _const_spec(arr):
    """Grid-constant (weight) BlockSpec: full array, same block every grid step."""
    return pl.BlockSpec(arr.shape, functools.partial(_const_index_map, arr.ndim))


# ---------------------------------------------------------------------------
# Encoder layer math (runs on values inside the backbone kernel)
# ---------------------------------------------------------------------------
def _encoder_layer(x, wqkv, bqkv, wo, bo, g1, be1, w1, b1, w2, b2, g2, be2,
                   *, nhead, block_batch, seq_len):
    rows, E = x.shape                      # rows = block_batch * seq_len
    Dh = E // nhead
    scale = 1.0 / math.sqrt(Dh)

    # Fused QKV projection: one (rows, E) x (E, 3E) MXU pass, f32 accumulation.
    qkv = jnp.dot(x.astype(jnp.bfloat16), wqkv,
                  preferred_element_type=jnp.float32) + bqkv
    q = (qkv[:, :E] * scale).reshape(block_batch, seq_len, E)        # f32
    k = qkv[:, E:2 * E].reshape(block_batch, seq_len, E)
    v = qkv[:, 2 * E:].reshape(block_batch, seq_len, E)

    # Per-head attention, batched over the batch tile (nhead iterations only).
    head_ctx = []
    for h in range(nhead):
        c0 = h * Dh
        qh = q[:, :, c0:c0 + Dh].astype(jnp.bfloat16)                # (bt, S, Dh)
        kh = k[:, :, c0:c0 + Dh].astype(jnp.bfloat16)
        vh = v[:, :, c0:c0 + Dh].astype(jnp.bfloat16)
        s = lax.dot_general(qh, kh, (((2,), (2,)), ((0,), (0,))),
                            preferred_element_type=jnp.float32)      # (bt, S, S)
        s = s - jnp.max(s, axis=-1, keepdims=True)
        p = jnp.exp(s)
        p = p / jnp.sum(p, axis=-1, keepdims=True)                   # exact softmax
        ctx = lax.dot_general(p.astype(jnp.bfloat16), vh,
                              (((2,), (1,)), ((0,), (0,))),
                              preferred_element_type=jnp.float32)    # (bt, S, Dh)
        head_ctx.append(ctx)
    ctx = jnp.concatenate(head_ctx, axis=-1).reshape(rows, E)        # lane concat

    # Attention output projection + residual + LayerNorm1.
    attn_out = jnp.dot(ctx.astype(jnp.bfloat16), wo,
                       preferred_element_type=jnp.float32) + bo
    y = x + attn_out
    mu = jnp.mean(y, axis=-1, keepdims=True)
    var = jnp.mean((y - mu) ** 2, axis=-1, keepdims=True)
    y = (y - mu) * lax.rsqrt(var + 1e-5) * g1 + be1

    # FFN: linear1 -> ReLU -> linear2, residual + LayerNorm2.
    h1 = jnp.dot(y.astype(jnp.bfloat16), w1,
                 preferred_element_type=jnp.float32) + b1
    h1 = jnp.maximum(h1, 0.0)
    h2 = jnp.dot(h1.astype(jnp.bfloat16), w2,
                 preferred_element_type=jnp.float32) + b2
    z = y + h2
    mu2 = jnp.mean(z, axis=-1, keepdims=True)
    var2 = jnp.mean((z - mu2) ** 2, axis=-1, keepdims=True)
    z = (z - mu2) * lax.rsqrt(var2 + 1e-5) * g2 + be2
    return z


# ---------------------------------------------------------------------------
# Fused backbone kernel: seq_emb_reducer(+pos_enc), encoder stack, emb_diff_reducer
# ---------------------------------------------------------------------------
def _backbone_kernel(sector_ref, diffin_ref, pos_ref,
                     ws1_ref, bs1_ref, ws2_ref, bs2_ref,
                     wqkv_ref, bqkv_ref, wo_ref, bo_ref,
                     g1_ref, be1_ref, w1_ref, b1_ref,
                     w2_ref, b2_ref, g2_ref, be2_ref,
                     wd1_ref, bd1_ref, wd2_ref, bd2_ref,
                     sec_out_ref, diff_out_ref,
                     *, nhead, num_layers, block_batch, seq_len):
    # --- seq_emb_reducer MLP + pos_enc (fused epilogue) ---
    xs = sector_ref[0].astype(jnp.float32)                           # (rows, E)
    hs = jnp.dot(xs.astype(jnp.bfloat16), ws1_ref[...],
                 preferred_element_type=jnp.float32) + bs1_ref[...]
    hs = _leaky_relu(hs)
    sec = jnp.dot(hs.astype(jnp.bfloat16), ws2_ref[...],
                  preferred_element_type=jnp.float32) + bs2_ref[...]
    sec = sec + pos_ref[0].astype(jnp.float32)
    sec_out_ref[0] = sec.astype(sec_out_ref.dtype)

    # --- transformer encoder stack (all layers in one kernel, weights resident) ---
    x = diffin_ref[0].astype(jnp.float32)                            # (rows, E)
    for l in range(num_layers):
        x = _encoder_layer(
            x,
            wqkv_ref[l], bqkv_ref[l], wo_ref[l], bo_ref[l],
            g1_ref[l], be1_ref[l], w1_ref[l], b1_ref[l],
            w2_ref[l], b2_ref[l], g2_ref[l], be2_ref[l],
            nhead=nhead, block_batch=block_batch, seq_len=seq_len)

    # --- emb_diff_reducer MLP ---
    hd = jnp.dot(x.astype(jnp.bfloat16), wd1_ref[...],
                 preferred_element_type=jnp.float32) + bd1_ref[...]
    hd = _leaky_relu(hd)
    diff = jnp.dot(hd.astype(jnp.bfloat16), wd2_ref[...],
                   preferred_element_type=jnp.float32) + bd2_ref[...]
    diff_out_ref[0] = diff.astype(diff_out_ref.dtype)


def _choose_block_batch(batch, seq_len, target_rows=2048):
    """Largest divisor bt of batch with bt*seq_len <= target_rows (amortizes the
    ~0.35us/grid-step overhead and gives the MXU a tall M)."""
    best = 1
    for bt in range(1, batch + 1):
        if batch % bt == 0 and bt * seq_len <= target_rows:
            best = bt
    # v7x has 2 TensorCores: prefer an even number of grid steps when it does not
    # shrink the row block below ~256 rows.
    if (batch // best) % 2 == 1:
        for bt in range(best - 1, 0, -1):
            if batch % bt == 0 and (batch // bt) % 2 == 0 and bt * seq_len >= 256:
                best = bt
                break
    return best


def _choose_row_tile(n, cap=1024):
    if n <= cap:
        return n
    for t in range(cap, 0, -1):
        if n % t == 0 and t % 8 == 0:
            return t
    return n


# ---------------------------------------------------------------------------
# Row-tiled MLP kernel (score head)
# ---------------------------------------------------------------------------
def _mlp_kernel(x_ref, *refs, num_layers, leaky):
    out_ref = refs[2 * num_layers]
    h = x_ref[...].astype(jnp.float32)
    for i in range(num_layers):
        w = refs[2 * i][...]            # bf16 (Din, Dout)
        b = refs[2 * i + 1][...]        # f32  (1, Dout)
        h = jnp.dot(h.astype(jnp.bfloat16), w,
                    preferred_element_type=jnp.float32) + b
        if leaky[i]:
            h = _leaky_relu(h)
    out_ref[...] = h.astype(out_ref.dtype)


def mlp_forward(x, layers, leaky, *, row_cap=1024):
    """x: (N, Din). layers: list of (w_t bf16 (Din, Dout), b f32 (1, Dout))."""
    n, d_in = x.shape
    d_out = layers[-1][0].shape[1]
    tile = _choose_row_tile(n, row_cap)
    grid = (n // tile,)

    in_specs = [pl.BlockSpec((tile, d_in), lambda i: (i, 0))]
    operands = [x]
    for w, b in layers:
        in_specs.append(_const_spec(w))
        in_specs.append(_const_spec(b))
        operands.extend([w, b])

    kernel = functools.partial(_mlp_kernel, num_layers=len(layers),
                               leaky=tuple(leaky))
    return pl.pallas_call(
        kernel,
        out_shape=jax.ShapeDtypeStruct((n, d_out), jnp.float32),
        grid=grid,
        in_specs=in_specs,
        out_specs=pl.BlockSpec((tile, d_out), lambda i: (i, 0)),
        compiler_params=pltpu.CompilerParams(dimension_semantics=("parallel",)),
    )(*operands)


# ---------------------------------------------------------------------------
# Full PrismScoreNoDeltasModel forward (two pallas_calls total)
# ---------------------------------------------------------------------------
_BACKBONE_WEIGHT_NAMES = (
    "ws1", "bs1", "ws2", "bs2",
    "wqkv", "bqkv", "wo", "bo", "g1", "be1", "w1", "b1", "w2", "b2", "g2", "be2",
    "wd1", "bd1", "wd2", "bd2",
)


def prism_score_no_deltas_forward(params, pos_enc, emb_sector, emb_diff_in, *,
                                  nhead, block_batch=None, target_rows=2048):
    B, L, E = emb_sector.shape
    cz = pos_enc.shape[-1]
    NL = params["wqkv"].shape[0]
    F = params["w1"].shape[-1]
    assert E % nhead == 0

    bt = _choose_block_batch(B, L, target_rows) if block_batch is None else block_batch
    assert B % bt == 0
    nb = B // bt
    rows = bt * L

    # Fold bt batch elements into one tall row block (no in-kernel reshape needed).
    sector_r = emb_sector.reshape(nb, rows, E)
    diffin_r = emb_diff_in.reshape(nb, rows, E)
    pos_r = pos_enc.reshape(nb, rows, cz)

    weights = [params[n] for n in _BACKBONE_WEIGHT_NAMES]

    in_specs = [pl.BlockSpec((1, rows, E), lambda i: (i, 0, 0)),
                pl.BlockSpec((1, rows, E), lambda i: (i, 0, 0)),
                pl.BlockSpec((1, rows, cz), lambda i: (i, 0, 0))]
    in_specs += [_const_spec(w) for w in weights]
    out_specs = [pl.BlockSpec((1, rows, cz), lambda i: (i, 0, 0)),
                 pl.BlockSpec((1, rows, cz), lambda i: (i, 0, 0))]
    out_shape = [jax.ShapeDtypeStruct((nb, rows, cz), jnp.float32),
                 jax.ShapeDtypeStruct((nb, rows, cz), jnp.float32)]

    # VMEM budget: weights (double-buffered), IO blocks (double-buffered),
    # live activations; cap well below v7x's 64 MiB core for compiler headroom.
    weight_bytes = sum(int(w.size) * w.dtype.itemsize for w in weights)
    io_bytes = rows * (2 * E + 3 * cz) * 4
    act_bytes = rows * (8 * E + F) * 4
    est = 2 * weight_bytes + 2 * io_bytes + 2 * act_bytes
    vmem_limit = int(min(48 * 1024 * 1024, max(16 * 1024 * 1024, 2 * est)))

    kernel = functools.partial(_backbone_kernel, nhead=nhead, num_layers=NL,
                               block_batch=bt, seq_len=L)
    sec_out, diff_out = pl.pallas_call(
        kernel,
        out_shape=out_shape,
        grid=(nb,),
        in_specs=in_specs,
        out_specs=out_specs,
        compiler_params=pltpu.CompilerParams(
            dimension_semantics=("parallel",),
            vmem_limit_bytes=vmem_limit,
        ),
    )(sector_r, diffin_r, pos_r, *weights)

    # Flatten / concat (tiny, layout-only) then the row-tiled score MLP.
    feats = jnp.concatenate([sec_out.reshape(B, L * cz),
                             diff_out.reshape(B, L * cz)], axis=1)
    return mlp_forward(feats, params["mlp"], (True, True, True, False))


# ---------------------------------------------------------------------------
# Parameters (torch Linear layout transposed; bf16 weights, f32 biases)
# ---------------------------------------------------------------------------
def _init_linear(key, fan_in, fan_out, scale=0.1):
    kw, kb = jax.random.split(key)
    w = jax.random.normal(kw, (fan_out, fan_in), jnp.float32) * scale   # torch layout
    b = jax.random.normal(kb, (fan_out,), jnp.float32) * scale
    return w.T.astype(jnp.bfloat16), b.reshape(1, fan_out)


def _init_encoder_layer(key, d_model, dim_ff, scale=0.1):
    E, F = d_model, dim_ff
    ks = jax.random.split(key, 8)
    wqkv = jax.random.normal(ks[0], (3 * E, E), jnp.float32) * scale
    bqkv = jax.random.normal(ks[1], (3 * E,), jnp.float32) * scale
    wo = jax.random.normal(ks[2], (E, E), jnp.float32) * scale
    bo = jax.random.normal(ks[3], (E,), jnp.float32) * scale
    w1 = jax.random.normal(ks[4], (F, E), jnp.float32) * scale
    b1 = jax.random.normal(ks[5], (F,), jnp.float32) * scale
    w2 = jax.random.normal(ks[6], (E, F), jnp.float32) * scale
    b2 = jax.random.normal(ks[7], (E,), jnp.float32) * scale
    return dict(
        wqkv=wqkv.T.astype(jnp.bfloat16), bqkv=bqkv.reshape(1, 3 * E),
        wo=wo.T.astype(jnp.bfloat16), bo=bo.reshape(1, E),
        g1=jnp.ones((1, E), jnp.float32), be1=jnp.zeros((1, E), jnp.float32),
        w1=w1.T.astype(jnp.bfloat16), b1=b1.reshape(1, F),
        w2=w2.T.astype(jnp.bfloat16), b2=b2.reshape(1, E),
        g2=jnp.ones((1, E), jnp.float32), be2=jnp.zeros((1, E), jnp.float32),
    )


def init_params(key, *, d_model, cz, sector_len, dim_ff, num_layers):
    E, L = d_model, sector_len
    red_mid = E // 2
    in_size = cz * L * 2
    hid1 = in_size // 2
    hid2 = hid1 // 4
    hid3 = hid2 // 4
    keys = jax.random.split(key, 5 + num_layers)

    ws1, bs1 = _init_linear(keys[0], E, red_mid)
    ws2, bs2 = _init_linear(keys[1], red_mid, cz)
    wd1, bd1 = _init_linear(keys[2], E, red_mid)
    wd2, bd2 = _init_linear(keys[3], red_mid, cz)
    mlp_dims = (in_size, hid1, hid2, hid3, 2)
    mkeys = jax.random.split(keys[4], len(mlp_dims) - 1)
    mlp = [_init_linear(mkeys[i], mlp_dims[i], mlp_dims[i + 1])
           for i in range(len(mlp_dims) - 1)]
    enc = [_init_encoder_layer(k, E, dim_ff) for k in keys[5:5 + num_layers]]
    stacked = {name: jnp.stack([lp[name] for lp in enc]) for name in enc[0]}
    return dict(ws1=ws1, bs1=bs1, ws2=ws2, bs2=bs2,
                wd1=wd1, bd1=bd1, wd2=wd2, bd2=bd2,
                mlp=mlp, **stacked)


# ---------------------------------------------------------------------------
# Pure-JAX reference (matched precision: bf16 matmul inputs, f32 accumulation)
# ---------------------------------------------------------------------------
def _layer_norm(x, g, b, eps=1e-5):
    mu = jnp.mean(x, axis=-1, keepdims=True)
    var = jnp.mean((x - mu) ** 2, axis=-1, keepdims=True)
    return (x - mu) * lax.rsqrt(var + eps) * g + b


def _ref_linear(x, w, b):
    return jnp.dot(x.astype(jnp.bfloat16), w,
                   preferred_element_type=jnp.float32) + b


def _ref_encoder_layer(x, p, l, nhead):
    B, S, E = x.shape
    Dh = E // nhead
    scale = 1.0 / math.sqrt(Dh)
    xr = x.reshape(B * S, E)
    qkv = _ref_linear(xr, p["wqkv"][l], p["bqkv"][l])
    q = (qkv[:, :E] * scale).reshape(B, S, E)
    k = qkv[:, E:2 * E].reshape(B, S, E)
    v = qkv[:, 2 * E:].reshape(B, S, E)
    heads = []
    for h in range(nhead):
        c = slice(h * Dh, (h + 1) * Dh)
        qh = q[..., c].astype(jnp.bfloat16)
        kh = k[..., c].astype(jnp.bfloat16)
        vh = v[..., c].astype(jnp.bfloat16)
        s = jnp.einsum("bqd,bkd->bqk", qh, kh, preferred_element_type=jnp.float32)
        s = s - jnp.max(s, axis=-1, keepdims=True)
        pr = jnp.exp(s)
        pr = pr / jnp.sum(pr, axis=-1, keepdims=True)
        heads.append(jnp.einsum("bqk,bkd->bqd", pr.astype(jnp.bfloat16), vh,
                                preferred_element_type=jnp.float32))
    ctx = jnp.concatenate(heads, axis=-1).reshape(B * S, E)
    attn_out = _ref_linear(ctx, p["wo"][l], p["bo"][l])
    y = _layer_norm(xr + attn_out, p["g1"][l], p["be1"][l])
    h1 = jnp.maximum(_ref_linear(y, p["w1"][l], p["b1"][l]), 0.0)
    h2 = _ref_linear(h1, p["w2"][l], p["b2"][l])
    z = _layer_norm(y + h2, p["g2"][l], p["be2"][l])
    return z.reshape(B, S, E)


def reference_model(params, pos_enc, emb_sector, emb_diff_in, *, nhead):
    B, L, E = emb_sector.shape
    cz = pos_enc.shape[-1]
    xs = emb_sector.astype(jnp.float32).reshape(B * L, E)
    sec = _ref_linear(_leaky_relu(_ref_linear(xs, params["ws1"], params["bs1"])),
                      params["ws2"], params["bs2"])
    sec = sec.reshape(B, L, cz) + pos_enc
    x = emb_diff_in.astype(jnp.float32)
    for l in range(params["wqkv"].shape[0]):
        x = _ref_encoder_layer(x, params, l, nhead)
    xd = x.reshape(B * L, E)
    diff = _ref_linear(_leaky_relu(_ref_linear(xd, params["wd1"], params["bd1"])),
                       params["wd2"], params["bd2"]).reshape(B, L, cz)
    feats = jnp.concatenate([sec.reshape(B, L * cz), diff.reshape(B, L * cz)], axis=1)
    h = feats
    leaky = (True, True, True, False)
    for i, (w, b) in enumerate(params["mlp"]):
        h = _ref_linear(h, w, b)
        if leaky[i]:
            h = _leaky_relu(h)
    return h


# ---------------------------------------------------------------------------
if __name__ == "__main__":
    # Small config consistent with the module:
    #   seq_emb_size (d_model) = 32, heads = 4, cz = 8,
    #   sector length L = 2*diff_width+1 = 8, attn_len = 2 encoder layers, FFN = 128.
    B, L, E, H, CZ, FF, NUM_LAYERS = 2, 8, 32, 4, 8, 128, 2

    key = jax.random.PRNGKey(0)
    k_par, k_sec, k_diff, k_pos = jax.random.split(key, 4)
    params = init_params(k_par, d_model=E, cz=CZ, sector_len=L, dim_ff=FF,
                         num_layers=NUM_LAYERS)
    emb_sector = jax.random.normal(k_sec, (B, L, E), jnp.float32)
    emb_diff_in = jax.random.normal(k_diff, (B, L, E), jnp.float32)
    pos_enc = jax.random.normal(k_pos, (B, L, CZ), jnp.float32)

    fwd = jax.jit(functools.partial(prism_score_no_deltas_forward, nhead=H))
    scores = jax.block_until_ready(fwd(params, pos_enc, emb_sector, emb_diff_in))
    assert scores.shape == (B, 2), scores.shape

    ref = jax.block_until_ready(
        reference_model(params, pos_enc, emb_sector, emb_diff_in, nhead=H))
    max_err = float(jnp.max(jnp.abs(scores - ref)))
    assert jnp.allclose(scores, ref, atol=2e-3, rtol=2e-3), (
        f"model output mismatch (max abs err = {max_err:.3e})")

    print("KERNEL_OK")
</pallas_src>

<mosaic_0001>
module attributes {stable_mosaic.version = 11 : i64} {
  func.func @_backbone_kernel(%arg0: i32, %arg1: memref<1x16x32xf32, #tpu.memory_space<vmem>>, %arg2: memref<1x16x32xf32, #tpu.memory_space<vmem>>, %arg3: memref<1x16x8xf32, #tpu.memory_space<vmem>>, %arg4: memref<32x16xbf16, #tpu.memory_space<vmem>>, %arg5: memref<1x16xf32, #tpu.memory_space<vmem>>, %arg6: memref<16x8xbf16, #tpu.memory_space<vmem>>, %arg7: memref<1x8xf32, #tpu.memory_space<vmem>>, %arg8: memref<2x32x96xbf16, #tpu.memory_space<vmem>>, %arg9: memref<2x1x96xf32, #tpu.memory_space<vmem>>, %arg10: memref<2x32x32xbf16, #tpu.memory_space<vmem>>, %arg11: memref<2x1x32xf32, #tpu.memory_space<vmem>>, %arg12: memref<2x1x32xf32, #tpu.memory_space<vmem>>, %arg13: memref<2x1x32xf32, #tpu.memory_space<vmem>>, %arg14: memref<2x32x128xbf16, #tpu.memory_space<vmem>>, %arg15: memref<2x1x128xf32, #tpu.memory_space<vmem>>, %arg16: memref<2x128x32xbf16, #tpu.memory_space<vmem>>, %arg17: memref<2x1x32xf32, #tpu.memory_space<vmem>>, %arg18: memref<2x1x32xf32, #tpu.memory_space<vmem>>, %arg19: memref<2x1x32xf32, #tpu.memory_space<vmem>>, %arg20: memref<32x16xbf16, #tpu.memory_space<vmem>>, %arg21: memref<1x16xf32, #tpu.memory_space<vmem>>, %arg22: memref<16x8xbf16, #tpu.memory_space<vmem>>, %arg23: memref<1x8xf32, #tpu.memory_space<vmem>>, %arg24: memref<1x16x8xf32, #tpu.memory_space<vmem>>, %arg25: memref<1x16x8xf32, #tpu.memory_space<vmem>>) attributes {dimension_semantics = [#tpu.dimension_semantics<parallel>], iteration_bounds = array<i64: 1>, scalar_prefetch = 0 : i64, scratch_operands = 0 : i64, tpu.core_type = #tpu.core_type<tc>, window_params = [{transform_indices = @transform_0, window_bounds = array<i64: 1, 16, 32>}, {transform_indices = @transform_1, window_bounds = array<i64: 1, 16, 32>}, {transform_indices = @transform_2, window_bounds = array<i64: 1, 16, 8>}, {pipeline_mode = #tpu.pipeline_mode<synchronous>, transform_indices = @transform_3, window_bounds = array<i64: 32, 16>}, {pipeline_mode = #tpu.pipeline_mode<synchronous>, transform_indices = @transform_4, window_bounds = array<i64: 1, 16>}, {pipeline_mode = #tpu.pipeline_mode<synchronous>, transform_indices = @transform_5, window_bounds = array<i64: 16, 8>}, {pipeline_mode = #tpu.pipeline_mode<synchronous>, transform_indices = @transform_6, window_bounds = array<i64: 1, 8>}, {pipeline_mode = #tpu.pipeline_mode<synchronous>, transform_indices = @transform_7, window_bounds = array<i64: 2, 32, 96>}, {pipeline_mode = #tpu.pipeline_mode<synchronous>, transform_indices = @transform_8, window_bounds = array<i64: 2, 1, 96>}, {pipeline_mode = #tpu.pipeline_mode<synchronous>, transform_indices = @transform_9, window_bounds = array<i64: 2, 32, 32>}, {pipeline_mode = #tpu.pipeline_mode<synchronous>, transform_indices = @transform_10, window_bounds = array<i64: 2, 1, 32>}, {pipeline_mode = #tpu.pipeline_mode<synchronous>, transform_indices = @transform_11, window_bounds = array<i64: 2, 1, 32>}, {pipeline_mode = #tpu.pipeline_mode<synchronous>, transform_indices = @transform_12, window_bounds = array<i64: 2, 1, 32>}, {pipeline_mode = #tpu.pipeline_mode<synchronous>, transform_indices = @transform_13, window_bounds = array<i64: 2, 32, 128>}, {pipeline_mode = #tpu.pipeline_mode<synchronous>, transform_indices = @transform_14, window_bounds = array<i64: 2, 1, 128>}, {pipeline_mode = #tpu.pipeline_mode<synchronous>, transform_indices = @transform_15, window_bounds = array<i64: 2, 128, 32>}, {pipeline_mode = #tpu.pipeline_mode<synchronous>, transform_indices = @transform_16, window_bounds = array<i64: 2, 1, 32>}, {pipeline_mode = #tpu.pipeline_mode<synchronous>, transform_indices = @transform_17, window_bounds = array<i64: 2, 1, 32>}, {pipeline_mode = #tpu.pipeline_mode<synchronous>, transform_indices = @transform_18, window_bounds = array<i64: 2, 1, 32>}, {pipeline_mode = #tpu.pipeline_mode<synchronous>, transform_indices = @transform_19, window_bounds = array<i64: 32, 16>}, {pipeline_mode = #tpu.pipeline_mode<synchronous>, transform_indices = @transform_20, window_bounds = array<i64: 1, 16>}, {pipeline_mode = #tpu.pipeline_mode<synchronous>, transform_indices = @transform_21, window_bounds = array<i64: 16, 8>}, {pipeline_mode = #tpu.pipeline_mode<synchronous>, transform_indices = @transform_22, window_bounds = array<i64: 1, 8>}, {transform_indices = @transform_23, window_bounds = array<i64: 1, 16, 8>}, {transform_indices = @transform_24, window_bounds = array<i64: 1, 16, 8>}]} {
    %c0 = arith.constant 0 : index
    %c0_0 = arith.constant 0 : index
    %c0_1 = arith.constant 0 : index
    %0 = vector.load %arg1[%c0, %c0_0, %c0_1] : memref<1x16x32xf32, #tpu.memory_space<vmem>>, vector<1x16x32xf32>
    %1 = vector.shape_cast %0 : vector<1x16x32xf32> to vector<16x32xf32>
    %2 = arith.truncf %1 : vector<16x32xf32> to vector<16x32xbf16>
    %c0_2 = arith.constant 0 : index
    %c0_3 = arith.constant 0 : index
    %3 = vector.load %arg4[%c0_2, %c0_3] : memref<32x16xbf16, #tpu.memory_space<vmem>>, vector<32x16xbf16>
    %cst = arith.constant dense<0.000000e+00> : vector<16x16xf32>
    %4 = tpu.matmul %2, %3, %cst {dimension_numbers = #tpu.dot_dimension_numbers<[1], [0], [0], [1], [0, 0, 1, 1], [], []>} : vector<16x32xbf16>, vector<32x16xbf16>, vector<16x16xf32> -> vector<16x16xf32>
    %c0_4 = arith.constant 0 : index
    %c0_5 = arith.constant 0 : index
    %5 = vector.load %arg5[%c0_4, %c0_5] : memref<1x16xf32, #tpu.memory_space<vmem>>, vector<1x16xf32>
    %6 = vector.broadcast %5 : vector<1x16xf32> to vector<16x16xf32>
    %7 = arith.addf %4, %6 : vector<16x16xf32>
    %cst_6 = arith.constant 0.000000e+00 : f32
    %8 = vector.broadcast %cst_6 : f32 to vector<16x16xf32>
    %9 = arith.cmpf ogt, %7, %8 : vector<16x16xf32>
    %cst_7 = arith.constant 0.00999999977 : f32
    %10 = vector.broadcast %cst_7 : f32 to vector<16x16xf32>
    %11 = arith.mulf %7, %10 : vector<16x16xf32>
    %12 = arith.select %9, %7, %11 : vector<16x16xi1>, vector<16x16xf32>
    %13 = arith.truncf %12 : vector<16x16xf32> to vector<16x16xbf16>
    %c0_8 = arith.constant 0 : index
    %c0_9 = arith.constant 0 : index
    %14 = vector.load %arg6[%c0_8, %c0_9] : memref<16x8xbf16, #tpu.memory_space<vmem>>, vector<16x8xbf16>
    %cst_10 = arith.constant dense<0.000000e+00> : vector<16x8xf32>
    %15 = tpu.matmul %13, %14, %cst_10 {dimension_numbers = #tpu.dot_dimension_numbers<[1], [0], [0], [1], [0, 0, 1, 1], [], []>} : vector<16x16xbf16>, vector<16x8xbf16>, vector<16x8xf32> -> vector<16x8xf32>
    %c0_11 = arith.constant 0 : index
    %c0_12 = arith.constant 0 : index
    %16 = vector.load %arg7[%c0_11, %c0_12] : memref<1x8xf32, #tpu.memory_space<vmem>>, vector<1x8xf32>
    %17 = vector.broadcast %16 : vector<1x8xf32> to vector<16x8xf32>
    %18 = arith.addf %15, %17 : vector<16x8xf32>
    %c0_13 = arith.constant 0 : index
    %c0_14 = arith.constant 0 : index
    %c0_15 = arith.constant 0 : index
    %19 = vector.load %arg3[%c0_13, %c0_14, %c0_15] : memref<1x16x8xf32, #tpu.memory_space<vmem>>, vector<1x16x8xf32>
    %20 = vector.shape_cast %19 : vector<1x16x8xf32> to vector<16x8xf32>
    %21 = arith.addf %18, %20 : vector<16x8xf32>
    %c0_16 = arith.constant 0 : index
    %c0_17 = arith.constant 0 : index
    %c0_18 = arith.constant 0 : index
    %22 = vector.load %arg24[%c0_16, %c0_17, %c0_18] : memref<1x16x8xf32, #tpu.memory_space<vmem>>, vector<1x16x8xf32>
    %23 = vector.shape_cast %22 : vector<1x16x8xf32> to vector<16x8xf32>
    %24 = vector.shape_cast %21 : vector<16x8xf32> to vector<1x16x8xf32>
    tpu.vector_store %arg24[%c0_16, %c0_17, %c0_18], %24 {strides = array<i32>} : memref<1x16x8xf32, #tpu.memory_space<vmem>>, vector<1x16x8xf32>,
    %c0_19 = arith.constant 0 : index
    %c0_20 = arith.constant 0 : index
    %c0_21 = arith.constant 0 : index
    %25 = vector.load %arg2[%c0_19, %c0_20, %c0_21] : memref<1x16x32xf32, #tpu.memory_space<vmem>>, vector<1x16x32xf32>
    %26 = vector.shape_cast %25 : vector<1x16x32xf32> to vector<16x32xf32>
    %c0_22 = arith.constant 0 : index
    %c0_23 = arith.constant 0 : index
    %c0_24 = arith.constant 0 : index
    %27 = vector.load %arg8[%c0_22, %c0_23, %c0_24] : memref<2x32x96xbf16, #tpu.memory_space<vmem>>, vector<1x32x96xbf16>
    %28 = vector.shape_cast %27 : vector<1x32x96xbf16> to vector<32x96xbf16>
    %c0_25 = arith.constant 0 : index
    %c0_26 = arith.constant 0 : index
    %c0_27 = arith.constant 0 : index
    %29 = vector.load %arg9[%c0_25, %c0_26, %c0_27] : memref<2x1x96xf32, #tpu.memory_space<vmem>>, vector<1x1x96xf32>
    %30 = vector.shape_cast %29 : vector<1x1x96xf32> to vector<1x96xf32>
    %c0_28 = arith.constant 0 : index
    %c0_29 = arith.constant 0 : index
    %c0_30 = arith.constant 0 : index
    %31 = vector.load %arg10[%c0_28, %c0_29, %c0_30] : memref<2x32x32xbf16, #tpu.memory_space<vmem>>, vector<1x32x32xbf16>
    %32 = vector.shape_cast %31 : vector<1x32x32xbf16> to vector<32x32xbf16>
    %c0_31 = arith.constant 0 : index
    %c0_32 = arith.constant 0 : index
    %c0_33 = arith.constant 0 : index
    %33 = vector.load %arg11[%c0_31, %c0_32, %c0_33] : memref<2x1x32xf32, #tpu.memory_space<vmem>>, vector<1x1x32xf32>
    %34 = vector.shape_cast %33 : vector<1x1x32xf32> to vector<1x32xf32>
    %c0_34 = arith.constant 0 : index
    %c0_35 = arith.constant 0 : index
    %c0_36 = arith.constant 0 : index
    %35 = vector.load %arg12[%c0_34, %c0_35, %c0_36] : memref<2x1x32xf32, #tpu.memory_space<vmem>>, vector<1x1x32xf32>
    %36 = vector.shape_cast %35 : vector<1x1x32xf32> to vector<1x32xf32>
    %c0_37 = arith.constant 0 : index
    %c0_38 = arith.constant 0 : index
    %c0_39 = arith.constant 0 : index
    %37 = vector.load %arg13[%c0_37, %c0_38, %c0_39] : memref<2x1x32xf32, #tpu.memory_space<vmem>>, vector<1x1x32xf32>
    %38 = vector.shape_cast %37 : vector<1x1x32xf32> to vector<1x32xf32>
    %c0_40 = arith.constant 0 : index
    %c0_41 = arith.constant 0 : index
    %c0_42 = arith.constant 0 : index
    %39 = vector.load %arg14[%c0_40, %c0_41, %c0_42] : memref<2x32x128xbf16, #tpu.memory_space<vmem>>, vector<1x32x128xbf16>
    %40 = vector.shape_cast %39 : vector<1x32x128xbf16> to vector<32x128xbf16>
    %c0_43 = arith.constant 0 : index
    %c0_44 = arith.constant 0 : index
    %c0_45 = arith.constant 0 : index
    %41 = vector.load %arg15[%c0_43, %c0_44, %c0_45] : memref<2x1x128xf32, #tpu.memory_space<vmem>>, vector<1x1x128xf32>
    %42 = vector.shape_cast %41 : vector<1x1x128xf32> to vector<1x128xf32>
    %c0_46 = arith.constant 0 : index
    %c0_47 = arith.constant 0 : index
    %c0_48 = arith.constant 0 : index
    %43 = vector.load %arg16[%c0_46, %c0_47, %c0_48] : memref<2x128x32xbf16, #tpu.memory_space<vmem>>, vector<1x128x32xbf16>
    %44 = vector.shape_cast %43 : vector<1x128x32xbf16> to vector<128x32xbf16>
    %c0_49 = arith.constant 0 : index
    %c0_50 = arith.constant 0 : index
    %c0_51 = arith.constant 0 : index
    %45 = vector.load %arg17[%c0_49, %c0_50, %c0_51] : memref<2x1x32xf32, #tpu.memory_space<vmem>>, vector<1x1x32xf32>
    %46 = vector.shape_cast %45 : vector<1x1x32xf32> to vector<1x32xf32>
    %c0_52 = arith.constant 0 : index
    %c0_53 = arith.constant 0 : index
    %c0_54 = arith.constant 0 : index
    %47 = vector.load %arg18[%c0_52, %c0_53, %c0_54] : memref<2x1x32xf32, #tpu.memory_space<vmem>>, vector<1x1x32xf32>
    %48 = vector.shape_cast %47 : vector<1x1x32xf32> to vector<1x32xf32>
    %c0_55 = arith.constant 0 : index
    %c0_56 = arith.constant 0 : index
    %c0_57 = arith.constant 0 : index
    %49 = vector.load %arg19[%c0_55, %c0_56, %c0_57] : memref<2x1x32xf32, #tpu.memory_space<vmem>>, vector<1x1x32xf32>
    %50 = vector.shape_cast %49 : vector<1x1x32xf32> to vector<1x32xf32>
    %51 = arith.truncf %26 : vector<16x32xf32> to vector<16x32xbf16>
    %cst_58 = arith.constant dense<0.000000e+00> : vector<16x96xf32>
    %52 = tpu.matmul %51, %28, %cst_58 {dimension_numbers = #tpu.dot_dimension_numbers<[1], [0], [0], [1], [0, 0, 1, 1], [], []>} : vector<16x32xbf16>, vector<32x96xbf16>, vector<16x96xf32> -> vector<16x96xf32>
    %53 = vector.broadcast %30 : vector<1x96xf32> to vector<16x96xf32>
    %54 = arith.addf %52, %53 : vector<16x96xf32>
    %55 = vector.extract_strided_slice %54 {offsets = [0, 0], sizes = [16, 32], strides = [1, 1]} : vector<16x96xf32> to vector<16x32xf32>
    %cst_59 = arith.constant 0.353553385 : f32
    %56 = vector.broadcast %cst_59 : f32 to vector<16x32xf32>
    %57 = arith.mulf %55, %56 : vector<16x32xf32>
    %58 = vector.shape_cast %57 : vector<16x32xf32> to vector<2x8x32xf32>
    %59 = vector.extract_strided_slice %54 {offsets = [0, 32], sizes = [16, 32], strides = [1, 1]} : vector<16x96xf32> to vector<16x32xf32>
    %60 = vector.shape_cast %59 : vector<16x32xf32> to vector<2x8x32xf32>
    %61 = vector.extract_strided_slice %54 {offsets = [0, 64], sizes = [16, 32], strides = [1, 1]} : vector<16x96xf32> to vector<16x32xf32>
    %62 = vector.shape_cast %61 : vector<16x32xf32> to vector<2x8x32xf32>
    %63 = vector.extract_strided_slice %58 {offsets = [0, 0, 0], sizes = [2, 8, 8], strides = [1, 1, 1]} : vector<2x8x32xf32> to vector<2x8x8xf32>
    %64 = arith.truncf %63 : vector<2x8x8xf32> to vector<2x8x8xbf16>
    %65 = vector.extract_strided_slice %60 {offsets = [0, 0, 0], sizes = [2, 8, 8], strides = [1, 1, 1]} : vector<2x8x32xf32> to vector<2x8x8xf32>
    %66 = arith.truncf %65 : vector<2x8x8xf32> to vector<2x8x8xbf16>
    %67 = vector.extract_strided_slice %62 {offsets = [0, 0, 0], sizes = [2, 8, 8], strides = [1, 1, 1]} : vector<2x8x32xf32> to vector<2x8x8xf32>
    %68 = arith.truncf %67 : vector<2x8x8xf32> to vector<2x8x8xbf16>
    %cst_60 = arith.constant dense<0.000000e+00> : vector<2x8x8xf32>
    %69 = tpu.matmul %64, %66, %cst_60 {dimension_numbers = #tpu.dot_dimension_numbers<[2], [2], [1], [1], [0, 0, 0, 1, 1, 1], [0], [0]>} : vector<2x8x8xbf16>, vector<2x8x8xbf16>, vector<2x8x8xf32> -> vector<2x8x8xf32>
    %cst_61 = arith.constant dense<0xFF800000> : vector<2x8xf32>
    %70 = vector.multi_reduction <maximumf>, %69, %cst_61 [2] : vector<2x8x8xf32> to vector<2x8xf32>
    %71 = vector.shape_cast %70 : vector<2x8xf32> to vector<2x8x1xf32>
    %72 = vector.broadcast %71 : vector<2x8x1xf32> to vector<2x8x8xf32>
    %73 = arith.subf %69, %72 : vector<2x8x8xf32>
    %74 = math.exp %73 : vector<2x8x8xf32>
    %cst_62 = arith.constant dense<0.000000e+00> : vector<2x8xf32>
    %75 = vector.multi_reduction <add>, %74, %cst_62 [2] : vector<2x8x8xf32> to vector<2x8xf32>
    %76 = vector.shape_cast %75 : vector<2x8xf32> to vector<2x8x1xf32>
    %77 = vector.broadcast %76 : vector<2x8x1xf32> to vector<2x8x8xf32>
    %78 = arith.divf %74, %77 : vector<2x8x8xf32>
    %79 = arith.truncf %78 : vector<2x8x8xf32> to vector<2x8x8xbf16>
    %cst_63 = arith.constant dense<0.000000e+00> : vector<2x8x8xf32>
    %80 = tpu.matmul %79, %68, %cst_63 {dimension_numbers = #tpu.dot_dimension_numbers<[2], [1], [1], [2], [0, 0, 0, 1, 1, 2], [0], [0]>} : vector<2x8x8xbf16>, vector<2x8x8xbf16>, vector<2x8x8xf32> -> vector<2x8x8xf32>
    %81 = vector.extract_strided_slice %58 {offsets = [0, 0, 8], sizes = [2, 8, 8], strides = [1, 1, 1]} : vector<2x8x32xf32> to vector<2x8x8xf32>
    %82 = arith.truncf %81 : vector<2x8x8xf32> to vector<2x8x8xbf16>
    %83 = vector.extract_strided_slice %60 {offsets = [0, 0, 8], sizes = [2, 8, 8], strides = [1, 1, 1]} : vector<2x8x32xf32> to vector<2x8x8xf32>
    %84 = arith.truncf %83 : vector<2x8x8xf32> to vector<2x8x8xbf16>
    %85 = vector.extract_strided_slice %62 {offsets = [0, 0, 8], sizes = [2, 8, 8], strides = [1, 1, 1]} : vector<2x8x32xf32> to vector<2x8x8xf32>
    %86 = arith.truncf %85 : vector<2x8x8xf32> to vector<2x8x8xbf16>
    %cst_64 = arith.constant dense<0.000000e+00> : vector<2x8x8xf32>
    %87 = tpu.matmul %82, %84, %cst_64 {dimension_numbers = #tpu.dot_dimension_numbers<[2], [2], [1], [1], [0, 0, 0, 1, 1, 1], [0], [0]>} : vector<2x8x8xbf16>, vector<2x8x8xbf16>, vector<2x8x8xf32> -> vector<2x8x8xf32>
    %cst_65 = arith.constant dense<0xFF800000> : vector<2x8xf32>
    %88 = vector.multi_reduction <maximumf>, %87, %cst_65 [2] : vector<2x8x8xf32> to vector<2x8xf32>
    %89 = vector.shape_cast %88 : vector<2x8xf32> to vector<2x8x1xf32>
    %90 = vector.broadcast %89 : vector<2x8x1xf32> to vector<2x8x8xf32>
    %91 = arith.subf %87, %90 : vector<2x8x8xf32>
    %92 = math.exp %91 : vector<2x8x8xf32>
    %cst_66 = arith.constant dense<0.000000e+00> : vector<2x8xf32>
    %93 = vector.multi_reduction <add>, %92, %cst_66 [2] : vector<2x8x8xf32> to vector<2x8xf32>
    %94 = vector.shape_cast %93 : vector<2x8xf32> to vector<2x8x1xf32>
    %95 = vector.broadcast %94 : vector<2x8x1xf32> to vector<2x8x8xf32>
    %96 = arith.divf %92, %95 : vector<2x8x8xf32>
    %97 = arith.truncf %96 : vector<2x8x8xf32> to vector<2x8x8xbf16>
    %cst_67 = arith.constant dense<0.000000e+00> : vector<2x8x8xf32>
    %98 = tpu.matmul %97, %86, %cst_67 {dimension_numbers = #tpu.dot_dimension_numbers<[2], [1], [1], [2], [0, 0, 0, 1, 1, 2], [0], [0]>} : vector<2x8x8xbf16>, vector<2x8x8xbf16>, vector<2x8x8xf32> -> vector<2x8x8xf32>
    %99 = vector.extract_strided_slice %58 {offsets = [0, 0, 16], sizes = [2, 8, 8], strides = [1, 1, 1]} : vector<2x8x32xf32> to vector<2x8x8xf32>
    %100 = arith.truncf %99 : vector<2x8x8xf32> to vector<2x8x8xbf16>
    %101 = vector.extract_strided_slice %60 {offsets = [0, 0, 16], sizes = [2, 8, 8], strides = [1, 1, 1]} : vector<2x8x32xf32> to vector<2x8x8xf32>
    %102 = arith.truncf %101 : vector<2x8x8xf32> to vector<2x8x8xbf16>
    %103 = vector.extract_strided_slice %62 {offsets = [0, 0, 16], sizes = [2, 8, 8], strides = [1, 1, 1]} : vector<2x8x32xf32> to vector<2x8x8xf32>
    %104 = arith.truncf %103 : vector<2x8x8xf32> to vector<2x8x8xbf16>
    %cst_68 = arith.constant dense<0.000000e+00> : vector<2x8x8xf32>
    %105 = tpu.matmul %100, %102, %cst_68 {dimension_numbers = #tpu.dot_dimension_numbers<[2], [2], [1], [1], [0, 0, 0, 1, 1, 1], [0], [0]>} : vector<2x8x8xbf16>, vector<2x8x8xbf16>, vector<2x8x8xf32> -> vector<2x8x8xf32>
    %cst_69 = arith.constant dense<0xFF800000> : vector<2x8xf32>
    %106 = vector.multi_reduction <maximumf>, %105, %cst_69 [2] : vector<2x8x8xf32> to vector<2x8xf32>
    %107 = vector.shape_cast %106 : vector<2x8xf32> to vector<2x8x1xf32>
    %108 = vector.broadcast %107 : vector<2x8x1xf32> to vector<2x8x8xf32>
    %109 = arith.subf %105, %108 : vector<2x8x8xf32>
    %110 = math.exp %109 : vector<2x8x8xf32>
    %cst_70 = arith.constant dense<0.000000e+00> : vector<2x8xf32>
    %111 = vector.multi_reduction <add>, %110, %cst_70 [2] : vector<2x8x8xf32> to vector<2x8xf32>
    %112 = vector.shape_cast %111 : vector<2x8xf32> to vector<2x8x1xf32>
    %113 = vector.broadcast %112 : vector<2x8x1xf32> to vector<2x8x8xf32>
    %114 = arith.divf %110, %113 : vector<2x8x8xf32>
    %115 = arith.truncf %114 : vector<2x8x8xf32> to vector<2x8x8xbf16>
    %cst_71 = arith.constant dense<0.000000e+00> : vector<2x8x8xf32>
    %116 = tpu.matmul %115, %104, %cst_71 {dimension_numbers = #tpu.dot_dimension_numbers<[2], [1], [1], [2], [0, 0, 0, 1, 1, 2], [0], [0]>} : vector<2x8x8xbf16>, vector<2x8x8xbf16>, vector<2x8x8xf32> -> vector<2x8x8xf32>
    %117 = vector.extract_strided_slice %58 {offsets = [0, 0, 24], sizes = [2, 8, 8], strides = [1, 1, 1]} : vector<2x8x32xf32> to vector<2x8x8xf32>
    %118 = arith.truncf %117 : vector<2x8x8xf32> to vector<2x8x8xbf16>
    %119 = vector.extract_strided_slice %60 {offsets = [0, 0, 24], sizes = [2, 8, 8], strides = [1, 1, 1]} : vector<2x8x32xf32> to vector<2x8x8xf32>
    %120 = arith.truncf %119 : vector<2x8x8xf32> to vector<2x8x8xbf16>
    %121 = vector.extract_strided_slice %62 {offsets = [0, 0, 24], sizes = [2, 8, 8], strides = [1, 1, 1]} : vector<2x8x32xf32> to vector<2x8x8xf32>
    %122 = arith.truncf %121 : vector<2x8x8xf32> to vector<2x8x8xbf16>
    %cst_72 = arith.constant dense<0.000000e+00> : vector<2x8x8xf32>
    %123 = tpu.matmul %118, %120, %cst_72 {dimension_numbers = #tpu.dot_dimension_numbers<[2], [2], [1], [1], [0, 0, 0, 1, 1, 1], [0], [0]>} : vector<2x8x8xbf16>, vector<2x8x8xbf16>, vector<2x8x8xf32> -> vector<2x8x8xf32>
    %cst_73 = arith.constant dense<0xFF800000> : vector<2x8xf32>
    %124 = vector.multi_reduction <maximumf>, %123, %cst_73 [2] : vector<2x8x8xf32> to vector<2x8xf32>
    %125 = vector.shape_cast %124 : vector<2x8xf32> to vector<2x8x1xf32>
    %126 = vector.broadcast %125 : vector<2x8x1xf32> to vector<2x8x8xf32>
    %127 = arith.subf %123, %126 : vector<2x8x8xf32>
    %128 = math.exp %127 : vector<2x8x8xf32>
    %cst_74 = arith.constant dense<0.000000e+00> : vector<2x8xf32>
    %129 = vector.multi_reduction <add>, %128, %cst_74 [2] : vector<2x8x8xf32> to vector<2x8xf32>
    %130 = vector.shape_cast %129 : vector<2x8xf32> to vector<2x8x1xf32>
    %131 = vector.broadcast %130 : vector<2x8x1xf32> to vector<2x8x8xf32>
    %132 = arith.divf %128, %131 : vector<2x8x8xf32>
    %133 = arith.truncf %132 : vector<2x8x8xf32> to vector<2x8x8xbf16>
    %cst_75 = arith.constant dense<0.000000e+00> : vector<2x8x8xf32>
    %134 = tpu.matmul %133, %122, %cst_75 {dimension_numbers = #tpu.dot_dimension_numbers<[2], [1], [1], [2], [0, 0, 0, 1, 1, 2], [0], [0]>} : vector<2x8x8xbf16>, vector<2x8x8xbf16>, vector<2x8x8xf32> -> vector<2x8x8xf32>
    %135 = tpu.concatenate %80, %98, %116, %134 in 2 : vector<2x8x8xf32>, vector<2x8x8xf32>, vector<2x8x8xf32>, vector<2x8x8xf32> -> vector<2x8x32xf32>
    %136 = vector.shape_cast %135 : vector<2x8x32xf32> to vector<16x32xf32>
    %137 = arith.truncf %136 : vector<16x32xf32> to vector<16x32xbf16>
    %cst_76 = arith.constant dense<0.000000e+00> : vector<16x32xf32>
    %138 = tpu.matmul %137, %32, %cst_76 {dimension_numbers = #tpu.dot_dimension_numbers<[1], [0], [0], [1], [0, 0, 1, 1], [], []>} : vector<16x32xbf16>, vector<32x32xbf16>, vector<16x32xf32> -> vector<16x32xf32>
    %139 = vector.broadcast %34 : vector<1x32xf32> to vector<16x32xf32>
    %140 = arith.addf %138, %139 : vector<16x32xf32>
    %141 = arith.addf %26, %140 : vector<16x32xf32>
    %cst_77 = arith.constant dense<0.000000e+00> : vector<16xf32>
    %142 = vector.multi_reduction <add>, %141, %cst_77 [1] : vector<16x32xf32> to vector<16xf32>
    %143 = vector.shape_cast %142 : vector<16xf32> to vector<16x1xf32>
    %cst_78 = arith.constant 3.200000e+01 : f32
    %144 = vector.broadcast %cst_78 : f32 to vector<16x1xf32>
    %145 = arith.divf %143, %144 : vector<16x1xf32>
    %146 = vector.broadcast %145 : vector<16x1xf32> to vector<16x32xf32>
    %147 = arith.subf %141, %146 : vector<16x32xf32>
    %148 = arith.mulf %147, %147 : vector<16x32xf32>
    %cst_79 = arith.constant dense<0.000000e+00> : vector<16xf32>
    %149 = vector.multi_reduction <add>, %148, %cst_79 [1] : vector<16x32xf32> to vector<16xf32>
    %150 = vector.shape_cast %149 : vector<16xf32> to vector<16x1xf32>
    %cst_80 = arith.constant 3.200000e+01 : f32
    %151 = vector.broadcast %cst_80 : f32 to vector<16x1xf32>
    %152 = arith.divf %150, %151 : vector<16x1xf32>
    %153 = vector.broadcast %145 : vector<16x1xf32> to vector<16x32xf32>
    %154 = arith.subf %141, %153 : vector<16x32xf32>
    %cst_81 = arith.constant 9.99999974E-6 : f32
    %155 = vector.broadcast %cst_81 : f32 to vector<16x1xf32>
    %156 = arith.addf %152, %155 : vector<16x1xf32>
    %157 = math.rsqrt %156 : vector<16x1xf32>
    %158 = vector.broadcast %157 : vector<16x1xf32> to vector<16x32xf32>
    %159 = arith.mulf %154, %158 : vector<16x32xf32>
    %160 = vector.broadcast %36 : vector<1x32xf32> to vector<16x32xf32>
    %161 = arith.mulf %159, %160 : vector<16x32xf32>
    %162 = vector.broadcast %38 : vector<1x32xf32> to vector<16x32xf32>
    %163 = arith.addf %161, %162 : vector<16x32xf32>
    %164 = arith.truncf %163 : vector<16x32xf32> to vector<16x32xbf16>
    %cst_82 = arith.constant dense<0.000000e+00> : vector<16x128xf32>
    %165 = tpu.matmul %164, %40, %cst_82 {dimension_numbers = #tpu.dot_dimension_numbers<[1], [0], [0], [1], [0, 0, 1, 1], [], []>} : vector<16x32xbf16>, vector<32x128xbf16>, vector<16x128xf32> -> vector<16x128xf32>
    %166 = vector.broadcast %42 : vector<1x128xf32> to vector<16x128xf32>
    %167 = arith.addf %165, %166 : vector<16x128xf32>
    %cst_83 = arith.constant 0.000000e+00 : f32
    %168 = vector.broadcast %cst_83 : f32 to vector<16x128xf32>
    %169 = arith.maximumf %167, %168 : vector<16x128xf32>
    %170 = arith.truncf %169 : vector<16x128xf32> to vector<16x128xbf16>
    %cst_84 = arith.constant dense<0.000000e+00> : vector<16x32xf32>
    %171 = tpu.matmul %170, %44, %cst_84 {dimension_numbers = #tpu.dot_dimension_numbers<[1], [0], [0], [1], [0, 0, 1, 1], [], []>} : vector<16x128xbf16>, vector<128x32xbf16>, vector<16x32xf32> -> vector<16x32xf32>
    %172 = vector.broadcast %46 : vector<1x32xf32> to vector<16x32xf32>
    %173 = arith.addf %171, %172 : vector<16x32xf32>
    %174 = arith.addf %163, %173 : vector<16x32xf32>
    %cst_85 = arith.constant dense<0.000000e+00> : vector<16xf32>
    %175 = vector.multi_reduction <add>, %174, %cst_85 [1] : vector<16x32xf32> to vector<16xf32>
    %176 = vector.shape_cast %175 : vector<16xf32> to vector<16x1xf32>
    %cst_86 = arith.constant 3.200000e+01 : f32
    %177 = vector.broadcast %cst_86 : f32 to vector<16x1xf32>
    %178 = arith.divf %176, %177 : vector<16x1xf32>
    %179 = vector.broadcast %178 : vector<16x1xf32> to vector<16x32xf32>
    %180 = arith.subf %174, %179 : vector<16x32xf32>
    %181 = arith.mulf %180, %180 : vector<16x32xf32>
    %cst_87 = arith.constant dense<0.000000e+00> : vector<16xf32>
    %182 = vector.multi_reduction <add>, %181, %cst_87 [1] : vector<16x32xf32> to vector<16xf32>
    %183 = vector.shape_cast %182 : vector<16xf32> to vector<16x1xf32>
    %cst_88 = arith.constant 3.200000e+01 : f32
    %184 = vector.broadcast %cst_88 : f32 to vector<16x1xf32>
    %185 = arith.divf %183, %184 : vector<16x1xf32>
    %186 = vector.broadcast %178 : vector<16x1xf32> to vector<16x32xf32>
    %187 = arith.subf %174, %186 : vector<16x32xf32>
    %cst_89 = arith.constant 9.99999974E-6 : f32
    %188 = vector.broadcast %cst_89 : f32 to vector<16x1xf32>
    %189 = arith.addf %185, %188 : vector<16x1xf32>
    %190 = math.rsqrt %189 : vector<16x1xf32>
    %191 = vector.broadcast %190 : vector<16x1xf32> to vector<16x32xf32>
    %192 = arith.mulf %187, %191 : vector<16x32xf32>
    %193 = vector.broadcast %48 : vector<1x32xf32> to vector<16x32xf32>
    %194 = arith.mulf %192, %193 : vector<16x32xf32>
    %195 = vector.broadcast %50 : vector<1x32xf32> to vector<16x32xf32>
    %196 = arith.addf %194, %195 : vector<16x32xf32>
    %c1 = arith.constant 1 : index
    %c0_90 = arith.constant 0 : index
    %c0_91 = arith.constant 0 : index
    %197 = vector.load %arg8[%c1, %c0_90, %c0_91] : memref<2x32x96xbf16, #tpu.memory_space<vmem>>, vector<1x32x96xbf16>
    %198 = vector.shape_cast %197 : vector<1x32x96xbf16> to vector<32x96xbf16>
    %c1_92 = arith.constant 1 : index
    %c0_93 = arith.constant 0 : index
    %c0_94 = arith.constant 0 : index
    %199 = vector.load %arg9[%c1_92, %c0_93, %c0_94] : memref<2x1x96xf32, #tpu.memory_space<vmem>>, vector<1x1x96xf32>
    %200 = vector.shape_cast %199 : vector<1x1x96xf32> to vector<1x96xf32>
    %c1_95 = arith.constant 1 : index
    %c0_96 = arith.constant 0 : index
    %c0_97 = arith.constant 0 : index
    %201 = vector.load %arg10[%c1_95, %c0_96, %c0_97] : memref<2x32x32xbf16, #tpu.memory_space<vmem>>, vector<1x32x32xbf16>
    %202 = vector.shape_cast %201 : vector<1x32x32xbf16> to vector<32x32xbf16>
    %c1_98 = arith.constant 1 : index
    %c0_99 = arith.constant 0 : index
    %c0_100 = arith.constant 0 : index
    %203 = vector.load %arg11[%c1_98, %c0_99, %c0_100] : memref<2x1x32xf32, #tpu.memory_space<vmem>>, vector<1x1x32xf32>
    %204 = vector.shape_cast %203 : vector<1x1x32xf32> to vector<1x32xf32>
    %c1_101 = arith.constant 1 : index
    %c0_102 = arith.constant 0 : index
    %c0_103 = arith.constant 0 : index
    %205 = vector.load %arg12[%c1_101, %c0_102, %c0_103] : memref<2x1x32xf32, #tpu.memory_space<vmem>>, vector<1x1x32xf32>
    %206 = vector.shape_cast %205 : vector<1x1x32xf32> to vector<1x32xf32>
    %c1_104 = arith.constant 1 : index
    %c0_105 = arith.constant 0 : index
    %c0_106 = arith.constant 0 : index
    %207 = vector.load %arg13[%c1_104, %c0_105, %c0_106] : memref<2x1x32xf32, #tpu.memory_space<vmem>>, vector<1x1x32xf32>
    %208 = vector.shape_cast %207 : vector<1x1x32xf32> to vector<1x32xf32>
    %c1_107 = arith.constant 1 : index
    %c0_108 = arith.constant 0 : index
    %c0_109 = arith.constant 0 : index
    %209 = vector.load %arg14[%c1_107, %c0_108, %c0_109] : memref<2x32x128xbf16, #tpu.memory_space<vmem>>, vector<1x32x128xbf16>
    %210 = vector.shape_cast %209 : vector<1x32x128xbf16> to vector<32x128xbf16>
    %c1_110 = arith.constant 1 : index
    %c0_111 = arith.constant 0 : index
    %c0_112 = arith.constant 0 : index
    %211 = vector.load %arg15[%c1_110, %c0_111, %c0_112] : memref<2x1x128xf32, #tpu.memory_space<vmem>>, vector<1x1x128xf32>
    %212 = vector.shape_cast %211 : vector<1x1x128xf32> to vector<1x128xf32>
    %c1_113 = arith.constant 1 : index
    %c0_114 = arith.constant 0 : index
    %c0_115 = arith.constant 0 : index
    %213 = vector.load %arg16[%c1_113, %c0_114, %c0_115] : memref<2x128x32xbf16, #tpu.memory_space<vmem>>, vector<1x128x32xbf16>
    %214 = vector.shape_cast %213 : vector<1x128x32xbf16> to vector<128x32xbf16>
    %c1_116 = arith.constant 1 : index
    %c0_117 = arith.constant 0 : index
    %c0_118 = arith.constant 0 : index
    %215 = vector.load %arg17[%c1_116, %c0_117, %c0_118] : memref<2x1x32xf32, #tpu.memory_space<vmem>>, vector<1x1x32xf32>
    %216 = vector.shape_cast %215 : vector<1x1x32xf32> to vector<1x32xf32>
    %c1_119 = arith.constant 1 : index
    %c0_120 = arith.constant 0 : index
    %c0_121 = arith.constant 0 : index
    %217 = vector.load %arg18[%c1_119, %c0_120, %c0_121] : memref<2x1x32xf32, #tpu.memory_space<vmem>>, vector<1x1x32xf32>
    %218 = vector.shape_cast %217 : vector<1x1x32xf32> to vector<1x32xf32>
    %c1_122 = arith.constant 1 : index
    %c0_123 = arith.constant 0 : index
    %c0_124 = arith.constant 0 : index
    %219 = vector.load %arg19[%c1_122, %c0_123, %c0_124] : memref<2x1x32xf32, #tpu.memory_space<vmem>>, vector<1x1x32xf32>
    %220 = vector.shape_cast %219 : vector<1x1x32xf32> to vector<1x32xf32>
    %221 = arith.truncf %196 : vector<16x32xf32> to vector<16x32xbf16>
    %cst_125 = arith.constant dense<0.000000e+00> : vector<16x96xf32>
    %222 = tpu.matmul %221, %198, %cst_125 {dimension_numbers = #tpu.dot_dimension_numbers<[1], [0], [0], [1], [0, 0, 1, 1], [], []>} : vector<16x32xbf16>, vector<32x96xbf16>, vector<16x96xf32> -> vector<16x96xf32>
    %223 = vector.broadcast %200 : vector<1x96xf32> to vector<16x96xf32>
    %224 = arith.addf %222, %223 : vector<16x96xf32>
    %225 = vector.extract_strided_slice %224 {offsets = [0, 0], sizes = [16, 32], strides = [1, 1]} : vector<16x96xf32> to vector<16x32xf32>
    %cst_126 = arith.constant 0.353553385 : f32
    %226 = vector.broadcast %cst_126 : f32 to vector<16x32xf32>
    %227 = arith.mulf %225, %226 : vector<16x32xf32>
    %228 = vector.shape_cast %227 : vector<16x32xf32> to vector<2x8x32xf32>
    %229 = vector.extract_strided_slice %224 {offsets = [0, 32], sizes = [16, 32], strides = [1, 1]} : vector<16x96xf32> to vector<16x32xf32>
    %230 = vector.shape_cast %229 : vector<16x32xf32> to vector<2x8x32xf32>
    %231 = vector.extract_strided_slice %224 {offsets = [0, 64], sizes = [16, 32], strides = [1, 1]} : vector<16x96xf32> to vector<16x32xf32>
    %232 = vector.shape_cast %231 : vector<16x32xf32> to vector<2x8x32xf32>
    %233 = vector.extract_strided_slice %228 {offsets = [0, 0, 0], sizes = [2, 8, 8], strides = [1, 1, 1]} : vector<2x8x32xf32> to vector<2x8x8xf32>
    %234 = arith.truncf %233 : vector<2x8x8xf32> to vector<2x8x8xbf16>
    %235 = vector.extract_strided_slice %230 {offsets = [0, 0, 0], sizes = [2, 8, 8], strides = [1, 1, 1]} : vector<2x8x32xf32> to vector<2x8x8xf32>
    %236 = arith.truncf %235 : vector<2x8x8xf32> to vector<2x8x8xbf16>
    %237 = vector.extract_strided_slice %232 {offsets = [0, 0, 0], sizes = [2, 8, 8], strides = [1, 1, 1]} : vector<2x8x32xf32> to vector<2x8x8xf32>
    %238 = arith.truncf %237 : vector<2x8x8xf32> to vector<2x8x8xbf16>
    %cst_127 = arith.constant dense<0.000000e+00> : vector<2x8x8xf32>
    %239 = tpu.matmul %234, %236, %cst_127 {dimension_numbers = #tpu.dot_dimension_numbers<[2], [2], [1], [1], [0, 0, 0, 1, 1, 1], [0], [0]>} : vector<2x8x8xbf16>, vector<2x8x8xbf16>, vector<2x8x8xf32> -> vector<2x8x8xf32>
    %cst_128 = arith.constant dense<0xFF800000> : vector<2x8xf32>
    %240 = vector.multi_reduction <maximumf>, %239, %cst_128 [2] : vector<2x8x8xf32> to vector<2x8xf32>
    %241 = vector.shape_cast %240 : vector<2x8xf32> to vector<2x8x1xf32>
    %242 = vector.broadcast %241 : vector<2x8x1xf32> to vector<2x8x8xf32>
    %243 = arith.subf %239, %242 : vector<2x8x8xf32>
    %244 = math.exp %243 : vector<2x8x8xf32>
    %cst_129 = arith.constant dense<0.000000e+00> : vector<2x8xf32>
    %245 = vector.multi_reduction <add>, %244, %cst_129 [2] : vector<2x8x8xf32> to vector<2x8xf32>
    %246 = vector.shape_cast %245 : vector<2x8xf32> to vector<2x8x1xf32>
    %247 = vector.broadcast %246 : vector<2x8x1xf32> to vector<2x8x8xf32>
    %248 = arith.divf %244, %247 : vector<2x8x8xf32>
    %249 = arith.truncf %248 : vector<2x8x8xf32> to vector<2x8x8xbf16>
    %cst_130 = arith.constant dense<0.000000e+00> : vector<2x8x8xf32>
    %250 = tpu.matmul %249, %238, %cst_130 {dimension_numbers = #tpu.dot_dimension_numbers<[2], [1], [1], [2], [0, 0, 0, 1, 1, 2], [0], [0]>} : vector<2x8x8xbf16>, vector<2x8x8xbf16>, vector<2x8x8xf32> -> vector<2x8x8xf32>
    %251 = vector.extract_strided_slice %228 {offsets = [0, 0, 8], sizes = [2, 8, 8], strides = [1, 1, 1]} : vector<2x8x32xf32> to vector<2x8x8xf32>
    %252 = arith.truncf %251 : vector<2x8x8xf32> to vector<2x8x8xbf16>
    %253 = vector.extract_strided_slice %230 {offsets = [0, 0, 8], sizes = [2, 8, 8], strides = [1, 1, 1]} : vector<2x8x32xf32> to vector<2x8x8xf32>
    %254 = arith.truncf %253 : vector<2x8x8xf32> to vector<2x8x8xbf16>
    %255 = vector.extract_strided_slice %232 {offsets = [0, 0, 8], sizes = [2, 8, 8], strides = [1, 1, 1]} : vector<2x8x32xf32> to vector<2x8x8xf32>
    %256 = arith.truncf %255 : vector<2x8x8xf32> to vector<2x8x8xbf16>
    %cst_131 = arith.constant dense<0.000000e+00> : vector<2x8x8xf32>
    %257 = tpu.matmul %252, %254, %cst_131 {dimension_numbers = #tpu.dot_dimension_numbers<[2], [2], [1], [1], [0, 0, 0, 1, 1, 1], [0], [0]>} : vector<2x8x8xbf16>, vector<2x8x8xbf16>, vector<2x8x8xf32> -> vector<2x8x8xf32>
    %cst_132 = arith.constant dense<0xFF800000> : vector<2x8xf32>
    %258 = vector.multi_reduction <maximumf>, %257, %cst_132 [2] : vector<2x8x8xf32> to vector<2x8xf32>
    %259 = vector.shape_cast %258 : vector<2x8xf32> to vector<2x8x1xf32>
    %260 = vector.broadcast %259 : vector<2x8x1xf32> to vector<2x8x8xf32>
    %261 = arith.subf %257, %260 : vector<2x8x8xf32>
    %262 = math.exp %261 : vector<2x8x8xf32>
    %cst_133 = arith.constant dense<0.000000e+00> : vector<2x8xf32>
    %263 = vector.multi_reduction <add>, %262, %cst_133 [2] : vector<2x8x8xf32> to vector<2x8xf32>
    %264 = vector.shape_cast %263 : vector<2x8xf32> to vector<2x8x1xf32>
    %265 = vector.broadcast %264 : vector<2x8x1xf32> to vector<2x8x8xf32>
    %266 = arith.divf %262, %265 : vector<2x8x8xf32>
    %267 = arith.truncf %266 : vector<2x8x8xf32> to vector<2x8x8xbf16>
    %cst_134 = arith.constant dense<0.000000e+00> : vector<2x8x8xf32>
    %268 = tpu.matmul %267, %256, %cst_134 {dimension_numbers = #tpu.dot_dimension_numbers<[2], [1], [1], [2], [0, 0, 0, 1, 1, 2], [0], [0]>} : vector<2x8x8xbf16>, vector<2x8x8xbf16>, vector<2x8x8xf32> -> vector<2x8x8xf32>
    %269 = vector.extract_strided_slice %228 {offsets = [0, 0, 16], sizes = [2, 8, 8], strides = [1, 1, 1]} : vector<2x8x32xf32> to vector<2x8x8xf32>
    %270 = arith.truncf %269 : vector<2x8x8xf32> to vector<2x8x8xbf16>
    %271 = vector.extract_strided_slice %230 {offsets = [0, 0, 16], sizes = [2, 8, 8], strides = [1, 1, 1]} : vector<2x8x32xf32> to vector<2x8x8xf32>
    %272 = arith.truncf %271 : vector<2x8x8xf32> to vector<2x8x8xbf16>
    %273 = vector.extract_strided_slice %232 {offsets = [0, 0, 16], sizes = [2, 8, 8], strides = [1, 1, 1]} : vector<2x8x32xf32> to vector<2x8x8xf32>
    %274 = arith.truncf %273 : vector<2x8x8xf32> to vector<2x8x8xbf16>
    %cst_135 = arith.constant dense<0.000000e+00> : vector<2x8x8xf32>
    %275 = tpu.matmul %270, %272, %cst_135 {dimension_numbers = #tpu.dot_dimension_numbers<[2], [2], [1], [1], [0, 0, 0, 1, 1, 1], [0], [0]>} : vector<2x8x8xbf16>, vector<2x8x8xbf16>, vector<2x8x8xf32> -> vector<2x8x8xf32>
    %cst_136 = arith.constant dense<0xFF800000> : vector<2x8xf32>
    %276 = vector.multi_reduction <maximumf>, %275, %cst_136 [2] : vector<2x8x8xf32> to vector<2x8xf32>
    %277 = vector.shape_cast %276 : vector<2x8xf32> to vector<2x8x1xf32>
    %278 = vector.broadcast %277 : vector<2x8x1xf32> to vector<2x8x8xf32>
    %279 = arith.subf %275, %278 : vector<2x8x8xf32>
    %280 = math.exp %279 : vector<2x8x8xf32>
    %cst_137 = arith.constant dense<0.000000e+00> : vector<2x8xf32>
    %281 = vector.multi_reduction <add>, %280, %cst_137 [2] : vector<2x8x8xf32> to vector<2x8xf32>
    %282 = vector.shape_cast %281 : vector<2x8xf32> to vector<2x8x1xf32>
    %283 = vector.broadcast %282 : vector<2x8x1xf32> to vector<2x8x8xf32>
    %284 = arith.divf %280, %283 : vector<2x8x8xf32>
    %285 = arith.truncf %284 : vector<2x8x8xf32> to vector<2x8x8xbf16>
    %cst_138 = arith.constant dense<0.000000e+00> : vector<2x8x8xf32>
    %286 = tpu.matmul %285, %274, %cst_138 {dimension_numbers = #tpu.dot_dimension_numbers<[2], [1], [1], [2], [0, 0, 0, 1, 1, 2], [0], [0]>} : vector<2x8x8xbf16>, vector<2x8x8xbf16>, vector<2x8x8xf32> -> vector<2x8x8xf32>
    %287 = vector.extract_strided_slice %228 {offsets = [0, 0, 24], sizes = [2, 8, 8], strides = [1, 1, 1]} : vector<2x8x32xf32> to vector<2x8x8xf32>
    %288 = arith.truncf %287 : vector<2x8x8xf32> to vector<2x8x8xbf16>
    %289 = vector.extract_strided_slice %230 {offsets = [0, 0, 24], sizes = [2, 8, 8], strides = [1, 1, 1]} : vector<2x8x32xf32> to vector<2x8x8xf32>
    %290 = arith.truncf %289 : vector<2x8x8xf32> to vector<2x8x8xbf16>
    %291 = vector.extract_strided_slice %232 {offsets = [0, 0, 24], sizes = [2, 8, 8], strides = [1, 1, 1]} : vector<2x8x32xf32> to vector<2x8x8xf32>
    %292 = arith.truncf %291 : vector<2x8x8xf32> to vector<2x8x8xbf16>
    %cst_139 = arith.constant dense<0.000000e+00> : vector<2x8x8xf32>
    %293 = tpu.matmul %288, %290, %cst_139 {dimension_numbers = #tpu.dot_dimension_numbers<[2], [2], [1], [1], [0, 0, 0, 1, 1, 1], [0], [0]>} : vector<2x8x8xbf16>, vector<2x8x8xbf16>, vector<2x8x8xf32> -> vector<2x8x8xf32>
    %cst_140 = arith.constant dense<0xFF800000> : vector<2x8xf32>
    %294 = vector.multi_reduction <maximumf>, %293, %cst_140 [2] : vector<2x8x8xf32> to vector<2x8xf32>
    %295 = vector.shape_cast %294 : vector<2x8xf32> to vector<2x8x1xf32>
    %296 = vector.broadcast %295 : vector<2x8x1xf32> to vector<2x8x8xf32>
    %297 = arith.subf %293, %296 : vector<2x8x8xf32>
    %298 = math.exp %297 : vector<2x8x8xf32>
    %cst_141 = arith.constant dense<0.000000e+00> : vector<2x8xf32>
    %299 = vector.multi_reduction <add>, %298, %cst_141 [2] : vector<2x8x8xf32> to vector<2x8xf32>
    %300 = vector.shape_cast %299 : vector<2x8xf32> to vector<2x8x1xf32>
    %301 = vector.broadcast %300 : vector<2x8x1xf32> to vector<2x8x8xf32>
    %302 = arith.divf %298, %301 : vector<2x8x8xf32>
    %303 = arith.truncf %302 : vector<2x8x8xf32> to vector<2x8x8xbf16>
    %cst_142 = arith.constant dense<0.000000e+00> : vector<2x8x8xf32>
    %304 = tpu.matmul %303, %292, %cst_142 {dimension_numbers = #tpu.dot_dimension_numbers<[2], [1], [1], [2], [0, 0, 0, 1, 1, 2], [0], [0]>} : vector<2x8x8xbf16>, vector<2x8x8xbf16>, vector<2x8x8xf32> -> vector<2x8x8xf32>
    %305 = tpu.concatenate %250, %268, %286, %304 in 2 : vector<2x8x8xf32>, vector<2x8x8xf32>, vector<2x8x8xf32>, vector<2x8x8xf32> -> vector<2x8x32xf32>
    %306 = vector.shape_cast %305 : vector<2x8x32xf32> to vector<16x32xf32>
    %307 = arith.truncf %306 : vector<16x32xf32> to vector<16x32xbf16>
    %cst_143 = arith.constant dense<0.000000e+00> : vector<16x32xf32>
    %308 = tpu.matmul %307, %202, %cst_143 {dimension_numbers = #tpu.dot_dimension_numbers<[1], [0], [0], [1], [0, 0, 1, 1], [], []>} : vector<16x32xbf16>, vector<32x32xbf16>, vector<16x32xf32> -> vector<16x32xf32>
    %309 = vector.broadcast %204 : vector<1x32xf32> to vector<16x32xf32>
    %310 = arith.addf %308, %309 : vector<16x32xf32>
    %311 = arith.addf %196, %310 : vector<16x32xf32>
    %cst_144 = arith.constant dense<0.000000e+00> : vector<16xf32>
    %312 = vector.multi_reduction <add>, %311, %cst_144 [1] : vector<16x32xf32> to vector<16xf32>
    %313 = vector.shape_cast %312 : vector<16xf32> to vector<16x1xf32>
    %cst_145 = arith.constant 3.200000e+01 : f32
    %314 = vector.broadcast %cst_145 : f32 to vector<16x1xf32>
    %315 = arith.divf %313, %314 : vector<16x1xf32>
    %316 = vector.broadcast %315 : vector<16x1xf32> to vector<16x32xf32>
    %317 = arith.subf %311, %316 : vector<16x32xf32>
    %318 = arith.mulf %317, %317 : vector<16x32xf32>
    %cst_146 = arith.constant dense<0.000000e+00> : vector<16xf32>
    %319 = vector.multi_reduction <add>, %318, %cst_146 [1] : vector<16x32xf32> to vector<16xf32>
    %320 = vector.shape_cast %319 : vector<16xf32> to vector<16x1xf32>
    %cst_147 = arith.constant 3.200000e+01 : f32
    %321 = vector.broadcast %cst_147 : f32 to vector<16x1xf32>
    %322 = arith.divf %320, %321 : vector<16x1xf32>
    %323 = vector.broadcast %315 : vector<16x1xf32> to vector<16x32xf32>
    %324 = arith.subf %311, %323 : vector<16x32xf32>
    %cst_148 = arith.constant 9.99999974E-6 : f32
    %325 = vector.broadcast %cst_148 : f32 to vector<16x1xf32>
    %326 = arith.addf %322, %325 : vector<16x1xf32>
    %327 = math.rsqrt %326 : vector<16x1xf32>
    %328 = vector.broadcast %327 : vector<16x1xf32> to vector<16x32xf32>
    %329 = arith.mulf %324, %328 : vector<16x32xf32>
    %330 = vector.broadcast %206 : vector<1x32xf32> to vector<16x32xf32>
    %331 = arith.mulf %329, %330 : vector<16x32xf32>
    %332 = vector.broadcast %208 : vector<1x32xf32> to vector<16x32xf32>
    %333 = arith.addf %331, %332 : vector<16x32xf32>
    %334 = arith.truncf %333 : vector<16x32xf32> to vector<16x32xbf16>
    %cst_149 = arith.constant dense<0.000000e+00> : vector<16x128xf32>
    %335 = tpu.matmul %334, %210, %cst_149 {dimension_numbers = #tpu.dot_dimension_numbers<[1], [0], [0], [1], [0, 0, 1, 1], [], []>} : vector<16x32xbf16>, vector<32x128xbf16>, vector<16x128xf32> -> vector<16x128xf32>
    %336 = vector.broadcast %212 : vector<1x128xf32> to vector<16x128xf32>
    %337 = arith.addf %335, %336 : vector<16x128xf32>
    %cst_150 = arith.constant 0.000000e+00 : f32
    %338 = vector.broadcast %cst_150 : f32 to vector<16x128xf32>
    %339 = arith.maximumf %337, %338 : vector<16x128xf32>
    %340 = arith.truncf %339 : vector<16x128xf32> to vector<16x128xbf16>
    %cst_151 = arith.constant dense<0.000000e+00> : vector<16x32xf32>
    %341 = tpu.matmul %340, %214, %cst_151 {dimension_numbers = #tpu.dot_dimension_numbers<[1], [0], [0], [1], [0, 0, 1, 1], [], []>} : vector<16x128xbf16>, vector<128x32xbf16>, vector<16x32xf32> -> vector<16x32xf32>
    %342 = vector.broadcast %216 : vector<1x32xf32> to vector<16x32xf32>
    %343 = arith.addf %341, %342 : vector<16x32xf32>
    %344 = arith.addf %333, %343 : vector<16x32xf32>
    %cst_152 = arith.constant dense<0.000000e+00> : vector<16xf32>
    %345 = vector.multi_reduction <add>, %344, %cst_152 [1] : vector<16x32xf32> to vector<16xf32>
    %346 = vector.shape_cast %345 : vector<16xf32> to vector<16x1xf32>
    %cst_153 = arith.constant 3.200000e+01 : f32
    %347 = vector.broadcast %cst_153 : f32 to vector<16x1xf32>
    %348 = arith.divf %346, %347 : vector<16x1xf32>
    %349 = vector.broadcast %348 : vector<16x1xf32> to vector<16x32xf32>
    %350 = arith.subf %344, %349 : vector<16x32xf32>
    %351 = arith.mulf %350, %350 : vector<16x32xf32>
    %cst_154 = arith.constant dense<0.000000e+00> : vector<16xf32>
    %352 = vector.multi_reduction <add>, %351, %cst_154 [1] : vector<16x32xf32> to vector<16xf32>
    %353 = vector.shape_cast %352 : vector<16xf32> to vector<16x1xf32>
    %cst_155 = arith.constant 3.200000e+01 : f32
    %354 = vector.broadcast %cst_155 : f32 to vector<16x1xf32>
    %355 = arith.divf %353, %354 : vector<16x1xf32>
    %356 = vector.broadcast %348 : vector<16x1xf32> to vector<16x32xf32>
    %357 = arith.subf %344, %356 : vector<16x32xf32>
    %cst_156 = arith.constant 9.99999974E-6 : f32
    %358 = vector.broadcast %cst_156 : f32 to vector<16x1xf32>
    %359 = arith.addf %355, %358 : vector<16x1xf32>
    %360 = math.rsqrt %359 : vector<16x1xf32>
    %361 = vector.broadcast %360 : vector<16x1xf32> to vector<16x32xf32>
    %362 = arith.mulf %357, %361 : vector<16x32xf32>
    %363 = vector.broadcast %218 : vector<1x32xf32> to vector<16x32xf32>
    %364 = arith.mulf %362, %363 : vector<16x32xf32>
    %365 = vector.broadcast %220 : vector<1x32xf32> to vector<16x32xf32>
    %366 = arith.addf %364, %365 : vector<16x32xf32>
    %367 = arith.truncf %366 : vector<16x32xf32> to vector<16x32xbf16>
    %c0_157 = arith.constant 0 : index
    %c0_158 = arith.constant 0 : index
    %368 = vector.load %arg20[%c0_157, %c0_158] : memref<32x16xbf16, #tpu.memory_space<vmem>>, vector<32x16xbf16>
    %cst_159 = arith.constant dense<0.000000e+00> : vector<16x16xf32>
    %369 = tpu.matmul %367, %368, %cst_159 {dimension_numbers = #tpu.dot_dimension_numbers<[1], [0], [0], [1], [0, 0, 1, 1], [], []>} : vector<16x32xbf16>, vector<32x16xbf16>, vector<16x16xf32> -> vector<16x16xf32>
    %c0_160 = arith.constant 0 : index
    %c0_161 = arith.constant 0 : index
    %370 = vector.load %arg21[%c0_160, %c0_161] : memref<1x16xf32, #tpu.memory_space<vmem>>, vector<1x16xf32>
    %371 = vector.broadcast %370 : vector<1x16xf32> to vector<16x16xf32>
    %372 = arith.addf %369, %371 : vector<16x16xf32>
    %cst_162 = arith.constant 0.000000e+00 : f32
    %373 = vector.broadcast %cst_162 : f32 to vector<16x16xf32>
    %374 = arith.cmpf ogt, %372, %373 : vector<16x16xf32>
    %cst_163 = arith.constant 0.00999999977 : f32
    %375 = vector.broadcast %cst_163 : f32 to vector<16x16xf32>
    %376 = arith.mulf %372, %375 : vector<16x16xf32>
    %377 = arith.select %374, %372, %376 : vector<16x16xi1>, vector<16x16xf32>
    %378 = arith.truncf %377 : vector<16x16xf32> to vector<16x16xbf16>
    %c0_164 = arith.constant 0 : index
    %c0_165 = arith.constant 0 : index
    %379 = vector.load %arg22[%c0_164, %c0_165] : memref<16x8xbf16, #tpu.memory_space<vmem>>, vector<16x8xbf16>
    %cst_166 = arith.constant dense<0.000000e+00> : vector<16x8xf32>
    %380 = tpu.matmul %378, %379, %cst_166 {dimension_numbers = #tpu.dot_dimension_numbers<[1], [0], [0], [1], [0, 0, 1, 1], [], []>} : vector<16x16xbf16>, vector<16x8xbf16>, vector<16x8xf32> -> vector<16x8xf32>
    %c0_167 = arith.constant 0 : index
    %c0_168 = arith.constant 0 : index
    %381 = vector.load %arg23[%c0_167, %c0_168] : memref<1x8xf32, #tpu.memory_space<vmem>>, vector<1x8xf32>
    %382 = vector.broadcast %381 : vector<1x8xf32> to vector<16x8xf32>
    %383 = arith.addf %380, %382 : vector<16x8xf32>
    %c0_169 = arith.constant 0 : index
    %c0_170 = arith.constant 0 : index
    %c0_171 = arith.constant 0 : index
    %384 = vector.load %arg25[%c0_169, %c0_170, %c0_171] : memref<1x16x8xf32, #tpu.memory_space<vmem>>, vector<1x16x8xf32>
    %385 = vector.shape_cast %384 : vector<1x16x8xf32> to vector<16x8xf32>
    %386 = vector.shape_cast %383 : vector<16x8xf32> to vector<1x16x8xf32>
    tpu.vector_store %arg25[%c0_169, %c0_170, %c0_171], %386 {strides = array<i32>} : memref<1x16x8xf32, #tpu.memory_space<vmem>>, vector<1x16x8xf32>,
    return
  }
  func.func @transform_0(%arg0: i32) -> (i32, i32, i32) {
    %c0_i32 = arith.constant 0 : i32
    %c0_i32_0 = arith.constant 0 : i32
    %c0_i32_1 = arith.constant 0 : i32
    return %arg0, %c0_i32, %c0_i32_0 : i32, i32, i32
  }
  func.func @transform_1(%arg0: i32) -> (i32, i32, i32) {
    %c0_i32 = arith.constant 0 : i32
    %c0_i32_0 = arith.constant 0 : i32
    %c0_i32_1 = arith.constant 0 : i32
    return %arg0, %c0_i32, %c0_i32_0 : i32, i32, i32
  }
  func.func @transform_2(%arg0: i32) -> (i32, i32, i32) {
    %c0_i32 = arith.constant 0 : i32
    %c0_i32_0 = arith.constant 0 : i32
    %c0_i32_1 = arith.constant 0 : i32
    return %arg0, %c0_i32, %c0_i32_0 : i32, i32, i32
  }
  func.func @transform_3(%arg0: i32) -> (i32, i32) {
    %c0_i32 = arith.constant 0 : i32
    %c0_i32_0 = arith.constant 0 : i32
    %c0_i32_1 = arith.constant 0 : i32
    return %c0_i32, %c0_i32_0 : i32, i32
  }
  func.func @transform_4(%arg0: i32) -> (i32, i32) {
    %c0_i32 = arith.constant 0 : i32
    %c0_i32_0 = arith.constant 0 : i32
    %c0_i32_1 = arith.constant 0 : i32
    return %c0_i32, %c0_i32_0 : i32, i32
  }
  func.func @transform_5(%arg0: i32) -> (i32, i32) {
    %c0_i32 = arith.constant 0 : i32
    %c0_i32_0 = arith.constant 0 : i32
    %c0_i32_1 = arith.constant 0 : i32
    return %c0_i32, %c0_i32_0 : i32, i32
  }
  func.func @transform_6(%arg0: i32) -> (i32, i32) {
    %c0_i32 = arith.constant 0 : i32
    %c0_i32_0 = arith.constant 0 : i32
    %c0_i32_1 = arith.constant 0 : i32
    return %c0_i32, %c0_i32_0 : i32, i32
  }
  func.func @transform_7(%arg0: i32) -> (i32, i32, i32) {
    %c0_i32 = arith.constant 0 : i32
    %c0_i32_0 = arith.constant 0 : i32
    %c0_i32_1 = arith.constant 0 : i32
    %c0_i32_2 = arith.constant 0 : i32
    return %c0_i32, %c0_i32_0, %c0_i32_1 : i32, i32, i32
  }
  func.func @transform_8(%arg0: i32) -> (i32, i32, i32) {
    %c0_i32 = arith.constant 0 : i32
    %c0_i32_0 = arith.constant 0 : i32
    %c0_i32_1 = arith.constant 0 : i32
    %c0_i32_2 = arith.constant 0 : i32
    return %c0_i32, %c0_i32_0, %c0_i32_1 : i32, i32, i32
  }
  func.func @transform_9(%arg0: i32) -> (i32, i32, i32) {
    %c0_i32 = arith.constant 0 : i32
    %c0_i32_0 = arith.constant 0 : i32
    %c0_i32_1 = arith.constant 0 : i32
    %c0_i32_2 = arith.constant 0 : i32
    return %c0_i32, %c0_i32_0, %c0_i32_1 : i32, i32, i32
  }
  func.func @transform_10(%arg0: i32) -> (i32, i32, i32) {
    %c0_i32 = arith.constant 0 : i32
    %c0_i32_0 = arith.constant 0 : i32
    %c0_i32_1 = arith.constant 0 : i32
    %c0_i32_2 = arith.constant 0 : i32
    return %c0_i32, %c0_i32_0, %c0_i32_1 : i32, i32, i32
  }
  func.func @transform_11(%arg0: i32) -> (i32, i32, i32) {
    %c0_i32 = arith.constant 0 : i32
    %c0_i32_0 = arith.constant 0 : i32
    %c0_i32_1 = arith.constant 0 : i32
    %c0_i32_2 = arith.constant 0 : i32
    return %c0_i32, %c0_i32_0, %c0_i32_1 : i32, i32, i32
  }
  func.func @transform_12(%arg0: i32) -> (i32, i32, i32) {
    %c0_i32 = arith.constant 0 : i32
    %c0_i32_0 = arith.constant 0 : i32
    %c0_i32_1 = arith.constant 0 : i32
    %c0_i32_2 = arith.constant 0 : i32
    return %c0_i32, %c0_i32_0, %c0_i32_1 : i32, i32, i32
  }
  func.func @transform_13(%arg0: i32) -> (i32, i32, i32) {
    %c0_i32 = arith.constant 0 : i32
    %c0_i32_0 = arith.constant 0 : i32
    %c0_i32_1 = arith.constant 0 : i32
    %c0_i32_2 = arith.constant 0 : i32
    return %c0_i32, %c0_i32_0, %c0_i32_1 : i32, i32, i32
  }
  func.func @transform_14(%arg0: i32) -> (i32, i32, i32) {
    %c0_i32 = arith.constant 0 : i32
    %c0_i32_0 = arith.constant 0 : i32
    %c0_i32_1 = arith.constant 0 : i32
    %c0_i32_2 = arith.constant 0 : i32
    return %c0_i32, %c0_i32_0, %c0_i32_1 : i32, i32, i32
  }
  func.func @transform_15(%arg0: i32) -> (i32, i32, i32) {
    %c0_i32 = arith.constant 0 : i32
    %c0_i32_0 = arith.constant 0 : i32
    %c0_i32_1 = arith.constant 0 : i32
    %c0_i32_2 = arith.constant 0 : i32
    return %c0_i32, %c0_i32_0, %c0_i32_1 : i32, i32, i32
  }
  func.func @transform_16(%arg0: i32) -> (i32, i32, i32) {
    %c0_i32 = arith.constant 0 : i32
    %c0_i32_0 = arith.constant 0 : i32
    %c0_i32_1 = arith.constant 0 : i32
    %c0_i32_2 = arith.constant 0 : i32
    return %c0_i32, %c0_i32_0, %c0_i32_1 : i32, i32, i32
  }
  func.func @transform_17(%arg0: i32) -> (i32, i32, i32) {
    %c0_i32 = arith.constant 0 : i32
    %c0_i32_0 = arith.constant 0 : i32
    %c0_i32_1 = arith.constant 0 : i32
    %c0_i32_2 = arith.constant 0 : i32
    return %c0_i32, %c0_i32_0, %c0_i32_1 : i32, i32, i32
  }
  func.func @transform_18(%arg0: i32) -> (i32, i32, i32) {
    %c0_i32 = arith.constant 0 : i32
    %c0_i32_0 = arith.constant 0 : i32
    %c0_i32_1 = arith.constant 0 : i32
    %c0_i32_2 = arith.constant 0 : i32
    return %c0_i32, %c0_i32_0, %c0_i32_1 : i32, i32, i32
  }
  func.func @transform_19(%arg0: i32) -> (i32, i32) {
    %c0_i32 = arith.constant 0 : i32
    %c0_i32_0 = arith.constant 0 : i32
    %c0_i32_1 = arith.constant 0 : i32
    return %c0_i32, %c0_i32_0 : i32, i32
  }
  func.func @transform_20(%arg0: i32) -> (i32, i32) {
    %c0_i32 = arith.constant 0 : i32
    %c0_i32_0 = arith.constant 0 : i32
    %c0_i32_1 = arith.constant 0 : i32
    return %c0_i32, %c0_i32_0 : i32, i32
  }
  func.func @transform_21(%arg0: i32) -> (i32, i32) {
    %c0_i32 = arith.constant 0 : i32
    %c0_i32_0 = arith.constant 0 : i32
    %c0_i32_1 = arith.constant 0 : i32
    return %c0_i32, %c0_i32_0 : i32, i32
  }
  func.func @transform_22(%arg0: i32) -> (i32, i32) {
    %c0_i32 = arith.constant 0 : i32
    %c0_i32_0 = arith.constant 0 : i32
    %c0_i32_1 = arith.constant 0 : i32
    return %c0_i32, %c0_i32_0 : i32, i32
  }
  func.func @transform_23(%arg0: i32) -> (i32, i32, i32) {
    %c0_i32 = arith.constant 0 : i32
    %c0_i32_0 = arith.constant 0 : i32
    %c0_i32_1 = arith.constant 0 : i32
    return %arg0, %c0_i32, %c0_i32_0 : i32, i32, i32
  }
  func.func @transform_24(%arg0: i32) -> (i32, i32, i32) {
    %c0_i32 = arith.constant 0 : i32
    %c0_i32_0 = arith.constant 0 : i32
    %c0_i32_1 = arith.constant 0 : i32
    return %arg0, %c0_i32, %c0_i32_0 : i32, i32, i32
  }
}

module attributes {stable_mosaic.version = 11 : i64} {
  func.func @_mlp_kernel(%arg0: i32, %arg1: memref<2x128xf32, #tpu.memory_space<vmem>>, %arg2: memref<128x64xbf16, #tpu.memory_space<vmem>>, %arg3: memref<1x64xf32, #tpu.memory_space<vmem>>, %arg4: memref<64x16xbf16, #tpu.memory_space<vmem>>, %arg5: memref<1x16xf32, #tpu.memory_space<vmem>>, %arg6: memref<16x4xbf16, #tpu.memory_space<vmem>>, %arg7: memref<1x4xf32, #tpu.memory_space<vmem>>, %arg8: memref<4x2xbf16, #tpu.memory_space<vmem>>, %arg9: memref<1x2xf32, #tpu.memory_space<vmem>>, %arg10: memref<2x2xf32, #tpu.memory_space<vmem>>) attributes {dimension_semantics = [#tpu.dimension_semantics<parallel>], iteration_bounds = array<i64: 1>, scalar_prefetch = 0 : i64, scratch_operands = 0 : i64, tpu.core_type = #tpu.core_type<tc>, window_params = [{transform_indices = @transform_0, window_bounds = array<i64: 2, 128>}, {pipeline_mode = #tpu.pipeline_mode<synchronous>, transform_indices = @transform_1, window_bounds = array<i64: 128, 64>}, {pipeline_mode = #tpu.pipeline_mode<synchronous>, transform_indices = @transform_2, window_bounds = array<i64: 1, 64>}, {pipeline_mode = #tpu.pipeline_mode<synchronous>, transform_indices = @transform_3, window_bounds = array<i64: 64, 16>}, {pipeline_mode = #tpu.pipeline_mode<synchronous>, transform_indices = @transform_4, window_bounds = array<i64: 1, 16>}, {pipeline_mode = #tpu.pipeline_mode<synchronous>, transform_indices = @transform_5, window_bounds = array<i64: 16, 4>}, {pipeline_mode = #tpu.pipeline_mode<synchronous>, transform_indices = @transform_6, window_bounds = array<i64: 1, 4>}, {pipeline_mode = #tpu.pipeline_mode<synchronous>, transform_indices = @transform_7, window_bounds = array<i64: 4, 2>}, {pipeline_mode = #tpu.pipeline_mode<synchronous>, transform_indices = @transform_8, window_bounds = array<i64: 1, 2>}, {transform_indices = @transform_9, window_bounds = array<i64: 2, 2>}]} {
    %c0 = arith.constant 0 : index
    %c0_0 = arith.constant 0 : index
    %0 = vector.load %arg1[%c0, %c0_0] : memref<2x128xf32, #tpu.memory_space<vmem>>, vector<2x128xf32>
    %c0_1 = arith.constant 0 : index
    %c0_2 = arith.constant 0 : index
    %1 = vector.load %arg2[%c0_1, %c0_2] : memref<128x64xbf16, #tpu.memory_space<vmem>>, vector<128x64xbf16>
    %c0_3 = arith.constant 0 : index
    %c0_4 = arith.constant 0 : index
    %2 = vector.load %arg3[%c0_3, %c0_4] : memref<1x64xf32, #tpu.memory_space<vmem>>, vector<1x64xf32>
    %3 = arith.truncf %0 : vector<2x128xf32> to vector<2x128xbf16>
    %cst = arith.constant dense<0.000000e+00> : vector<2x64xf32>
    %4 = tpu.matmul %3, %1, %cst {dimension_numbers = #tpu.dot_dimension_numbers<[1], [0], [0], [1], [0, 0, 1, 1], [], []>} : vector<2x128xbf16>, vector<128x64xbf16>, vector<2x64xf32> -> vector<2x64xf32>
    %5 = vector.broadcast %2 : vector<1x64xf32> to vector<2x64xf32>
    %6 = arith.addf %4, %5 : vector<2x64xf32>
    %cst_5 = arith.constant 0.000000e+00 : f32
    %7 = vector.broadcast %cst_5 : f32 to vector<2x64xf32>
    %8 = arith.cmpf ogt, %6, %7 : vector<2x64xf32>
    %cst_6 = arith.constant 0.00999999977 : f32
    %9 = vector.broadcast %cst_6 : f32 to vector<2x64xf32>
    %10 = arith.mulf %6, %9 : vector<2x64xf32>
    %11 = arith.select %8, %6, %10 : vector<2x64xi1>, vector<2x64xf32>
    %c0_7 = arith.constant 0 : index
    %c0_8 = arith.constant 0 : index
    %12 = vector.load %arg4[%c0_7, %c0_8] : memref<64x16xbf16, #tpu.memory_space<vmem>>, vector<64x16xbf16>
    %c0_9 = arith.constant 0 : index
    %c0_10 = arith.constant 0 : index
    %13 = vector.load %arg5[%c0_9, %c0_10] : memref<1x16xf32, #tpu.memory_space<vmem>>, vector<1x16xf32>
    %14 = arith.truncf %11 : vector<2x64xf32> to vector<2x64xbf16>
    %cst_11 = arith.constant dense<0.000000e+00> : vector<2x16xf32>
    %15 = tpu.matmul %14, %12, %cst_11 {dimension_numbers = #tpu.dot_dimension_numbers<[1], [0], [0], [1], [0, 0, 1, 1], [], []>} : vector<2x64xbf16>, vector<64x16xbf16>, vector<2x16xf32> -> vector<2x16xf32>
    %16 = vector.broadcast %13 : vector<1x16xf32> to vector<2x16xf32>
    %17 = arith.addf %15, %16 : vector<2x16xf32>
    %cst_12 = arith.constant 0.000000e+00 : f32
    %18 = vector.broadcast %cst_12 : f32 to vector<2x16xf32>
    %19 = arith.cmpf ogt, %17, %18 : vector<2x16xf32>
    %cst_13 = arith.constant 0.00999999977 : f32
    %20 = vector.broadcast %cst_13 : f32 to vector<2x16xf32>
    %21 = arith.mulf %17, %20 : vector<2x16xf32>
    %22 = arith.select %19, %17, %21 : vector<2x16xi1>, vector<2x16xf32>
    %c0_14 = arith.constant 0 : index
    %c0_15 = arith.constant 0 : index
    %23 = vector.load %arg6[%c0_14, %c0_15] : memref<16x4xbf16, #tpu.memory_space<vmem>>, vector<16x4xbf16>
    %c0_16 = arith.constant 0 : index
    %c0_17 = arith.constant 0 : index
    %24 = vector.load %arg7[%c0_16, %c0_17] : memref<1x4xf32, #tpu.memory_space<vmem>>, vector<1x4xf32>
    %25 = arith.truncf %22 : vector<2x16xf32> to vector<2x16xbf16>
    %cst_18 = arith.constant dense<0.000000e+00> : vector<2x4xf32>
    %26 = tpu.matmul %25, %23, %cst_18 {dimension_numbers = #tpu.dot_dimension_numbers<[1], [0], [0], [1], [0, 0, 1, 1], [], []>} : vector<2x16xbf16>, vector<16x4xbf16>, vector<2x4xf32> -> vector<2x4xf32>
    %27 = vector.broadcast %24 : vector<1x4xf32> to vector<2x4xf32>
    %28 = arith.addf %26, %27 : vector<2x4xf32>
    %cst_19 = arith.constant 0.000000e+00 : f32
    %29 = vector.broadcast %cst_19 : f32 to vector<2x4xf32>
    %30 = arith.cmpf ogt, %28, %29 : vector<2x4xf32>
    %cst_20 = arith.constant 0.00999999977 : f32
    %31 = vector.broadcast %cst_20 : f32 to vector<2x4xf32>
    %32 = arith.mulf %28, %31 : vector<2x4xf32>
    %33 = arith.select %30, %28, %32 : vector<2x4xi1>, vector<2x4xf32>
    %c0_21 = arith.constant 0 : index
    %c0_22 = arith.constant 0 : index
    %34 = vector.load %arg8[%c0_21, %c0_22] : memref<4x2xbf16, #tpu.memory_space<vmem>>, vector<4x2xbf16>
    %c0_23 = arith.constant 0 : index
    %c0_24 = arith.constant 0 : index
    %35 = vector.load %arg9[%c0_23, %c0_24] : memref<1x2xf32, #tpu.memory_space<vmem>>, vector<1x2xf32>
    %36 = arith.truncf %33 : vector<2x4xf32> to vector<2x4xbf16>
    %cst_25 = arith.constant dense<0.000000e+00> : vector<2x2xf32>
    %37 = tpu.matmul %36, %34, %cst_25 {dimension_numbers = #tpu.dot_dimension_numbers<[1], [0], [0], [1], [0, 0, 1, 1], [], []>} : vector<2x4xbf16>, vector<4x2xbf16>, vector<2x2xf32> -> vector<2x2xf32>
    %38 = vector.broadcast %35 : vector<1x2xf32> to vector<2x2xf32>
    %39 = arith.addf %37, %38 : vector<2x2xf32>
    %c0_26 = arith.constant 0 : index
    %c0_27 = arith.constant 0 : index
    %40 = vector.load %arg10[%c0_26, %c0_27] : memref<2x2xf32, #tpu.memory_space<vmem>>, vector<2x2xf32>
    tpu.vector_store %arg10[%c0_26, %c0_27], %39 {strides = array<i32>} : memref<2x2xf32, #tpu.memory_space<vmem>>, vector<2x2xf32>,
    return
  }
  func.func @transform_0(%arg0: i32) -> (i32, i32) {
    %c0_i32 = arith.constant 0 : i32
    %c0_i32_0 = arith.constant 0 : i32
    return %arg0, %c0_i32 : i32, i32
  }
  func.func @transform_1(%arg0: i32) -> (i32, i32) {
    %c0_i32 = arith.constant 0 : i32
    %c0_i32_0 = arith.constant 0 : i32
    %c0_i32_1 = arith.constant 0 : i32
    return %c0_i32, %c0_i32_0 : i32, i32
  }
  func.func @transform_2(%arg0: i32) -> (i32, i32) {
    %c0_i32 = arith.constant 0 : i32
    %c0_i32_0 = arith.constant 0 : i32
    %c0_i32_1 = arith.constant 0 : i32
    return %c0_i32, %c0_i32_0 : i32, i32
  }
  func.func @transform_3(%arg0: i32) -> (i32, i32) {
    %c0_i32 = arith.constant 0 : i32
    %c0_i32_0 = arith.constant 0 : i32
    %c0_i32_1 = arith.constant 0 : i32
    return %c0_i32, %c0_i32_0 : i32, i32
  }
  func.func @transform_4(%arg0: i32) -> (i32, i32) {
    %c0_i32 = arith.constant 0 : i32
    %c0_i32_0 = arith.constant 0 : i32
    %c0_i32_1 = arith.constant 0 : i32
    return %c0_i32, %c0_i32_0 : i32, i32
  }
  func.func @transform_5(%arg0: i32) -> (i32, i32) {
    %c0_i32 = arith.constant 0 : i32
    %c0_i32_0 = arith.constant 0 : i32
    %c0_i32_1 = arith.constant 0 : i32
    return %c0_i32, %c0_i32_0 : i32, i32
  }
  func.func @transform_6(%arg0: i32) -> (i32, i32) {
    %c0_i32 = arith.constant 0 : i32
    %c0_i32_0 = arith.constant 0 : i32
    %c0_i32_1 = arith.constant 0 : i32
    return %c0_i32, %c0_i32_0 : i32, i32
  }
  func.func @transform_7(%arg0: i32) -> (i32, i32) {
    %c0_i32 = arith.constant 0 : i32
    %c0_i32_0 = arith.constant 0 : i32
    %c0_i32_1 = arith.constant 0 : i32
    return %c0_i32, %c0_i32_0 : i32, i32
  }
  func.func @transform_8(%arg0: i32) -> (i32, i32) {
    %c0_i32 = arith.constant 0 : i32
    %c0_i32_0 = arith.constant 0 : i32
    %c0_i32_1 = arith.constant 0 : i32
    return %c0_i32, %c0_i32_0 : i32, i32
  }
  func.func @transform_9(%arg0: i32) -> (i32, i32) {
    %c0_i32 = arith.constant 0 : i32
    %c0_i32_0 = arith.constant 0 : i32
    return %arg0, %c0_i32 : i32, i32
  }
}

</mosaic_0001>

<bundles_post_ra>
// kernel: prism_score_no_deltas_forward.3
= control target key start
LH: loop header
LB: loop body
LE: loop exit
PB: predicated region body
PF: predicated region fallthrough
CT: control target
= control target key end

     0   :  { %v493_v1 = vmov 0.0   ;;  %vm494_vm0 = vmmov 0   ;;  %s628_s0 = inlined_call_operand.vmem [shape: f32[2,128], index: 0, kind: input, shape index: {}]   ;;  %s629_s1 = inlined_call_operand.vmem [shape: bf16[128,64], index: 1, kind: input, shape index: {}]   ;;  %s630_s2 = inlined_call_operand.vmem [shape: f32[1,64], index: 2, kind: input, shape index: {}]   ;;  %s631_s3 = inlined_call_operand.vmem [shape: bf16[64,16], index: 3, kind: input, shape index: {}]   ;;  %s632_s4 = inlined_call_operand.vmem [shape: f32[1,16], index: 4, kind: input, shape index: {}]   ;;  %s633_s5 = inlined_call_operand.vmem [shape: bf16[16,4], index: 5, kind: input, shape index: {}]   ;;  %s634_s6 = inlined_call_operand.vmem [shape: f32[1,4], index: 6, kind: input, shape index: {}]   ;;  %s635_s7 = inlined_call_operand.vmem [shape: bf16[4,2], index: 7, kind: input, shape index: {}]   ;;  %s636_s8 = inlined_call_operand.vmem [shape: f32[1,2], index: 8, kind: input, shape index: {}]   ;;  %s637_s9 = inlined_call_operand.hbm [shape: f32[2,2], index: 9, kind: output, shape index: {}]  }
   0x1   :  { %v458_v0 = vld [vmem:[%s629_s1 + $0x38] sm:$0xff]   ;;  %411 = vmatprep.subr.bf16.mxu0 %v493_v1  ;;  %431 = vmatprep.subr.bf16.mxu1 %v493_v1  ;;  %v459_v2 = vld [vmem:[%s629_s1 + $0x30] sm:$0xff]   ;;  %v460_v3 = vld [vmem:[%s629_s1 + $0x28] sm:$0xff]  }
   0x2   :  { %412 = vmatpush3.bf16.msra.mxu0 %v458_v0  ;;  %427 = vmatprep.mubr.msk.bf16.mxu0 %vm494_vm0, %v493_v1  ;;  %v466_v4 = vld [vmem:[%s631_s3 + $0x18] sm:$0xff]   ;;  %v461_v5 = vld [vmem:[%s629_s1 + $0x20] sm:$0xff]   ;;  %v467_v6 = vld [vmem:[%s631_s3 + $0x10] sm:$0xff]  }
   0x3   :  { %413 = vmatprep.subr.bf16.mxu0 %v493_v1  ;;  %439 = vmatprep.mubr.msk.bf16.mxu1 %vm494_vm0, %v493_v1 }
   0x4   :  { %432 = vmatpush3.bf16.msra.mxu1 %v466_v4 }
   0x5   :  { %433 = vmatprep.subr.bf16.mxu1 %v493_v1 }
   0x6   :  { %414 = vmatpush3.bf16.msra.mxu0 %v459_v2 }
   0x7   :  { %415 = vmatprep.subr.bf16.mxu0 %v493_v1 }
   0xa   :  { %416 = vmatpush3.bf16.msra.mxu0 %v460_v3 }
   0xb   :  { %417 = vmatprep.subr.bf16.mxu0 %v493_v1 }
   0xc   :  { %14 = vsyncpa [#allocation3], 0  ;;  %v462_v7 = vld [vmem:[%s629_s1 + $0x18] sm:$0xff]   ;;  %434 = vmatpush3.bf16.msra.mxu1 %v467_v6  ;;  %v463_v8 = vld [vmem:[%s629_s1 + $0x10] sm:$0xff]   ;;  %vm190_vm2 = vcmask 523264   ;;  %vm253_vm4 = vcmask 130048  }
   0xd   :  { %435 = vmatprep.subr.bf16.mxu1 %v493_v1  ;;  %v464_v9 = vld [vmem:[%s629_s1 + $0x8] sm:$0xff]   ;;  %v465_v10 = vld [vmem:[%s629_s1] sm:$0xff]   ;;  %vm313_vm5 = vcmask 1041408   ;;  %vm309_vm7 = vcmask 31744   ;;  %s495_s19 = smov [#allocation2]   ;;  %vm357_vm8 = vcmask 9216  }
   0xe   :  { %418 = vmatpush3.bf16.msra.mxu0 %v461_v5  ;;  %v34_v11 = vld [vmem:[%s628_s0] sm:$0x3]  ;;  %v468_v13 = vld [vmem:[%s631_s3 + $0x8] sm:$0xff]   ;;  %s365_s20 = sshll.u32 %s495_s19, 4  ;;  %s366_s20 = int_to_ptr.vmem [resolvable:$true] %s365_s20 }
   0xf   :  { %419 = vmatprep.subr.bf16.mxu0 %v493_v1  ;;  %v52_v12 = vpack.c.bf16 %v34_v11, %v34_v11  ;;  %v469_v14 = vld [vmem:[%s631_s3] sm:$0xff]   ;;  %p476_p1 = scmp.lt.s32.totalorder %s366_s20, %s366_s20 }
  0x10   :  { %436 = vmatpush3.bf16.msra.mxu1 %v468_v13  ;;  %v373_v15 = vld [vmem:[%s630_s2] ss:$0 sm:$0xff] }
  0x11   :  { %437 = vmatprep.subr.bf16.mxu1 %v493_v1  ;;  %v470_v24 = vld [vmem:[%s633_s5] sm:$0xff]  }
  0x12   :  { %420 = vmatpush3.bf16.msra.mxu0 %v462_v7  ;;  %v382_v25 = vld [vmem:[%s632_s4] ss:$0 sm:$0xff] }
  0x13   :  { %421 = vmatprep.subr.bf16.mxu0 %v493_v1  ;;  %v300_v34 = vld [vmem:[%s635_s7] sm:$0x3] }
  0x14   :  { %438 = vmatpush3.bf16.msra.mxu1 %v469_v14  ;;  %v315_v35 = vsel %vm313_vm5, %v300_v34, 0  ;;  %v388_v36 = vld [vmem:[%s634_s6] ss:$0 sm:$0xff]  ;;  %s471_s6 = scalar_lea.vmem %s366_s20, 32 }
  0x15   :  { %443 = vmatprep.subr.bf16.mxu1 %v493_v1  ;;  %v391_v45 = vld [vmem:[%s636_s8] ss:$0 sm:$0xff]  ;;  %p472_p0 = scmp.ne.s32.totalorder %s366_s20, %s471_s6  ;;  %p477_p2 = scmp.lt.s32.totalorder %s471_s6, %s471_s6 }
  0x16   :  { %422 = vmatpush3.bf16.msra.mxu0 %v463_v8 }
  0x17   :  { %423 = vmatprep.subr.bf16.mxu0 %v493_v1  ;;  %p478_p3 = por %p477_p2, %p476_p1 }
  0x19   :  { %p479_p4 = pnand %p478_p3, %p472_p0 }
  0x1a   :  { %424 = vmatpush3.bf16.msra.mxu0 %v464_v9 }
  0x1b   :  { %425 = vmatprep.subr.bf16.mxu0 %v493_v1 }
  0x1e   :  { %426 = vmatpush3.bf16.msra.mxu0 %v465_v10 }
  0x21   :  { %428 = vmatmul.mubr.bf16.vlgmr.msra.gmra.mxu0 %v52_v12 }
  0xe1   :  { %v141_v16 = vpop.f32.mrf.mxu0 }
  0xe2   :  { %v142_v17 = vadd.f32 %v373_v15, %v141_v16 }
  0xe3   :  { %v429_v18 = vpop.f32.mrf.mxu0 }
  0xe4   :  { %vm147_vm1 = vcmp.gt.f32.partialorder %v142_v17, 0.0  ;;  %v148_v19 = vmul.f32 0.01, %v142_v17 }
  0xe5   :  { %v144_v20 = vpop.f32.mrf.mxu0 }
  0xe6   :  { %v149_v21 = vsel %vm147_vm1, %v142_v17, %v148_v19 }
  0xe7   :  { %v159_v22 = vpack.c.bf16 %v149_v21, %v149_v21  ;;  %v430_v23 = vpop.f32.mrf.mxu0 }
  0xe9   :  { %440 = vmatmul.mubr.msk.bf16.vlgmr.msra.gmra.mxu1 %vm190_vm2, %v159_v22 }
  0xea   :  { %445 = vmatprep.mubr.msk.bf16.mxu1 %vm494_vm0, %v493_v1  ;;  %444 = vmatpush3.bf16.msra.mxu1 %v470_v24 }
  0xeb   :  { %449 = vmatprep.subr.bf16.mxu1 %v493_v1 }
 0x1a9   :  { %v228_v26 = vpop.f32.mrf.mxu1 }
 0x1aa   :  { %v229_v27 = vadd.f32 %v382_v25, %v228_v26 }
 0x1ab   :  { %v441_v28 = vpop.f32.mrf.mxu1 }
 0x1ac   :  { %vm234_vm3 = vcmp.gt.f32.partialorder %v229_v27, 0.0  ;;  %v235_v29 = vmul.f32 0.01, %v229_v27 }
 0x1ad   :  { %v231_v30 = vpop.f32.mrf.mxu1 }
 0x1ae   :  { %v236_v31 = vsel %vm234_vm3, %v229_v27, %v235_v29 }
 0x1af   :  { %v240_v32 = vpack.c.bf16 %v236_v31, %v236_v31  ;;  %v442_v33 = vpop.f32.mrf.mxu1 }
 0x1b1   :  { %446 = vmatmul.mubr.msk.bf16.vlgmr.msra.gmra.mxu1 %vm253_vm4, %v240_v32 }
 0x1b2   :  { %451 = vmatprep.mubr.msk.bf16.mxu1 %vm494_vm0, %v493_v1  ;;  %450 = vmatpush3.bf16.msra.mxu1 %v315_v35 }
 0x271   :  { %v291_v37 = vpop.f32.mrf.mxu1 }
 0x272   :  { %v292_v38 = vadd.f32 %v388_v36, %v291_v37 }
 0x273   :  { %v447_v39 = vpop.f32.mrf.mxu1 }
 0x274   :  { %vm297_vm6 = vcmp.gt.f32.partialorder %v292_v38, 0.0  ;;  %v298_v40 = vmul.f32 0.01, %v292_v38 }
 0x275   :  { %v294_v41 = vpop.f32.mrf.mxu1 }
 0x276   :  { %v299_v42 = vsel %vm297_vm6, %v292_v38, %v298_v40 }
 0x277   :  { %v302_v43 = vpack.c.bf16 %v299_v42, %v299_v42  ;;  %v448_v44 = vpop.f32.mrf.mxu1 }
 0x279   :  { %452 = vmatmul.mubr.msk.bf16.vlgmr.msra.gmra.mxu1 %vm309_vm7, %v302_v43 }
 0x339   :  { %v351_v46 = vpop.f32.mrf.mxu1 }
 0x33a   :  { %v352_v47 = vadd.f32 %v391_v45, %v351_v46 }
 0x33b   :  { %v453_v48 = vpop.f32.mrf.mxu1 }
 0x33c   :  { %358 = vst.msk [vmem:[#allocation2] sm:$0x3] %vm357_vm8, %v352_v47 }
 0x33d   :  { %v354_v49 = vpop.f32.mrf.mxu1 }
 0x33e   :  { %482 = shalt.err (!%p479_p4)
}
 0x33f   :  { %368 = dma.vmem_to_hbm [thread:$0]  %s366_s20, 32, %s637_s9, [#allocation3]   ;;  %v454_v50 = vpop.f32.mrf.mxu1 }
 0x340   :  { %491 = dma.done.wait [#allocation3], 32  }
 0x341   :  { %492 = vsyncadd [#allocation3], 4294967264 }
 0x342   :  { %372 = vsyncpa [#allocation3], 1 }

// kernel: prism_score_no_deltas_forward.2
= control target key start
LH: loop header
LB: loop body
LE: loop exit
PB: predicated region body
PF: predicated region fallthrough
CT: control target
= control target key end

     0   :  { %v3747_v0 = vmov 0.0   ;;  %vm3748_vm0 = vmmov 0   ;;  %vm103_vm1 = vcmask 261120   ;;  %vm170_vm4 = vcmask 130048   ;;  %s3750_s26 = smov 64   ;;  %s4574_s29 = smov 112   ;;  %s4532_s7 = inlined_call_operand.vmem [shape: bf16[2,32,96], index: 7, kind: input, shape index: {}]   ;;  %s4533_s1 = inlined_call_operand.vmem [shape: f32[1,16,32], index: 1, kind: input, shape index: {}]   ;;  %s4534_s3 = inlined_call_operand.vmem [shape: bf16[32,16], index: 3, kind: input, shape index: {}]   ;;  %s4535_s0 = inlined_call_operand.vmem [shape: f32[1,16,32], index: 0, kind: input, shape index: {}]   ;;  %s4536_s5 = inlined_call_operand.vmem [shape: bf16[16,8], index: 5, kind: input, shape index: {}]   ;;  %s4537_s8 = inlined_call_operand.vmem [shape: f32[2,1,96], index: 8, kind: input, shape index: {}]   ;;  %s4538_s4 = inlined_call_operand.vmem [shape: f32[1,16], index: 4, kind: input, shape index: {}]   ;;  %s4539_s6 = inlined_call_operand.vmem [shape: f32[1,8], index: 6, kind: input, shape index: {}]   ;;  %s4540_s2 = inlined_call_operand.vmem [shape: f32[1,16,8], index: 2, kind: input, shape index: {}]   ;;  %s4541_s23 = inlined_call_operand.vmem [shape: f32[1,16,8], index: 23, kind: output, shape index: {0}]   ;;  %s4542_s9 = inlined_call_operand.vmem [shape: bf16[2,32,32], index: 9, kind: input, shape index: {}]   ;;  %s4543_s10 = inlined_call_operand.vmem [shape: f32[2,1,32], index: 10, kind: input, shape index: {}]   ;;  %s4544_s13 = inlined_call_operand.vmem [shape: bf16[2,32,128], index: 13, kind: input, shape index: {}]   ;;  %s4545_s15 = inlined_call_operand.vmem [shape: bf16[2,128,32], index: 15, kind: input, shape index: {}]   ;;  %s4546_s11 = inlined_call_operand.vmem [shape: f32[2,1,32], index: 11, kind: input, shape index: {}]   ;;  %s4547_s12 = inlined_call_operand.vmem [shape: f32[2,1,32], index: 12, kind: input, shape index: {}]   ;;  %s4548_s14 = inlined_call_operand.vmem [shape: f32[2,1,128], index: 14, kind: input, shape index: {}]   ;;  %s4549_s16 = inlined_call_operand.vmem [shape: f32[2,1,32], index: 16, kind: input, shape index: {}]   ;;  %s4550_s17 = inlined_call_operand.vmem [shape: f32[2,1,32], index: 17, kind: input, shape index: {}]   ;;  %s4551_s18 = inlined_call_operand.vmem [shape: f32[2,1,32], index: 18, kind: input, shape index: {}]   ;;  %s4552_s19 = inlined_call_operand.vmem [shape: bf16[32,16], index: 19, kind: input, shape index: {}]   ;;  %s4553_s21 = inlined_call_operand.vmem [shape: bf16[16,8], index: 21, kind: input, shape index: {}]   ;;  %s4554_s20 = inlined_call_operand.vmem [shape: f32[1,16], index: 20, kind: input, shape index: {}]   ;;  %s4555_s22 = inlined_call_operand.vmem [shape: f32[1,8], index: 22, kind: input, shape index: {}]   ;;  %s4556_s24 = inlined_call_operand.vmem [shape: f32[1,16,8], index: 24, kind: output, shape index: {1}]  }
   0x1   :  { %4576 = sst [smem:[#allocation2_spill]] %s4532_s7  ;;  %3293 = vmatprep.subr.bf16.mxu1 %v3747_v0  ;;  %3297 = vmatprep.mubr.msk.bf16.mxu1 %vm3748_vm0, %v3747_v0  ;;  %vm219_vm5 = vcmask 64512   ;;  %vm456_vm6 = vcmask 1043456   ;;  %s4567_s30 = smov 104   ;;  %vm1238_vm7 = vcmask 195584  }
   0x2   :  { %4577 = sst [smem:[#allocation3_spill]] %s4533_s1  ;;  %3279 = vmatprep.subr.bf16.mxu0 %v3747_v0  ;;  %3283 = vmatprep.mubr.msk.bf16.mxu0 %vm3748_vm0, %v3747_v0 }
   0x3   :  { %4578 = sst [smem:[#allocation4_spill]] %s4534_s3  ;;  %s3754_s3 = smov 80  }
   0x4   :  { %4579 = sst [smem:[#allocation5_spill]] %s4535_s0 }
   0x5   :  { %4580 = sst [smem:[#allocation6_spill]] %s4536_s5  ;;  %s4564_s5 = smov 16  }
   0x6   :  { %4581 = sst [smem:[#allocation7_spill]] %s4537_s8  ;;  %s3749_s8 = smov 96  }
   0x7   :  { %4582 = sst [smem:[#allocation8_spill]] %s4538_s4 }
   0x8   :  { %4583 = sst [smem:[#allocation9_spill]] %s4539_s6 }
   0x9   :  { %4584 = sst [smem:[#allocation10_spill]] %s4540_s2  ;;  %s4565_s2 = smov 40  }
   0xa   :  { %s4585_s27 = sld [smem:[#allocation2_spill]] }
   0xb   :  { %s4586_s0 = sld [smem:[#allocation3_spill]] }
   0xc   :  { %s4587_s25 = sld [smem:[#allocation4_spill]] }
   0xd   :  { %s4588_s28 = sld [smem:[#allocation5_spill]] }
   0xe   :  { %s4589_s6 = sld [smem:[#allocation6_spill]] }
   0xf   :  { %s4590_s7 = sld [smem:[#allocation7_spill]] }
  0x10   :  { %v3633_v1 = vld [vmem:[%s4585_s27 + $0x8] sm:$0xff]   ;;  %v3634_v2 = vld [vmem:[%s4585_s27] sm:$0xff]   ;;  %s4591_s1 = sld [smem:[#allocation8_spill]] }
  0x11   :  { %3294 = vmatpush3.bf16.msra.mxu1 %v3633_v1  ;;  %v3903_v3 = vld [vmem:[%s4586_s0] sm:$0xff]  ;;  %v3908_v4 = vld [vmem:[%s4586_s0 + $0x8] sm:$0xff]  ;;  %s4592_s4 = sld [smem:[#allocation9_spill]] }
  0x12   :  { %3295 = vmatprep.subr.bf16.mxu1 %v3747_v0  ;;  %v3635_v5 = vld [vmem:[%s4587_s25 + $0x8] sm:$0xff]   ;;  %v3636_v6 = vld [vmem:[%s4587_s25] sm:$0xff]   ;;  %v260_v7 = vpack.c.bf16 %v3908_v4, %v3903_v3  ;;  %s4593_s0 = sld [smem:[#allocation10_spill]]  ;;  %s4563_s25 = smov 8  }
  0x13   :  { %3280 = vmatpush3.bf16.msra.mxu0 %v3635_v5  ;;  %v77_v8 = vld [vmem:[%s4588_s28] sm:$0xff]  ;;  %v78_v9 = vld [vmem:[%s4588_s28 + $0x8] sm:$0xff]  ;;  %s3752_s28 = smov 120  }
  0x14   :  { %3281 = vmatprep.subr.bf16.mxu0 %v3747_v0  ;;  %v79_v10 = vpack.c.bf16 %v78_v9, %v77_v8  ;;  %v3637_v11 = vld [vmem:[%s4589_s6] sm:$0xff]   ;;  %s4570_s6 = smov 72  }
  0x15   :  { %3296 = vmatpush3.bf16.msra.mxu1 %v3634_v2  ;;  %v3044_v12 = vld [vmem:[%s4590_s7] ss:$0 sm:$0xff] }
  0x16   :  { %3307 = vmatprep.subr.bf16.mxu1 %v3747_v0  ;;  %v3037_v15 = vld [vmem:[%s4591_s1] ss:$0 sm:$0xff]  ;;  %s4601_s1 = smov 24  }
  0x17   :  { %3282 = vmatpush3.bf16.msra.mxu0 %v3636_v6  ;;  %v3041_v41 = vld [vmem:[%s4592_s4] ss:$0 sm:$0xff]  ;;  %s3753_s4 = smov 56  }
  0x18   :  { %3298 = vmatmul.mubr.msk.bf16.vlgmr.msra.gmra.mxu1 %vm103_vm1, %v260_v7  ;;  %3287 = vmatprep.subr.bf16.mxu0 %v3747_v0  ;;  %v215_v43 = vld [vmem:[%s4593_s0] sm:$0xff]  ;;  %v216_v48 = vld [vmem:[%s4593_s0 + $0x8] sm:$0xff]  ;;  %s4572_s0 = smov 48  }
  0x19   :  { %3309 = vmatprep.mubr.msk.bf16.mxu1 %vm3748_vm0, %v3747_v0 }
  0x1a   :  { %3284 = vmatmul.mubr.msk.bf16.vlgmr.msra.gmra.mxu0 %vm103_vm1, %v79_v10 }
  0x1b   :  { %3289 = vmatprep.mubr.msk.bf16.mxu0 %vm3748_vm0, %v3747_v0  ;;  %3288 = vmatpush3.bf16.msra.mxu0 %v3637_v11 }
  0x1c   :  { %3301 = vmatprep.subr.bf16.mxu0 %v3747_v0 }
  0xd8   :  { %v316_v13 = vpop.f32.mrf.mxu1 }
  0xd9   :  { %v317_v14 = vadd.f32 %v3044_v12, %v316_v13 }
  0xda   :  { %v3299_v16 = vpop.f32.mrf.mxu1  ;;  %v141_v18 = vpop.f32.mrf.mxu0 }
  0xdb   :  { %v3944_v17 = vpack.c.bf16 %v317_v14, %v317_v14  ;;  %v142_v20 = vadd.f32 %v3037_v15, %v141_v18  ;;  %v323_v35 = vmul.f32 0.35355338, %v317_v14 }
  0xdc   :  { %v319_v19 = vpop.f32.mrf.mxu1  ;;  %v3285_v22 = vpop.f32.mrf.mxu0 }
  0xdd   :  { %v320_v21 = vadd.f32 %v3044_v12, %v319_v19  ;;  %330 = vrot.lane.b32.xlu0 %v3944_v17, %s3749_s8  ;;  %v150_v24 = vmul.f32 0.01, %v142_v20  ;;  %vm148_vm2 = vcmp.gt.f32.partialorder %v142_v20, 0.0  ;;  %v3958_v38 = vpack.c.bf16 %v323_v35, %v323_v35 }
  0xde   :  { %v3300_v23 = vpop.f32.mrf.mxu1  ;;  %v144_v26 = vpop.f32.mrf.mxu0 }
  0xdf   :  { %v3948_v25 = vpack.c.bf16 %v320_v21, %v320_v21  ;;  %v145_v27 = vadd.f32 %v3037_v15, %v144_v26  ;;  %v152_v29 = vsel %vm148_vm2, %v142_v20, %v150_v24  ;;  %v324_v39 = vmul.f32 0.35355338, %v320_v21 }
  0xe0   :  { %v3286_v28 = vpop.f32.mrf.mxu0 }
  0xe1   :  { %379 = vrot.lane.b32.xlu0 %v3948_v25, %s3749_s8  ;;  %vm149_vm3 = vcmp.gt.f32.partialorder %v145_v27, 0.0  ;;  %v151_v30 = vmul.f32 0.01, %v145_v27  ;;  %v3965_v40 = vpack.c.bf16 %v324_v39, %v324_v39 }
  0xe3   :  { %v153_v31 = vsel %vm149_vm3, %v145_v27, %v151_v30 }
  0xe4   :  { %v154_v32 = vpack.c.bf16 %v153_v31, %v152_v29 }
  0xe6   :  { %3290 = vmatmul.mubr.msk.bf16.vlgmr.msra.gmra.mxu0 %vm170_vm4, %v154_v32 }
  0xe7   :  { %3303 = vmatprep.mubr.msk.bf16.mxu0 %vm3748_vm0, %v3747_v0 }
 0x14f   :  { %v331_v33 = vpop.permute.xlu0 %330 }
 0x150   :  { %v336_v34 = vsel %vm219_vm5, %v331_v33, 0 }
 0x151   :  { %3302 = vmatpush3.bf16.xpose.msra.mxu0 %v336_v34 }
 0x152   :  { %3313 = vmatprep.subr.bf16.mxu0 %v3747_v0 }
 0x153   :  { %v380_v36 = vpop.permute.xlu0 %379 }
 0x154   :  { %v385_v37 = vsel %vm219_vm5, %v380_v36, 0 }
 0x155   :  { %3308 = vmatpush3.bf16.xpose.msra.mxu1 %v385_v37 }
 0x156   :  { %3319 = vmatprep.subr.bf16.mxu1 %v3747_v0 }
 0x158   :  { %3304 = vmatmul.mubr.msk.bf16.vlgmr.msra.gmra.mxu0 %vm219_vm5, %v3958_v38 }
 0x159   :  { %3315 = vmatprep.mubr.msk.bf16.mxu0 %vm3748_vm0, %v3747_v0 }
 0x15c   :  { %3310 = vmatmul.mubr.msk.bf16.vlgmr.msra.gmra.mxu1 %vm219_vm5, %v3965_v40 }
 0x15d   :  { %3321 = vmatprep.mubr.msk.bf16.mxu1 %vm3748_vm0, %v3747_v0 }
 0x1a6   :  { %v208_v42 = vpop.f32.mrf.mxu0 }
 0x1a7   :  { %v209_v44 = vadd.f32 %v3041_v41, %v208_v42 }
 0x1a8   :  { %v3291_v45 = vpop.f32.mrf.mxu0 }
 0x1a9   :  { %v217_v46 = vadd.f32 %v215_v43, %v209_v44 }
 0x1aa   :  { %v211_v47 = vpop.f32.mrf.mxu0 }
 0x1ab   :  { %220 = vst.msk [vmem:[%s4541_s23] sm:$0xff] %vm219_vm5, %v217_v46  ;;  %v212_v49 = vadd.f32 %v3041_v41, %v211_v47 }
 0x1ac   :  { %v3292_v50 = vpop.f32.mrf.mxu0 }
 0x1ad   :  { %v218_v51 = vadd.f32 %v216_v48, %v212_v49 }
 0x1af   :  { %221 = vst.msk [vmem:[%s4541_s23 + $0x8] sm:$0xff] %vm219_vm5, %v218_v51  ;;  %s3751_s23 = smov 88  }
 0x218   :  { %v372_v52 = vpop.f32.mrf.mxu0 }
 0x219   :  { %v427_v53 = vsel %vm219_vm5, %v372_v52, -inf }
 0x21a   :  { %428 = vmax.xlane.f32.xlu1 %v427_v53  ;;  %v3305_v54 = vpop.f32.mrf.mxu0 }
 0x21c   :  { %v375_v55 = vpop.f32.mrf.mxu0  ;;  %v421_v56 = vpop.f32.mrf.mxu1 }
 0x21d   :  { %v430_v57 = vsel %vm219_vm5, %v421_v56, -inf }
 0x21e   :  { %v3311_v58 = vpop.f32.mrf.mxu1  ;;  %431 = vmax.xlane.f32.xlu1 %v430_v57  ;;  %v3306_v59 = vpop.f32.mrf.mxu0 }
 0x220   :  { %v424_v60 = vpop.f32.mrf.mxu1 }
 0x222   :  { %v3312_v61 = vpop.f32.mrf.mxu1 }
 0x22f   :  { %451 = vrot.lane.b32.xlu1 %v3944_v17, %s3750_s26 }
 0x233   :  { %500 = vrot.lane.b32.xlu1 %v3948_v25, %s3750_s26 }
 0x237   :  { %551 = vrot.lane.b32.xlu1 %v3944_v17, %s3751_s23 }
 0x2a3   :  { %v429_v62 = vpop.xlane.xlu1 %428 }
 0x2a4   :  { %v433_v63 = vsub.f32 %v372_v52, %v429_v62 }
 0x2a6   :  { %v435_v1 = vmul.f32 1.442695, %v433_v63 }
 0x2a7   :  { %v432_v2 = vpop.xlane.xlu1 %431 }
 0x2a8   :  { %3667 = vpow2.f32 %v435_v1  ;;  %v434_v5 = vsub.f32 %v421_v56, %v432_v2 }
 0x2aa   :  { %v437_v6 = vmul.f32 1.442695, %v434_v5 }
 0x2ab   :  { %v452_v7 = vpop.permute.xlu1 %451 }
 0x2ac   :  { %3669 = vpow2.f32 %v437_v6  ;;  %v458_v8 = vsel %vm456_vm6, %v452_v7, 0 }
 0x2ad   :  { %3314 = vmatpush3.bf16.msra.mxu0 %v458_v8 }
 0x2ae   :  { %3325 = vmatprep.subr.bf16.mxu0 %v3747_v0 }
 0x2af   :  { %v501_v9 = vpop.permute.xlu1 %500 }
 0x2b0   :  { %v506_v10 = vsel %vm456_vm6, %v501_v9, 0 }
 0x2b1   :  { %3320 = vmatpush3.bf16.msra.mxu1 %v506_v10 }
 0x2b2   :  { %3331 = vmatprep.subr.bf16.mxu1 %v3747_v0 }
 0x2b3   :  { %v552_v15 = vpop.permute.xlu1 %551 }
 0x2b4   :  { %v557_v23 = vsel %vm219_vm5, %v552_v15, 0 }
 0x2b5   :  { %v3668_v11 = vpop.eup %3667 }
 0x2b6   :  { %v439_v12 = vsel %vm219_vm5, %v3668_v11, 0.0 }
 0x2b7   :  { %440 = vadd.xlane.f32.xlu0 %v439_v12 }
 0x2b9   :  { %v3670_v13 = vpop.eup %3669 }
 0x2ba   :  { %v442_v14 = vsel %vm219_vm5, %v3670_v13, 0.0 }
 0x2bb   :  { %443 = vadd.xlane.f32.xlu1 %v442_v14 }
 0x2cc   :  { %602 = vrot.lane.b32.xlu1 %v3948_v25, %s3751_s23 }
 0x2cd   :  { %549 = vrot.lane.b32.xlu0 %v3958_v38, %s3752_s28 }
 0x2d0   :  { %600 = vrot.lane.b32.xlu1 %v3965_v40, %s3752_s28 }
 0x340   :  { %v441_v16 = vpop.xlane.xlu0 %440 }
 0x341   :  { %3671 = vrcp.f32 %v441_v16 }
 0x344   :  { %v444_v18 = vpop.xlane.xlu1 %443  ;;  %v550_v29 = vpop.permute.xlu0 %549 }
 0x345   :  { %3673 = vrcp.f32 %v444_v18 }
 0x348   :  { %v603_v26 = vpop.permute.xlu1 %602 }
 0x349   :  { %v608_v28 = vsel %vm219_vm5, %v603_v26, 0 }
 0x34c   :  { %v601_v30 = vpop.permute.xlu1 %600 }
 0x34e   :  { %v3672_v19 = vpop.eup %3671 }
 0x34f   :  { %v446_v20 = vmul.f32 %v3672_v19, %v3668_v11 }
 0x351   :  { %v449_v21 = vpack.c.bf16 %v446_v20, %v446_v20 }
 0x352   :  { %v3674_v22 = vpop.eup %3673 }
 0x353   :  { %3316 = vmatmul.mubr.msk.bf16.vlgmr.msra.gmra.mxu0 %vm219_vm5, %v449_v21  ;;  %v448_v24 = vmul.f32 %v3674_v22, %v3670_v13 }
 0x354   :  { %3326 = vmatpush3.bf16.xpose.msra.mxu0 %v557_v23  ;;  %3327 = vmatprep.mubr.msk.bf16.mxu0 %vm3748_vm0, %v3747_v0 }
 0x355   :  { %v450_v27 = vpack.c.bf16 %v448_v24, %v448_v24  ;;  %3337 = vmatprep.subr.bf16.mxu0 %v3747_v0 }
 0x357   :  { %3322 = vmatmul.mubr.msk.bf16.vlgmr.msra.gmra.mxu1 %vm219_vm5, %v450_v27 }
 0x358   :  { %3332 = vmatpush3.bf16.xpose.msra.mxu1 %v608_v28  ;;  %3333 = vmatprep.mubr.msk.bf16.mxu1 %vm3748_vm0, %v3747_v0 }
 0x359   :  { %3343 = vmatprep.subr.bf16.mxu1 %v3747_v0 }
 0x35b   :  { %3328 = vmatmul.mubr.msk.bf16.vlgmr.msra.gmra.mxu0 %vm219_vm5, %v550_v29 }
 0x35c   :  { %3339 = vmatprep.mubr.msk.bf16.mxu0 %vm3748_vm0, %v3747_v0 }
 0x35f   :  { %3334 = vmatmul.mubr.msk.bf16.vlgmr.msra.gmra.mxu1 %vm219_vm5, %v601_v30 }
 0x360   :  { %3345 = vmatprep.mubr.msk.bf16.mxu1 %vm3748_vm0, %v3747_v0 }
 0x413   :  { %v4024_v31 = vpop.f32.mrf.mxu0 }
 0x415   :  { %v3317_v32 = vpop.f32.mrf.mxu0 }
 0x417   :  { %v497_v33 = vpop.f32.mrf.mxu0  ;;  %v4026_v34 = vpop.f32.mrf.mxu1 }
 0x419   :  { %v3318_v35 = vpop.f32.mrf.mxu0  ;;  %v3323_v36 = vpop.f32.mrf.mxu1 }
 0x41b   :  { %v545_v37 = vpop.f32.mrf.mxu1  ;;  %v593_v39 = vpop.f32.mrf.mxu0 }
 0x41c   :  { %v650_v41 = vsel %vm219_vm5, %v593_v39, -inf }
 0x41d   :  { %v3324_v42 = vpop.f32.mrf.mxu1  ;;  %651 = vmax.xlane.f32.xlu1 %v650_v41  ;;  %v3329_v43 = vpop.f32.mrf.mxu0 }
 0x41f   :  { %v596_v44 = vpop.f32.mrf.mxu0  ;;  %v644_v45 = vpop.f32.mrf.mxu1 }
 0x420   :  { %v653_v46 = vsel %vm219_vm5, %v644_v45, -inf }
 0x421   :  { %654 = vmax.xlane.f32.xlu0 %v653_v46  ;;  %v3330_v47 = vpop.f32.mrf.mxu0  ;;  %v3335_v48 = vpop.f32.mrf.mxu1 }
 0x423   :  { %v647_v49 = vpop.f32.mrf.mxu1 }
 0x425   :  { %v3336_v50 = vpop.f32.mrf.mxu1 }
 0x42e   :  { %674 = vrot.lane.b32.xlu1 %v3944_v17, %s3753_s4 }
 0x432   :  { %772 = vrot.lane.b32.xlu1 %v3944_v17, %s3754_s3 }
 0x437   :  { %722 = vrot.lane.b32.xlu0 %v3948_v25, %s3753_s4 }
 0x43b   :  { %770 = vrot.lane.b32.xlu0 %v3958_v38, %s4574_s29 }
 0x4a6   :  { %v652_v51 = vpop.xlane.xlu1 %651 }
 0x4a7   :  { %v656_v52 = vsub.f32 %v593_v39, %v652_v51 }
 0x4a9   :  { %v658_v53 = vmul.f32 1.442695, %v656_v52 }
 0x4aa   :  { %v655_v54 = vpop.xlane.xlu0 %654  ;;  %v675_v55 = vpop.permute.xlu1 %674 }
 0x4ab   :  { %3675 = vpow2.f32 %v658_v53  ;;  %v657_v56 = vsub.f32 %v644_v45, %v655_v54  ;;  %v680_v57 = vsel %vm456_vm6, %v675_v55, 0 }
 0x4ac   :  { %3338 = vmatpush3.bf16.msra.mxu0 %v680_v57 }
 0x4ad   :  { %v660_v58 = vmul.f32 1.442695, %v657_v56  ;;  %3349 = vmatprep.subr.bf16.mxu0 %v3747_v0 }
 0x4ae   :  { %v723_v59 = vpop.permute.xlu0 %722  ;;  %v773_v2 = vpop.permute.xlu1 %772 }
 0x4af   :  { %3677 = vpow2.f32 %v660_v58  ;;  %v728_v60 = vsel %vm456_vm6, %v723_v59, 0  ;;  %v778_v11 = vsel %vm219_vm5, %v773_v2, 0 }
 0x4b0   :  { %3344 = vmatpush3.bf16.msra.mxu1 %v728_v60 }
 0x4b1   :  { %3355 = vmatprep.subr.bf16.mxu1 %v3747_v0 }
 0x4b2   :  { %v771_v16 = vpop.permute.xlu0 %770 }
 0x4b8   :  { %v3676_v61 = vpop.eup %3675 }
 0x4b9   :  { %v662_v62 = vsel %vm219_vm5, %v3676_v61, 0.0 }
 0x4ba   :  { %663 = vadd.xlane.f32.xlu1 %v662_v62 }
 0x4bc   :  { %v3678_v63 = vpop.eup %3677 }
 0x4bd   :  { %v665_v1 = vsel %vm219_vm5, %v3678_v63, 0.0 }
 0x4be   :  { %666 = vadd.xlane.f32.xlu1 %v665_v1 }
 0x4cf   :  { %822 = vrot.lane.b32.xlu1 %v3948_v25, %s3754_s3 }
 0x4d3   :  { %820 = vrot.lane.b32.xlu1 %v3965_v40, %s4574_s29 }
 0x543   :  { %v664_v5 = vpop.xlane.xlu1 %663 }
 0x544   :  { %3679 = vrcp.f32 %v664_v5 }
 0x547   :  { %v667_v6 = vpop.xlane.xlu1 %666 }
 0x548   :  { %3681 = vrcp.f32 %v667_v6 }
 0x54b   :  { %v823_v13 = vpop.permute.xlu1 %822 }
 0x54c   :  { %v828_v15 = vsel %vm219_vm5, %v823_v13, 0 }
 0x54f   :  { %v821_v18 = vpop.permute.xlu1 %820 }
 0x551   :  { %v3680_v7 = vpop.eup %3679 }
 0x552   :  { %v669_v8 = vmul.f32 %v3680_v7, %v3676_v61 }
 0x554   :  { %v672_v9 = vpack.c.bf16 %v669_v8, %v669_v8 }
 0x555   :  { %v3682_v10 = vpop.eup %3681 }
 0x556   :  { %3340 = vmatmul.mubr.msk.bf16.vlgmr.msra.gmra.mxu0 %vm219_vm5, %v672_v9  ;;  %v671_v12 = vmul.f32 %v3682_v10, %v3678_v63 }
 0x557   :  { %3350 = vmatpush3.bf16.xpose.msra.mxu0 %v778_v11  ;;  %3351 = vmatprep.mubr.msk.bf16.mxu0 %vm3748_vm0, %v3747_v0 }
 0x558   :  { %v673_v14 = vpack.c.bf16 %v671_v12, %v671_v12  ;;  %3361 = vmatprep.subr.bf16.mxu0 %v3747_v0 }
 0x55a   :  { %3346 = vmatmul.mubr.msk.bf16.vlgmr.msra.gmra.mxu1 %vm219_vm5, %v673_v14 }
 0x55b   :  { %3356 = vmatpush3.bf16.xpose.msra.mxu1 %v828_v15  ;;  %3357 = vmatprep.mubr.msk.bf16.mxu1 %vm3748_vm0, %v3747_v0 }
 0x55c   :  { %3367 = vmatprep.subr.bf16.mxu1 %v3747_v0 }
 0x55e   :  { %3352 = vmatmul.mubr.msk.bf16.vlgmr.msra.gmra.mxu0 %vm219_vm5, %v771_v16 }
 0x55f   :  { %3363 = vmatprep.mubr.msk.bf16.mxu0 %vm3748_vm0, %v3747_v0 }
 0x562   :  { %3358 = vmatmul.mubr.msk.bf16.vlgmr.msra.gmra.mxu1 %vm219_vm5, %v821_v18 }
 0x563   :  { %3369 = vmatprep.mubr.msk.bf16.mxu1 %vm3748_vm0, %v3747_v0 }
 0x616   :  { %v4064_v19 = vpop.f32.mrf.mxu0 }
 0x618   :  { %v3341_v20 = vpop.f32.mrf.mxu0 }
 0x61a   :  { %v719_v21 = vpop.f32.mrf.mxu0  ;;  %v4066_v22 = vpop.f32.mrf.mxu1 }
 0x61b   :  { %v3603_v23 = vpack.i.bf16 %v4066_v22, %v4064_v19 }
 0x61c   :  { %v3342_v24 = vpop.f32.mrf.mxu0  ;;  %v3347_v26 = vpop.f32.mrf.mxu1 }
 0x61e   :  { %v767_v27 = vpop.f32.mrf.mxu1  ;;  %v814_v28 = vpop.f32.mrf.mxu0 }
 0x61f   :  { %v870_v29 = vsel %vm219_vm5, %v814_v28, -inf }
 0x620   :  { %v3348_v30 = vpop.f32.mrf.mxu1  ;;  %871 = vmax.xlane.f32.xlu0 %v870_v29  ;;  %v3353_v32 = vpop.f32.mrf.mxu0 }
 0x622   :  { %v817_v33 = vpop.f32.mrf.mxu0  ;;  %v864_v35 = vpop.f32.mrf.mxu1 }
 0x623   :  { %v873_v36 = vsel %vm219_vm5, %v864_v35, -inf }
 0x624   :  { %874 = vmax.xlane.f32.xlu1 %v873_v36  ;;  %v3354_v37 = vpop.f32.mrf.mxu0  ;;  %v3359_v39 = vpop.f32.mrf.mxu1 }
 0x626   :  { %v867_v41 = vpop.f32.mrf.mxu1 }
 0x628   :  { %v3360_v42 = vpop.f32.mrf.mxu1 }
 0x635   :  { %894 = vrot.lane.b32.xlu1 %v3944_v17, %s4572_s0 }
 0x639   :  { %992 = vrot.lane.b32.xlu1 %v3944_v17, %s4570_s6 }
 0x63d   :  { %1042 = vrot.lane.b32.xlu1 %v3948_v25, %s4570_s6 }
 0x641   :  { %1040 = vrot.lane.b32.xlu1 %v3965_v40, %s4567_s30 }
 0x6a9   :  { %v872_v43 = vpop.xlane.xlu0 %871 }
 0x6aa   :  { %v876_v44 = vsub.f32 %v814_v28, %v872_v43 }
 0x6ac   :  { %v878_v45 = vmul.f32 1.442695, %v876_v44 }
 0x6ad   :  { %v875_v46 = vpop.xlane.xlu1 %874 }
 0x6ae   :  { %3683 = vpow2.f32 %v878_v45  ;;  %v877_v47 = vsub.f32 %v864_v35, %v875_v46 }
 0x6b0   :  { %v880_v48 = vmul.f32 1.442695, %v877_v47 }
 0x6b1   :  { %v895_v49 = vpop.permute.xlu1 %894 }
 0x6b2   :  { %3685 = vpow2.f32 %v880_v48  ;;  %v900_v50 = vsel %vm456_vm6, %v895_v49, 0 }
 0x6b3   :  { %3362 = vmatpush3.bf16.msra.mxu0 %v900_v50 }
 0x6b4   :  { %3373 = vmatprep.subr.bf16.mxu0 %v3747_v0 }
 0x6b5   :  { %v993_v59 = vpop.permute.xlu1 %992 }
 0x6b6   :  { %v998_v63 = vsel %vm219_vm5, %v993_v59, 0 }
 0x6b9   :  { %v1043_v1 = vpop.permute.xlu1 %1042 }
 0x6ba   :  { %v1048_v5 = vsel %vm219_vm5, %v1043_v1, 0 }
 0x6bb   :  { %v3684_v51 = vpop.eup %3683 }
 0x6bc   :  { %v882_v52 = vsel %vm219_vm5, %v3684_v51, 0.0 }
 0x6bd   :  { %883 = vadd.xlane.f32.xlu0 %v882_v52  ;;  %v1041_v7 = vpop.permute.xlu1 %1040 }
 0x6bf   :  { %v3686_v53 = vpop.eup %3685 }
 0x6c0   :  { %v885_v40 = vsel %vm219_vm5, %v3686_v53, 0.0 }
 0x6c1   :  { %886 = vadd.xlane.f32.xlu0 %v885_v40  ;;  %v3639_v40 = vld [vmem:[%s4542_s9] sm:$0xff]  }
 0x6d7   :  { %942 = vrot.lane.b32.xlu0 %v3948_v25, %s4572_s0 }
 0x6db   :  { %990 = vrot.lane.b32.xlu0 %v3958_v38, %s4567_s30  ;;  %s4569_s30 = smov 24  }
 0x746   :  { %v884_v54 = vpop.xlane.xlu0 %883 }
 0x747   :  { %3687 = vrcp.f32 %v884_v54 }
 0x74a   :  { %v887_v55 = vpop.xlane.xlu0 %886 }
 0x74b   :  { %3689 = vrcp.f32 %v887_v55 }
 0x74e   :  { %v943_v56 = vpop.permute.xlu0 %942 }
 0x74f   :  { %v948_v57 = vsel %vm456_vm6, %v943_v56, 0 }
 0x750   :  { %3368 = vmatpush3.bf16.msra.mxu1 %v948_v57 }
 0x751   :  { %3379 = vmatprep.subr.bf16.mxu1 %v3747_v0 }
 0x752   :  { %v991_v6 = vpop.permute.xlu0 %990 }
 0x754   :  { %v3688_v58 = vpop.eup %3687 }
 0x755   :  { %v889_v60 = vmul.f32 %v3688_v58, %v3684_v51 }
 0x757   :  { %v892_v61 = vpack.c.bf16 %v889_v60, %v889_v60 }
 0x758   :  { %v3690_v62 = vpop.eup %3689 }
 0x759   :  { %3364 = vmatmul.mubr.msk.bf16.vlgmr.msra.gmra.mxu0 %vm219_vm5, %v892_v61  ;;  %v891_v38 = vmul.f32 %v3690_v62, %v3686_v53  ;;  %v3638_v53 = vld [vmem:[%s4542_s9 + $0x8] sm:$0xff]  }
 0x75a   :  { %3374 = vmatpush3.bf16.xpose.msra.mxu0 %v998_v63  ;;  %3375 = vmatprep.mubr.msk.bf16.mxu0 %vm3748_vm0, %v3747_v0 }
 0x75b   :  { %v893_v2 = vpack.c.bf16 %v891_v38, %v891_v38  ;;  %3385 = vmatprep.subr.bf16.mxu0 %v3747_v0 }
 0x75d   :  { %3370 = vmatmul.mubr.msk.bf16.vlgmr.msra.gmra.mxu1 %vm219_vm5, %v893_v2 }
 0x75e   :  { %3380 = vmatpush3.bf16.xpose.msra.mxu1 %v1048_v5  ;;  %3381 = vmatprep.mubr.msk.bf16.mxu1 %vm3748_vm0, %v3747_v0 }
 0x75f   :  { %3391 = vmatprep.subr.bf16.mxu1 %v3747_v0 }
 0x761   :  { %3376 = vmatmul.mubr.msk.bf16.vlgmr.msra.gmra.mxu0 %vm219_vm5, %v991_v6 }
 0x762   :  { %3387 = vmatprep.mubr.msk.bf16.mxu0 %vm3748_vm0, %v3747_v0 }
 0x765   :  { %3382 = vmatmul.mubr.msk.bf16.vlgmr.msra.gmra.mxu1 %vm219_vm5, %v1041_v7 }
 0x766   :  { %3393 = vmatprep.mubr.msk.bf16.mxu1 %vm3748_vm0, %v3747_v0 }
 0x819   :  { %v936_v8 = vpop.f32.mrf.mxu0 }
 0x81b   :  { %v3365_v9 = vpop.f32.mrf.mxu0 }
 0x81d   :  { %v939_v10 = vpop.f32.mrf.mxu0  ;;  %v984_v11 = vpop.f32.mrf.mxu1 }
 0x81e   :  { %v3608_v32 = vpack.i.bf16 %v984_v11, %v936_v8 }
 0x81f   :  { %v3366_v12 = vpop.f32.mrf.mxu0  ;;  %v3371_v13 = vpop.f32.mrf.mxu1 }
 0x821   :  { %v987_v14 = vpop.f32.mrf.mxu1  ;;  %v1034_v15 = vpop.f32.mrf.mxu0 }
 0x822   :  { %v1090_v16 = vsel %vm219_vm5, %v1034_v15, -inf }
 0x823   :  { %v3372_v18 = vpop.f32.mrf.mxu1  ;;  %1091 = vmax.xlane.f32.xlu0 %v1090_v16  ;;  %v3377_v20 = vpop.f32.mrf.mxu0 }
 0x825   :  { %v1037_v21 = vpop.f32.mrf.mxu0  ;;  %v1084_v24 = vpop.f32.mrf.mxu1 }
 0x826   :  { %v1093_v26 = vsel %vm219_vm5, %v1084_v24, -inf }
 0x827   :  { %1094 = vmax.xlane.f32.xlu1 %v1093_v26  ;;  %v3378_v27 = vpop.f32.mrf.mxu0  ;;  %v3383_v28 = vpop.f32.mrf.mxu1 }
 0x829   :  { %v1087_v29 = vpop.f32.mrf.mxu1 }
 0x82b   :  { %v3384_v30 = vpop.f32.mrf.mxu1 }
 0x838   :  { %1114 = vrot.lane.b32.xlu1 %v3944_v17, %s4565_s2 }
 0x83c   :  { %3604 = vrot.lane.b32.xlu1 %v3603_v23, %s4563_s25 }
 0x840   :  { %3609 = vrot.lane.b32.xlu1 %v3608_v32, %s4564_s5 }
 0x8ac   :  { %v1092_v33 = vpop.xlane.xlu0 %1091 }
 0x8ad   :  { %v1096_v35 = vsub.f32 %v1034_v15, %v1092_v33 }
 0x8af   :  { %v1098_v36 = vmul.f32 1.442695, %v1096_v35 }
 0x8b0   :  { %v1095_v37 = vpop.xlane.xlu1 %1094 }
 0x8b1   :  { %3691 = vpow2.f32 %v1098_v36  ;;  %v1097_v39 = vsub.f32 %v1084_v24, %v1095_v37 }
 0x8b3   :  { %v1100_v41 = vmul.f32 1.442695, %v1097_v39 }
 0x8b4   :  { %v1115_v42 = vpop.permute.xlu1 %1114 }
 0x8b5   :  { %3693 = vpow2.f32 %v1100_v41  ;;  %v1120_v17 = vsel %vm456_vm6, %v1115_v42, 0 }
 0x8b6   :  { %3386 = vmatpush3.bf16.msra.mxu0 %v1120_v17 }
 0x8b7   :  { %3397 = vmatprep.subr.bf16.mxu0 %v3747_v0 }
 0x8b8   :  { %v3605_v63 = vpop.permute.xlu1 %3604 }
 0x8b9   :  { %v3607_v1 = vunpack.i.h.bf16 %v3605_v63  ;;  %v3606_v2 = vunpack.i.l.bf16 %v3605_v63  ;;  %v3649_v63 = vld [vmem:[%s4545_s15] sm:$0xff]  }
 0x8bb   :  { %v1235_v8 = vsel %vm219_vm5, %v4026_v34, %v3607_v1  ;;  %v1234_v9 = vsel %vm219_vm5, %v4024_v31, %v3606_v2  ;;  %v3064_v31 = vld [vmem:[%s4543_s10] ss:$0 sm:$0xff] }
 0x8bc   :  { %v3610_v38 = vpop.permute.xlu1 %3609 }
 0x8bd   :  { %v3612_v5 = vunpack.i.h.bf16 %v3610_v38  ;;  %v3611_v6 = vunpack.i.l.bf16 %v3610_v38  ;;  %v3070_v38 = vld [vmem:[%s4548_s14] ss:$0 sm:$0xff] }
 0x8be   :  { %v3692_v19 = vpop.eup %3691 }
 0x8bf   :  { %v1102_v22 = vsel %vm219_vm5, %v3692_v19, 0.0  ;;  %v1237_v12 = vsel %vm170_vm4, %v1235_v8, %v3612_v5  ;;  %v1236_v13 = vsel %vm170_vm4, %v1234_v9, %v3611_v6 }
 0x8c0   :  { %1103 = vadd.xlane.f32.xlu0 %v1102_v22  ;;  %v3642_v22 = vld [vmem:[%s4545_s15 + $0x38] sm:$0xff]  }
 0x8c2   :  { %v3694_v23 = vpop.eup %3693 }
 0x8c3   :  { %v1105_v43 = vsel %vm219_vm5, %v3694_v23, 0.0 }
 0x8c4   :  { %1106 = vadd.xlane.f32.xlu0 %v1105_v43  ;;  %v3644_v43 = vld [vmem:[%s4545_s15 + $0x28] sm:$0xff]  }
 0x8da   :  { %1162 = vrot.lane.b32.xlu0 %v3948_v25, %s4565_s2 }
 0x949   :  { %v1104_v44 = vpop.xlane.xlu0 %1103 }
 0x94a   :  { %3695 = vrcp.f32 %v1104_v44  ;;  %v3645_v44 = vld [vmem:[%s4545_s15 + $0x20] sm:$0xff]  }
 0x94d   :  { %v1107_v45 = vpop.xlane.xlu0 %1106 }
 0x94e   :  { %3697 = vrcp.f32 %v1107_v45  ;;  %v3646_v45 = vld [vmem:[%s4545_s15 + $0x18] sm:$0xff]  }
 0x951   :  { %v1163_v46 = vpop.permute.xlu0 %1162 }
 0x952   :  { %v1168_v47 = vsel %vm456_vm6, %v1163_v46, 0 }
 0x953   :  { %3392 = vmatpush3.bf16.msra.mxu1 %v1168_v47 }
 0x954   :  { %3405 = vmatprep.subr.bf16.mxu1 %v3747_v0 }
 0x957   :  { %v3696_v48 = vpop.eup %3695 }
 0x958   :  { %v1109_v49 = vmul.f32 %v3696_v48, %v3692_v19  ;;  %v3641_v19 = vld [vmem:[%s4544_s13] sm:$0xff]  }
 0x95a   :  { %v1112_v50 = vpack.c.bf16 %v1109_v49, %v1109_v49 }
 0x95b   :  { %v3698_v51 = vpop.eup %3697 }
 0x95c   :  { %3388 = vmatmul.mubr.msk.bf16.vlgmr.msra.gmra.mxu0 %vm219_vm5, %v1112_v50  ;;  %v1111_v52 = vmul.f32 %v3698_v51, %v3694_v23  ;;  %v3643_v23 = vld [vmem:[%s4545_s15 + $0x30] sm:$0xff]  }
 0x95d   :  { %3401 = vmatprep.mubr.msk.bf16.mxu0 %vm3748_vm0, %v3747_v0  ;;  %3398 = vmatpush3.bf16.msra.mxu0 %v3638_v53  ;;  %v3068_v53 = vld [vmem:[%s4546_s11] ss:$0 sm:$0xff] }
 0x95e   :  { %v1113_v25 = vpack.c.bf16 %v1111_v52, %v1111_v52  ;;  %3399 = vmatprep.subr.bf16.mxu0 %v3747_v0 }
 0x960   :  { %3394 = vmatmul.mubr.msk.bf16.vlgmr.msra.gmra.mxu1 %vm219_vm5, %v1113_v25 }
 0x961   :  { %3409 = vmatprep.mubr.msk.bf16.mxu1 %vm3748_vm0, %v3747_v0  ;;  %3400 = vmatpush3.bf16.msra.mxu0 %v3639_v40 }
 0x962   :  { %3413 = vmatprep.subr.bf16.mxu0 %v3747_v0 }
 0xa1c   :  { %v1156_v54 = vpop.f32.mrf.mxu0 }
 0xa1e   :  { %v3389_v55 = vpop.f32.mrf.mxu0 }
 0xa20   :  { %v1159_v56 = vpop.f32.mrf.mxu0  ;;  %v1204_v57 = vpop.f32.mrf.mxu1 }
 0xa21   :  { %v3613_v58 = vpack.i.bf16 %v1204_v57, %v1156_v54  ;;  %v3069_v56 = vld [vmem:[%s4547_s12] ss:$0 sm:$0xff] }
 0xa22   :  { %v3390_v59 = vpop.f32.mrf.mxu0  ;;  %v3395_v60 = vpop.f32.mrf.mxu1 }
 0xa23   :  { %3614 = vrot.lane.b32.xlu0 %v3613_v58, %s4569_s30 }
 0xa24   :  { %v1207_v61 = vpop.f32.mrf.mxu1 }
 0xa25   :  { %v3647_v61 = vld [vmem:[%s4545_s15 + $0x10] sm:$0xff]  }
 0xa26   :  { %v3396_v62 = vpop.f32.mrf.mxu1 }
 0xa27   :  { %v3648_v62 = vld [vmem:[%s4545_s15 + $0x8] sm:$0xff]  }
 0xa95   :  { %v3615_v7 = vpop.permute.xlu0 %3614 }
 0xa96   :  { %v3617_v10 = vunpack.i.h.bf16 %v3615_v7  ;;  %v3616_v11 = vunpack.i.l.bf16 %v3615_v7 }
 0xa98   :  { %v1240_v14 = vsel %vm1238_vm7, %v1237_v12, %v3617_v10  ;;  %v1239_v15 = vsel %vm1238_vm7, %v1236_v13, %v3616_v11  ;;  %v3074_v12 = vld [vmem:[%s4549_s16] ss:$0 sm:$0xff] }
 0xa99   :  { %v1241_v16 = vpack.c.bf16 %v1240_v14, %v1239_v15 }
 0xa9b   :  { %3402 = vmatmul.mubr.msk.bf16.vlgmr.msra.gmra.mxu0 %vm103_vm1, %v1241_v16 }
 0xa9c   :  { %3429 = vmatprep.mubr.msk.bf16.mxu0 %vm3748_vm0, %v3747_v0  ;;  %3414 = vmatpush3.bf16.msra.mxu0 %v3642_v22 }
 0xa9d   :  { %3415 = vmatprep.subr.bf16.mxu0 %v3747_v0 }
 0xaa0   :  { %3416 = vmatpush3.bf16.msra.mxu0 %v3643_v23 }
 0xaa1   :  { %3417 = vmatprep.subr.bf16.mxu0 %v3747_v0 }
 0xaa4   :  { %3418 = vmatpush3.bf16.msra.mxu0 %v3644_v43 }
 0xaa5   :  { %3419 = vmatprep.subr.bf16.mxu0 %v3747_v0 }
 0xaa8   :  { %3420 = vmatpush3.bf16.msra.mxu0 %v3645_v44  ;;  %v3083_v44 = vld [vmem:[%s4550_s17] ss:$0 sm:$0xff] }
 0xaa9   :  { %3421 = vmatprep.subr.bf16.mxu0 %v3747_v0 }
 0xaac   :  { %3422 = vmatpush3.bf16.msra.mxu0 %v3646_v45 }
 0xaad   :  { %3423 = vmatprep.subr.bf16.mxu0 %v3747_v0 }
 0xab0   :  { %3424 = vmatpush3.bf16.msra.mxu0 %v3647_v61 }
 0xab1   :  { %3425 = vmatprep.subr.bf16.mxu0 %v3747_v0 }
 0xab4   :  { %3426 = vmatpush3.bf16.msra.mxu0 %v3648_v62 }
 0xab5   :  { %3427 = vmatprep.subr.bf16.mxu0 %v3747_v0 }
 0xab8   :  { %3428 = vmatpush3.bf16.msra.mxu0 %v3649_v63 }
 0xab9   :  { %3459 = vmatprep.subr.bf16.mxu0 %v3747_v0 }
 0xb5b   :  { %v1297_v34 = vpop.f32.mrf.mxu0 }
 0xb5c   :  { %v1298_v18 = vadd.f32 %v3064_v31, %v1297_v34 }
 0xb5d   :  { %v3403_v20 = vpop.f32.mrf.mxu0 }
 0xb5e   :  { %v1304_v21 = vadd.f32 %v1298_v18, %v3903_v3 }
 0xb5f   :  { %v1300_v24 = vpop.f32.mrf.mxu0 }
 0xb60   :  { %v1301_v26 = vadd.f32 %v3064_v31, %v1300_v24  ;;  %v1306_v27 = vsel %vm103_vm1, %v1304_v21, 0.0 }
 0xb61   :  { %1307 = vadd.xlane.f32.xlu1 %v1306_v27  ;;  %v3404_v28 = vpop.f32.mrf.mxu0 }
 0xb62   :  { %v1305_v29 = vadd.f32 %v1301_v26, %v3908_v4  ;;  %v3640_v4 = vld [vmem:[%s4544_s13 + $0x8] sm:$0xff]  }
 0xb63   :  { %3406 = vmatpush3.bf16.msra.mxu1 %v3640_v4 }
 0xb64   :  { %v1309_v30 = vsel %vm103_vm1, %v1305_v29, 0.0  ;;  %3407 = vmatprep.subr.bf16.mxu1 %v3747_v0 }
 0xb65   :  { %1310 = vadd.xlane.f32.xlu0 %v1309_v30 }
 0xb67   :  { %3408 = vmatpush3.bf16.msra.mxu1 %v3641_v19 }
 0xb68   :  { %3433 = vmatprep.subr.bf16.mxu1 %v3747_v0 }
 0xbea   :  { %v1308_v32 = vpop.xlane.xlu1 %1307 }
 0xbeb   :  { %v1313_v33 = vmul.f32 0.03125, %v1308_v32 }
 0xbed   :  { %v1315_v35 = vsub.f32 %v1304_v21, %v1313_v33 }
 0xbee   :  { %v1311_v36 = vpop.xlane.xlu0 %1310 }
 0xbef   :  { %v1314_v37 = vmul.f32 0.03125, %v1311_v36  ;;  %v1317_v39 = vmul.f32 %v1315_v35, %v1315_v35 }
 0xbf1   :  { %v1316_v41 = vsub.f32 %v1305_v29, %v1314_v37  ;;  %v1319_v3 = vsel %vm103_vm1, %v1317_v39, 0.0  ;;  %v3650_v39 = vld [vmem:[%s4585_s27 + $0x18] sm:$0xff]  }
 0xbf2   :  { %1320 = vadd.xlane.f32.xlu0 %v1319_v3 }
 0xbf3   :  { %v1318_v42 = vmul.f32 %v1316_v41, %v1316_v41 }
 0xbf5   :  { %v1322_v17 = vsel %vm103_vm1, %v1318_v42, 0.0 }
 0xbf6   :  { %1323 = vadd.xlane.f32.xlu1 %v1322_v17 }
 0xc7b   :  { %v1321_v46 = vpop.xlane.xlu0 %1320 }
 0xc7c   :  { %v1325_v47 = vmul.f32 0.03125, %v1321_v46 }
 0xc7e   :  { %v1327_v48 = vadd.f32 1e-05, %v1325_v47 }
 0xc7f   :  { %v1324_v49 = vpop.xlane.xlu1 %1323 }
 0xc80   :  { %3699 = vrsqrt.f32 %v1327_v48  ;;  %v1326_v50 = vmul.f32 0.03125, %v1324_v49  ;;  %v3084_v48 = vld [vmem:[%s4551_s18] ss:$0 sm:$0xff] }
 0xc82   :  { %v1328_v51 = vadd.f32 1e-05, %v1326_v50 }
 0xc84   :  { %3701 = vrsqrt.f32 %v1328_v51 }
 0xc8d   :  { %v3700_v52 = vpop.eup %3699 }
 0xc8e   :  { %v1331_v25 = vmul.f32 %v3700_v52, %v1315_v35 }
 0xc90   :  { %v1339_v55 = vmul.f32 %v3068_v53, %v1331_v25  ;;  %v3121_v25 = vld [vmem:[%s4590_s7 + $0x1] ss:$0 sm:$0xff]  ;;  %s4594_s7 = smov 112  }
 0xc91   :  { %v3702_v40 = vpop.eup %3701 }
 0xc92   :  { %v1332_v54 = vmul.f32 %v3702_v40, %v1316_v41  ;;  %v1347_v58 = vadd.f32 %v3069_v56, %v1339_v55  ;;  %v3651_v41 = vld [vmem:[%s4585_s27 + $0x10] sm:$0xff]  }
 0xc94   :  { %v1340_v57 = vmul.f32 %v3068_v53, %v1332_v54 }
 0xc96   :  { %v1348_v59 = vadd.f32 %v3069_v56, %v1340_v57 }
 0xc98   :  { %v1349_v60 = vpack.c.bf16 %v1348_v59, %v1347_v58 }
 0xc9a   :  { %3410 = vmatmul.mubr.msk.bf16.vlgmr.msra.gmra.mxu1 %vm103_vm1, %v1349_v60 }
 0xc9b   :  { %3437 = vmatprep.mubr.msk.bf16.mxu1 %vm3748_vm0, %v3747_v0  ;;  %3434 = vmatpush3.bf16.msra.mxu1 %v3650_v39 }
 0xc9c   :  { %3435 = vmatprep.subr.bf16.mxu1 %v3747_v0 }
 0xc9f   :  { %3436 = vmatpush3.bf16.msra.mxu1 %v3651_v41 }
 0xca0   :  { %3441 = vmatprep.subr.bf16.mxu1 %v3747_v0 }
 0xd5a   :  { %v1405_v1 = vpop.f32.mrf.mxu1 }
 0xd5b   :  { %v1406_v5 = vadd.f32 %v3070_v38, %v1405_v1 }
 0xd5c   :  { %v3411_v2 = vpop.f32.mrf.mxu1 }
 0xd5d   :  { %v1412_v9 = vmax.f32 %v1406_v5, 0.0 }
 0xd5e   :  { %v1408_v6 = vpop.f32.mrf.mxu1 }
 0xd5f   :  { %v1409_v7 = vadd.f32 %v3070_v38, %v1408_v6 }
 0xd60   :  { %v3412_v8 = vpop.f32.mrf.mxu1 }
 0xd61   :  { %v1413_v10 = vmax.f32 %v1409_v7, 0.0 }
 0xd63   :  { %v1414_v11 = vpack.c.bf16 %v1413_v10, %v1412_v9 }
 0xd65   :  { %3430 = vmatmul.mubr.bf16.vlgmr.msra.gmra.mxu0 %v1414_v11 }
 0xd66   :  { %3461 = vmatprep.mubr.msk.bf16.mxu0 %vm3748_vm0, %v3747_v0 }
 0xe25   :  { %v1503_v13 = vpop.f32.mrf.mxu0 }
 0xe26   :  { %v1504_v14 = vadd.f32 %v3074_v12, %v1503_v13 }
 0xe27   :  { %v3431_v15 = vpop.f32.mrf.mxu0 }
 0xe28   :  { %v1510_v16 = vadd.f32 %v1504_v14, %v1347_v58 }
 0xe29   :  { %v1506_v31 = vpop.f32.mrf.mxu0 }
 0xe2a   :  { %v1507_v34 = vadd.f32 %v3074_v12, %v1506_v31  ;;  %v1512_v18 = vsel %vm103_vm1, %v1510_v16, 0.0 }
 0xe2b   :  { %1513 = vadd.xlane.f32.xlu0 %v1512_v18  ;;  %v3432_v20 = vpop.f32.mrf.mxu0 }
 0xe2c   :  { %v1511_v21 = vadd.f32 %v1507_v34, %v1348_v59 }
 0xe2e   :  { %v1515_v24 = vsel %vm103_vm1, %v1511_v21, 0.0 }
 0xe2f   :  { %1516 = vadd.xlane.f32.xlu1 %v1515_v24 }
 0xeb4   :  { %v1514_v26 = vpop.xlane.xlu0 %1513 }
 0xeb5   :  { %v1518_v27 = vmul.f32 0.03125, %v1514_v26 }
 0xeb7   :  { %v1520_v28 = vsub.f32 %v1510_v16, %v1518_v27 }
 0xeb8   :  { %v1517_v29 = vpop.xlane.xlu1 %1516 }
 0xeb9   :  { %v1519_v30 = vmul.f32 0.03125, %v1517_v29  ;;  %v1522_v32 = vmul.f32 %v1520_v28, %v1520_v28 }
 0xebb   :  { %v1521_v33 = vsub.f32 %v1511_v21, %v1519_v30  ;;  %v1524_v35 = vsel %vm103_vm1, %v1522_v32, 0.0 }
 0xebc   :  { %1525 = vadd.xlane.f32.xlu0 %v1524_v35 }
 0xebd   :  { %v1523_v36 = vmul.f32 %v1521_v33, %v1521_v33 }
 0xebf   :  { %v1527_v37 = vsel %vm103_vm1, %v1523_v36, 0.0 }
 0xec0   :  { %1528 = vadd.xlane.f32.xlu1 %v1527_v37 }
 0xf45   :  { %v1526_v3 = vpop.xlane.xlu0 %1525 }
 0xf46   :  { %v1530_v42 = vmul.f32 0.03125, %v1526_v3 }
 0xf48   :  { %v1532_v17 = vadd.f32 1e-05, %v1530_v42 }
 0xf49   :  { %v1529_v4 = vpop.xlane.xlu1 %1528 }
 0xf4a   :  { %3703 = vrsqrt.f32 %v1532_v17  ;;  %v1531_v19 = vmul.f32 0.03125, %v1529_v4 }
 0xf4c   :  { %v1533_v22 = vadd.f32 1e-05, %v1531_v19 }
 0xf4e   :  { %3705 = vrsqrt.f32 %v1533_v22 }
 0xf57   :  { %v3704_v23 = vpop.eup %3703 }
 0xf58   :  { %v1536_v43 = vmul.f32 %v3704_v23, %v1520_v28 }
 0xf5a   :  { %v1544_v47 = vmul.f32 %v3083_v44, %v1536_v43 }
 0xf5b   :  { %v3706_v45 = vpop.eup %3705 }
 0xf5c   :  { %v1537_v46 = vmul.f32 %v3706_v45, %v1521_v33  ;;  %v4233_v50 = vadd.f32 %v3084_v48, %v1544_v47 }
 0xf5e   :  { %v1545_v49 = vmul.f32 %v3083_v44, %v1537_v46 }
 0xf60   :  { %v4235_v51 = vadd.f32 %v3084_v48, %v1545_v49 }
 0xf62   :  { %v1602_v52 = vpack.c.bf16 %v4235_v51, %v4233_v50 }
 0xf64   :  { %3438 = vmatmul.mubr.msk.bf16.vlgmr.msra.gmra.mxu1 %vm103_vm1, %v1602_v52 }
 0xf65   :  { %3443 = vmatprep.mubr.msk.bf16.mxu1 %vm3748_vm0, %v3747_v0 }
0x1024   :  { %v1658_v53 = vpop.f32.mrf.mxu1 }
0x1025   :  { %v1659_v40 = vadd.f32 %v3121_v25, %v1658_v53 }
0x1026   :  { %v3439_v54 = vpop.f32.mrf.mxu1 }
0x1027   :  { %v4245_v55 = vpack.c.bf16 %v1659_v40, %v1659_v40  ;;  %v1665_v62 = vmul.f32 0.35355338, %v1659_v40 }
0x1028   :  { %v1661_v56 = vpop.f32.mrf.mxu1 }
0x1029   :  { %v1662_v57 = vadd.f32 %v3121_v25, %v1661_v56  ;;  %1672 = vrot.lane.b32.xlu0 %v4245_v55, %s3749_s8  ;;  %v4255_v38 = vpack.c.bf16 %v1665_v62, %v1665_v62 }
0x102a   :  { %v3440_v58 = vpop.f32.mrf.mxu1 }
0x102b   :  { %v4249_v59 = vpack.c.bf16 %v1662_v57, %v1662_v57  ;;  %v1666_v2 = vmul.f32 0.35355338, %v1662_v57 }
0x102d   :  { %1721 = vrot.lane.b32.xlu1 %v4249_v59, %s3749_s8  ;;  %v4263_v5 = vpack.c.bf16 %v1666_v2, %v1666_v2  ;;  %s4595_s8 = smov 48  }
0x109b   :  { %v1673_v60 = vpop.permute.xlu0 %1672 }
0x109c   :  { %v1678_v61 = vsel %vm219_vm5, %v1673_v60, 0 }
0x109d   :  { %3442 = vmatpush3.bf16.xpose.msra.mxu1 %v1678_v61 }
0x109e   :  { %3447 = vmatprep.subr.bf16.mxu1 %v3747_v0 }
0x109f   :  { %v1722_v63 = vpop.permute.xlu1 %1721 }
0x10a0   :  { %v1727_v1 = vsel %vm219_vm5, %v1722_v63, 0 }
0x10a4   :  { %3444 = vmatmul.mubr.msk.bf16.vlgmr.msra.gmra.mxu1 %vm219_vm5, %v4255_v38 }
0x10a5   :  { %3448 = vmatpush3.bf16.xpose.msra.mxu1 %v1727_v1  ;;  %3449 = vmatprep.mubr.msk.bf16.mxu1 %vm3748_vm0, %v3747_v0 }
0x10a6   :  { %3453 = vmatprep.subr.bf16.mxu1 %v3747_v0 }
0x10ac   :  { %3450 = vmatmul.mubr.msk.bf16.vlgmr.msra.gmra.mxu1 %vm219_vm5, %v4263_v5 }
0x10ad   :  { %3455 = vmatprep.mubr.msk.bf16.mxu1 %vm3748_vm0, %v3747_v0 }
0x1164   :  { %v1714_v6 = vpop.f32.mrf.mxu1 }
0x1165   :  { %v1769_v7 = vsel %vm219_vm5, %v1714_v6, -inf }
0x1166   :  { %1770 = vmax.xlane.f32.xlu1 %v1769_v7  ;;  %v3445_v8 = vpop.f32.mrf.mxu1 }
0x1168   :  { %v1717_v9 = vpop.f32.mrf.mxu1 }
0x116a   :  { %v3446_v10 = vpop.f32.mrf.mxu1 }
0x116c   :  { %v1763_v11 = vpop.f32.mrf.mxu1 }
0x116d   :  { %v1772_v12 = vsel %vm219_vm5, %v1763_v11, -inf }
0x116e   :  { %1773 = vmax.xlane.f32.xlu0 %v1772_v12  ;;  %v3451_v13 = vpop.f32.mrf.mxu1 }
0x1170   :  { %v1766_v14 = vpop.f32.mrf.mxu1 }
0x1172   :  { %v3452_v15 = vpop.f32.mrf.mxu1 }
0x1177   :  { %1841 = vrot.lane.b32.xlu1 %v4249_v59, %s3750_s26 }
0x1184   :  { %1793 = vrot.lane.b32.xlu0 %v4245_v55, %s3750_s26  ;;  %s4596_s26 = smov 72  }
0x11ef   :  { %v1771_v16 = vpop.xlane.xlu1 %1770 }
0x11f0   :  { %v1775_v31 = vsub.f32 %v1714_v6, %v1771_v16 }
0x11f2   :  { %v1777_v34 = vmul.f32 1.442695, %v1775_v31 }
0x11f3   :  { %v1842_v18 = vpop.permute.xlu1 %1841 }
0x11f4   :  { %3707 = vpow2.f32 %v1777_v34  ;;  %v1847_v20 = vsel %vm456_vm6, %v1842_v18, 0 }
0x11f5   :  { %3460 = vmatpush3.bf16.msra.mxu0 %v1847_v20 }
0x11f6   :  { %3471 = vmatprep.subr.bf16.mxu0 %v3747_v0 }
0x11f7   :  { %v1774_v21 = vpop.xlane.xlu0 %1773 }
0x11f8   :  { %v1776_v24 = vsub.f32 %v1763_v11, %v1774_v21 }
0x11fa   :  { %v1779_v26 = vmul.f32 1.442695, %v1776_v24 }
0x11fb   :  { %v1794_v27 = vpop.permute.xlu0 %1793 }
0x11fc   :  { %3709 = vpow2.f32 %v1779_v26  ;;  %v1799_v28 = vsel %vm456_vm6, %v1794_v27, 0 }
0x11fd   :  { %3454 = vmatpush3.bf16.msra.mxu1 %v1799_v28 }
0x11fe   :  { %3465 = vmatprep.subr.bf16.mxu1 %v3747_v0 }
0x1201   :  { %v3708_v29 = vpop.eup %3707 }
0x1202   :  { %v1781_v30 = vsel %vm219_vm5, %v3708_v29, 0.0 }
0x1203   :  { %1782 = vadd.xlane.f32.xlu0 %v1781_v30 }
0x1209   :  { %v3710_v32 = vpop.eup %3709 }
0x120a   :  { %v1784_v33 = vsel %vm219_vm5, %v3710_v32, 0.0 }
0x120b   :  { %1785 = vadd.xlane.f32.xlu1 %v1784_v33 }
0x1219   :  { %1943 = vrot.lane.b32.xlu0 %v4249_v59, %s3751_s23 }
0x121c   :  { %1892 = vrot.lane.b32.xlu1 %v4245_v55, %s3751_s23  ;;  %s4597_s23 = smov 104  }
0x121d   :  { %1941 = vrot.lane.b32.xlu0 %v4263_v5, %s3752_s28 }
0x1220   :  { %1890 = vrot.lane.b32.xlu1 %v4255_v38, %s3752_s28  ;;  %s4598_s28 = smov 40  }
0x128c   :  { %v1783_v35 = vpop.xlane.xlu0 %1782 }
0x128d   :  { %3711 = vrcp.f32 %v1783_v35 }
0x1290   :  { %v1944_v19 = vpop.permute.xlu0 %1943 }
0x1291   :  { %v1949_v43 = vsel %vm219_vm5, %v1944_v19, 0 }
0x1294   :  { %v1786_v36 = vpop.xlane.xlu1 %1785  ;;  %v1942_v44 = vpop.permute.xlu0 %1941 }
0x1295   :  { %3713 = vrcp.f32 %v1786_v36 }
0x1298   :  { %v1893_v41 = vpop.permute.xlu1 %1892 }
0x1299   :  { %v1898_v42 = vsel %vm219_vm5, %v1893_v41, 0 }
0x129a   :  { %v3712_v37 = vpop.eup %3711 }
0x129b   :  { %v1788_v39 = vmul.f32 %v3712_v37, %v3708_v29 }
0x129c   :  { %v1891_v23 = vpop.permute.xlu1 %1890 }
0x129d   :  { %v1791_v3 = vpack.c.bf16 %v1788_v39, %v1788_v39 }
0x129f   :  { %3456 = vmatmul.mubr.msk.bf16.vlgmr.msra.gmra.mxu1 %vm219_vm5, %v1791_v3 }
0x12a0   :  { %3466 = vmatpush3.bf16.xpose.msra.mxu1 %v1898_v42  ;;  %3467 = vmatprep.mubr.msk.bf16.mxu1 %vm3748_vm0, %v3747_v0 }
0x12a1   :  { %3477 = vmatprep.subr.bf16.mxu1 %v3747_v0 }
0x12a2   :  { %v3714_v17 = vpop.eup %3713 }
0x12a3   :  { %v1790_v4 = vmul.f32 %v3714_v17, %v3710_v32 }
0x12a5   :  { %v1792_v22 = vpack.c.bf16 %v1790_v4, %v1790_v4 }
0x12a7   :  { %3462 = vmatmul.mubr.msk.bf16.vlgmr.msra.gmra.mxu0 %vm219_vm5, %v1792_v22  ;;  %3468 = vmatmul.mubr.msk.bf16.vlgmr.msra.gmra.mxu1 %vm219_vm5, %v1891_v23 }
0x12a8   :  { %3472 = vmatpush3.bf16.xpose.msra.mxu0 %v1949_v43  ;;  %3473 = vmatprep.mubr.msk.bf16.mxu0 %vm3748_vm0, %v3747_v0 }
0x12a9   :  { %3483 = vmatprep.subr.bf16.mxu0 %v3747_v0  ;;  %3479 = vmatprep.mubr.msk.bf16.mxu1 %vm3748_vm0, %v3747_v0 }
0x12af   :  { %3474 = vmatmul.mubr.msk.bf16.vlgmr.msra.gmra.mxu0 %vm219_vm5, %v1942_v44 }
0x12b0   :  { %3485 = vmatprep.mubr.msk.bf16.mxu0 %vm3748_vm0, %v3747_v0 }
0x135f   :  { %v4305_v45 = vpop.f32.mrf.mxu1 }
0x1361   :  { %v3457_v46 = vpop.f32.mrf.mxu1 }
0x1363   :  { %v1838_v47 = vpop.f32.mrf.mxu1 }
0x1365   :  { %v3458_v48 = vpop.f32.mrf.mxu1 }
0x1367   :  { %v4307_v49 = vpop.f32.mrf.mxu0  ;;  %v1934_v52 = vpop.f32.mrf.mxu1 }
0x1368   :  { %v1991_v25 = vsel %vm219_vm5, %v1934_v52, -inf }
0x1369   :  { %1992 = vmax.xlane.f32.xlu1 %v1991_v25  ;;  %v3463_v53 = vpop.f32.mrf.mxu0  ;;  %v3469_v40 = vpop.f32.mrf.mxu1 }
0x136b   :  { %v1886_v54 = vpop.f32.mrf.mxu0  ;;  %v1937_v56 = vpop.f32.mrf.mxu1 }
0x136d   :  { %v3464_v57 = vpop.f32.mrf.mxu0  ;;  %v3470_v58 = vpop.f32.mrf.mxu1 }
0x136f   :  { %v1985_v60 = vpop.f32.mrf.mxu0 }
0x1370   :  { %v1994_v61 = vsel %vm219_vm5, %v1985_v60, -inf }
0x1371   :  { %1995 = vmax.xlane.f32.xlu0 %v1994_v61  ;;  %v3475_v62 = vpop.f32.mrf.mxu0 }
0x1373   :  { %v1988_v63 = vpop.f32.mrf.mxu0 }
0x1375   :  { %v3476_v1 = vpop.f32.mrf.mxu0 }
0x137a   :  { %2063 = vrot.lane.b32.xlu1 %v4249_v59, %s3753_s4 }
0x1387   :  { %2015 = vrot.lane.b32.xlu0 %v4245_v55, %s3753_s4  ;;  %s4599_s4 = smov 16  }
0x13f2   :  { %v1993_v2 = vpop.xlane.xlu1 %1992 }
0x13f3   :  { %v1997_v6 = vsub.f32 %v1934_v52, %v1993_v2 }
0x13f5   :  { %v1999_v7 = vmul.f32 1.442695, %v1997_v6 }
0x13f6   :  { %v2064_v8 = vpop.permute.xlu1 %2063 }
0x13f7   :  { %3715 = vpow2.f32 %v1999_v7  ;;  %v2069_v9 = vsel %vm456_vm6, %v2064_v8, 0 }
0x13f8   :  { %3484 = vmatpush3.bf16.msra.mxu0 %v2069_v9 }
0x13f9   :  { %3495 = vmatprep.subr.bf16.mxu0 %v3747_v0 }
0x13fa   :  { %v1996_v10 = vpop.xlane.xlu0 %1995 }
0x13fb   :  { %v1998_v11 = vsub.f32 %v1985_v60, %v1996_v10 }
0x13fd   :  { %v2001_v12 = vmul.f32 1.442695, %v1998_v11 }
0x13fe   :  { %v2016_v13 = vpop.permute.xlu0 %2015 }
0x13ff   :  { %3717 = vpow2.f32 %v2001_v12  ;;  %v2021_v14 = vsel %vm456_vm6, %v2016_v13, 0 }
0x1400   :  { %3478 = vmatpush3.bf16.msra.mxu1 %v2021_v14 }
0x1401   :  { %3489 = vmatprep.subr.bf16.mxu1 %v3747_v0 }
0x1404   :  { %v3716_v15 = vpop.eup %3715 }
0x1405   :  { %v2003_v16 = vsel %vm219_vm5, %v3716_v15, 0.0 }
0x1406   :  { %2004 = vadd.xlane.f32.xlu0 %v2003_v16 }
0x140c   :  { %v3718_v31 = vpop.eup %3717 }
0x140d   :  { %v2006_v34 = vsel %vm219_vm5, %v3718_v31, 0.0 }
0x140e   :  { %2007 = vadd.xlane.f32.xlu1 %v2006_v34 }
0x141c   :  { %2163 = vrot.lane.b32.xlu0 %v4249_v59, %s3754_s3 }
0x141f   :  { %2113 = vrot.lane.b32.xlu1 %v4245_v55, %s3754_s3  ;;  %s4600_s3 = smov 8  }
0x1420   :  { %2161 = vrot.lane.b32.xlu0 %v4263_v5, %s4594_s7 }
0x1423   :  { %2111 = vrot.lane.b32.xlu1 %v4255_v38, %s4594_s7 }
0x148f   :  { %v2005_v18 = vpop.xlane.xlu0 %2004 }
0x1490   :  { %3719 = vrcp.f32 %v2005_v18 }
0x1493   :  { %v2164_v32 = vpop.permute.xlu0 %2163 }
0x1494   :  { %v2169_v36 = vsel %vm219_vm5, %v2164_v32, 0 }
0x1497   :  { %v2008_v20 = vpop.xlane.xlu1 %2007  ;;  %v2162_v37 = vpop.permute.xlu0 %2161 }
0x1498   :  { %3721 = vrcp.f32 %v2008_v20 }
0x149b   :  { %v2114_v26 = vpop.permute.xlu1 %2113 }
0x149c   :  { %v2119_v28 = vsel %vm219_vm5, %v2114_v26, 0 }
0x149d   :  { %v3720_v21 = vpop.eup %3719 }
0x149e   :  { %v2010_v24 = vmul.f32 %v3720_v21, %v3716_v15 }
0x149f   :  { %v2112_v35 = vpop.permute.xlu1 %2111 }
0x14a0   :  { %v2013_v27 = vpack.c.bf16 %v2010_v24, %v2010_v24 }
0x14a2   :  { %3480 = vmatmul.mubr.msk.bf16.vlgmr.msra.gmra.mxu1 %vm219_vm5, %v2013_v27 }
0x14a3   :  { %3490 = vmatpush3.bf16.xpose.msra.mxu1 %v2119_v28  ;;  %3491 = vmatprep.mubr.msk.bf16.mxu1 %vm3748_vm0, %v3747_v0 }
0x14a4   :  { %3501 = vmatprep.subr.bf16.mxu1 %v3747_v0 }
0x14a5   :  { %v3722_v29 = vpop.eup %3721 }
0x14a6   :  { %v2012_v30 = vmul.f32 %v3722_v29, %v3718_v31 }
0x14a8   :  { %v2014_v33 = vpack.c.bf16 %v2012_v30, %v2012_v30 }
0x14aa   :  { %3486 = vmatmul.mubr.msk.bf16.vlgmr.msra.gmra.mxu0 %vm219_vm5, %v2014_v33  ;;  %3492 = vmatmul.mubr.msk.bf16.vlgmr.msra.gmra.mxu1 %vm219_vm5, %v2112_v35 }
0x14ab   :  { %3496 = vmatpush3.bf16.xpose.msra.mxu0 %v2169_v36  ;;  %3497 = vmatprep.mubr.msk.bf16.mxu0 %vm3748_vm0, %v3747_v0 }
0x14ac   :  { %3507 = vmatprep.subr.bf16.mxu0 %v3747_v0  ;;  %3503 = vmatprep.mubr.msk.bf16.mxu1 %vm3748_vm0, %v3747_v0 }
0x14b2   :  { %3498 = vmatmul.mubr.msk.bf16.vlgmr.msra.gmra.mxu0 %vm219_vm5, %v2162_v37 }
0x14b3   :  { %3509 = vmatprep.mubr.msk.bf16.mxu0 %vm3748_vm0, %v3747_v0 }
0x1562   :  { %v4345_v39 = vpop.f32.mrf.mxu1 }
0x1564   :  { %v3481_v41 = vpop.f32.mrf.mxu1 }
0x1566   :  { %v2060_v3 = vpop.f32.mrf.mxu1 }
0x1568   :  { %v3482_v42 = vpop.f32.mrf.mxu1 }
0x156a   :  { %v4347_v17 = vpop.f32.mrf.mxu0  ;;  %v2155_v4 = vpop.f32.mrf.mxu1 }
0x156b   :  { %v3618_v19 = vpack.i.bf16 %v4347_v17, %v4345_v39  ;;  %v2211_v22 = vsel %vm219_vm5, %v2155_v4, -inf }
0x156c   :  { %2212 = vmax.xlane.f32.xlu1 %v2211_v22  ;;  %v3487_v23 = vpop.f32.mrf.mxu0  ;;  %v3493_v43 = vpop.f32.mrf.mxu1 }
0x156e   :  { %v2108_v44 = vpop.f32.mrf.mxu0  ;;  %v2158_v46 = vpop.f32.mrf.mxu1 }
0x1570   :  { %v3488_v47 = vpop.f32.mrf.mxu0  ;;  %v3494_v48 = vpop.f32.mrf.mxu1 }
0x1572   :  { %v2205_v52 = vpop.f32.mrf.mxu0 }
0x1573   :  { %v2214_v25 = vsel %vm219_vm5, %v2205_v52, -inf }
0x1574   :  { %2215 = vmax.xlane.f32.xlu0 %v2214_v25  ;;  %v3499_v53 = vpop.f32.mrf.mxu0 }
0x1576   :  { %v2208_v40 = vpop.f32.mrf.mxu0 }
0x1578   :  { %v3500_v54 = vpop.f32.mrf.mxu0 }
0x157d   :  { %2283 = vrot.lane.b32.xlu1 %v4249_v59, %s4595_s8 }
0x158a   :  { %2235 = vrot.lane.b32.xlu0 %v4245_v55, %s4595_s8 }
0x15f5   :  { %v2213_v56 = vpop.xlane.xlu1 %2212 }
0x15f6   :  { %v2217_v57 = vsub.f32 %v2155_v4, %v2213_v56 }
0x15f8   :  { %v2219_v58 = vmul.f32 1.442695, %v2217_v57 }
0x15f9   :  { %v2284_v60 = vpop.permute.xlu1 %2283 }
0x15fa   :  { %3723 = vpow2.f32 %v2219_v58  ;;  %v2289_v61 = vsel %vm456_vm6, %v2284_v60, 0 }
0x15fb   :  { %3508 = vmatpush3.bf16.msra.mxu0 %v2289_v61 }
0x15fc   :  { %3519 = vmatprep.subr.bf16.mxu0 %v3747_v0 }
0x15fd   :  { %v2216_v62 = vpop.xlane.xlu0 %2215 }
0x15fe   :  { %v2218_v63 = vsub.f32 %v2205_v52, %v2216_v62 }
0x1600   :  { %v2221_v1 = vmul.f32 1.442695, %v2218_v63 }
0x1601   :  { %v2236_v2 = vpop.permute.xlu0 %2235 }
0x1602   :  { %3725 = vpow2.f32 %v2221_v1  ;;  %v2241_v6 = vsel %vm456_vm6, %v2236_v2, 0 }
0x1603   :  { %3502 = vmatpush3.bf16.msra.mxu1 %v2241_v6 }
0x1604   :  { %3513 = vmatprep.subr.bf16.mxu1 %v3747_v0 }
0x1607   :  { %v3724_v7 = vpop.eup %3723 }
0x1608   :  { %v2223_v8 = vsel %vm219_vm5, %v3724_v7, 0.0 }
0x1609   :  { %2224 = vadd.xlane.f32.xlu0 %v2223_v8  ;;  %v3653_v8 = vld [vmem:[%s4542_s9 + $0x10] sm:$0xff]  }
0x160f   :  { %v3726_v9 = vpop.eup %3725 }
0x1610   :  { %v2226_v10 = vsel %vm219_vm5, %v3726_v9, 0.0 }
0x1611   :  { %2227 = vadd.xlane.f32.xlu1 %v2226_v10 }
0x161f   :  { %2383 = vrot.lane.b32.xlu0 %v4249_v59, %s4596_s26 }
0x1622   :  { %2333 = vrot.lane.b32.xlu1 %v4245_v55, %s4596_s26 }
0x1623   :  { %2381 = vrot.lane.b32.xlu0 %v4263_v5, %s4597_s23 }
0x1626   :  { %2331 = vrot.lane.b32.xlu1 %v4255_v38, %s4597_s23 }
0x1692   :  { %v2225_v11 = vpop.xlane.xlu0 %2224 }
0x1693   :  { %3727 = vrcp.f32 %v2225_v11 }
0x1696   :  { %v2384_v34 = vpop.permute.xlu0 %2383 }
0x1697   :  { %v2389_v21 = vsel %vm219_vm5, %v2384_v34, 0 }
0x169a   :  { %v2228_v12 = vpop.xlane.xlu1 %2227  ;;  %v2382_v24 = vpop.permute.xlu0 %2381 }
0x169b   :  { %3729 = vrcp.f32 %v2228_v12 }
0x169e   :  { %v2334_v15 = vpop.permute.xlu1 %2333 }
0x169f   :  { %v2339_v31 = vsel %vm219_vm5, %v2334_v15, 0 }
0x16a0   :  { %v3728_v13 = vpop.eup %3727 }
0x16a1   :  { %v2230_v14 = vmul.f32 %v3728_v13, %v3724_v7  ;;  %v3652_v7 = vld [vmem:[%s4542_s9 + $0x18] sm:$0xff]  }
0x16a2   :  { %v2332_v20 = vpop.permute.xlu1 %2331 }
0x16a3   :  { %v2233_v16 = vpack.c.bf16 %v2230_v14, %v2230_v14 }
0x16a5   :  { %3504 = vmatmul.mubr.msk.bf16.vlgmr.msra.gmra.mxu1 %vm219_vm5, %v2233_v16 }
0x16a6   :  { %3514 = vmatpush3.bf16.xpose.msra.mxu1 %v2339_v31  ;;  %3515 = vmatprep.mubr.msk.bf16.mxu1 %vm3748_vm0, %v3747_v0 }
0x16a7   :  { %3525 = vmatprep.subr.bf16.mxu1 %v3747_v0 }
0x16a8   :  { %v3730_v5 = vpop.eup %3729 }
0x16a9   :  { %v2232_v38 = vmul.f32 %v3730_v5, %v3726_v9 }
0x16ab   :  { %v2234_v18 = vpack.c.bf16 %v2232_v38, %v2232_v38 }
0x16ad   :  { %3510 = vmatmul.mubr.msk.bf16.vlgmr.msra.gmra.mxu0 %vm219_vm5, %v2234_v18  ;;  %3516 = vmatmul.mubr.msk.bf16.vlgmr.msra.gmra.mxu1 %vm219_vm5, %v2332_v20 }
0x16ae   :  { %3520 = vmatpush3.bf16.xpose.msra.mxu0 %v2389_v21  ;;  %3521 = vmatprep.mubr.msk.bf16.mxu0 %vm3748_vm0, %v3747_v0 }
0x16af   :  { %3531 = vmatprep.subr.bf16.mxu0 %v3747_v0  ;;  %3527 = vmatprep.mubr.msk.bf16.mxu1 %vm3748_vm0, %v3747_v0 }
0x16b5   :  { %3522 = vmatmul.mubr.msk.bf16.vlgmr.msra.gmra.mxu0 %vm219_vm5, %v2382_v24 }
0x16b6   :  { %3533 = vmatprep.mubr.msk.bf16.mxu0 %vm3748_vm0, %v3747_v0 }
0x1765   :  { %v2277_v26 = vpop.f32.mrf.mxu1 }
0x1767   :  { %v3505_v27 = vpop.f32.mrf.mxu1 }
0x1769   :  { %v2280_v28 = vpop.f32.mrf.mxu1 }
0x176b   :  { %v3506_v29 = vpop.f32.mrf.mxu1 }
0x176d   :  { %v2325_v30 = vpop.f32.mrf.mxu0  ;;  %v2375_v32 = vpop.f32.mrf.mxu1 }
0x176e   :  { %v3623_v33 = vpack.i.bf16 %v2325_v30, %v2277_v26  ;;  %v2431_v35 = vsel %vm219_vm5, %v2375_v32, -inf }
0x176f   :  { %2432 = vmax.xlane.f32.xlu1 %v2431_v35  ;;  %v3511_v36 = vpop.f32.mrf.mxu0  ;;  %v3517_v37 = vpop.f32.mrf.mxu1 }
0x1771   :  { %v2328_v41 = vpop.f32.mrf.mxu0  ;;  %v2378_v3 = vpop.f32.mrf.mxu1 }
0x1773   :  { %v3512_v42 = vpop.f32.mrf.mxu0  ;;  %v3518_v4 = vpop.f32.mrf.mxu1 }
0x1775   :  { %v2425_v22 = vpop.f32.mrf.mxu0 }
0x1776   :  { %v2434_v23 = vsel %vm219_vm5, %v2425_v22, -inf }
0x1777   :  { %2435 = vmax.xlane.f32.xlu0 %v2434_v23  ;;  %v3523_v43 = vpop.f32.mrf.mxu0 }
0x1779   :  { %v2428_v44 = vpop.f32.mrf.mxu0 }
0x177b   :  { %v3524_v46 = vpop.f32.mrf.mxu0 }
0x17f8   :  { %v2433_v47 = vpop.xlane.xlu1 %2432 }
0x17f9   :  { %v2437_v48 = vsub.f32 %v2375_v32, %v2433_v47 }
0x17fb   :  { %v2439_v52 = vmul.f32 1.442695, %v2437_v48 }
0x17fd   :  { %3731 = vpow2.f32 %v2439_v52 }
0x1800   :  { %v2436_v25 = vpop.xlane.xlu0 %2435 }
0x1801   :  { %v2438_v53 = vsub.f32 %v2425_v22, %v2436_v25 }
0x1803   :  { %v2441_v40 = vmul.f32 1.442695, %v2438_v53 }
0x1805   :  { %3733 = vpow2.f32 %v2441_v40 }
0x180a   :  { %v3732_v54 = vpop.eup %3731 }
0x180b   :  { %v2443_v56 = vsel %vm219_vm5, %v3732_v54, 0.0 }
0x180c   :  { %2444 = vadd.xlane.f32.xlu0 %v2443_v56 }
0x1812   :  { %v3734_v57 = vpop.eup %3733 }
0x1813   :  { %v2446_v58 = vsel %vm219_vm5, %v3734_v57, 0.0 }
0x1814   :  { %2447 = vadd.xlane.f32.xlu1 %v2446_v58  ;;  %v3656_v58 = vld [vmem:[%s4545_s15 + $0x78] sm:$0xff]  }
0x1822   :  { %2455 = vrot.lane.b32.xlu0 %v4245_v55, %s4598_s28 }
0x1825   :  { %2503 = vrot.lane.b32.xlu1 %v4249_v59, %s4598_s28 }
0x1826   :  { %3624 = vrot.lane.b32.xlu0 %v3623_v33, %s4599_s4 }
0x1829   :  { %3619 = vrot.lane.b32.xlu1 %v3618_v19, %s4600_s3 }
0x1895   :  { %v2445_v60 = vpop.xlane.xlu0 %2444 }
0x1896   :  { %3735 = vrcp.f32 %v2445_v60  ;;  %v3657_v60 = vld [vmem:[%s4545_s15 + $0x70] sm:$0xff]  }
0x1899   :  { %v2456_v61 = vpop.permute.xlu0 %2455 }
0x189a   :  { %v2461_v62 = vsel %vm456_vm6, %v2456_v61, 0  ;;  %v3658_v61 = vld [vmem:[%s4545_s15 + $0x68] sm:$0xff]  }
0x189b   :  { %3526 = vmatpush3.bf16.msra.mxu1 %v2461_v62  ;;  %v3659_v62 = vld [vmem:[%s4545_s15 + $0x60] sm:$0xff]  }
0x189c   :  { %3537 = vmatprep.subr.bf16.mxu1 %v3747_v0 }
0x189d   :  { %v2448_v63 = vpop.xlane.xlu1 %2447  ;;  %v3625_v18 = vpop.permute.xlu0 %3624 }
0x189e   :  { %3737 = vrcp.f32 %v2448_v63  ;;  %v3627_v24 = vunpack.i.h.bf16 %v3625_v18  ;;  %v3626_v26 = vunpack.i.l.bf16 %v3625_v18  ;;  %v3660_v63 = vld [vmem:[%s4545_s15 + $0x58] sm:$0xff]  }
0x18a1   :  { %v2504_v55 = vpop.permute.xlu1 %2503 }
0x18a2   :  { %v2509_v59 = vsel %vm456_vm6, %v2504_v55, 0 }
0x18a3   :  { %v3736_v1 = vpop.eup %3735  ;;  %3532 = vmatpush3.bf16.msra.mxu0 %v2509_v59 }
0x18a4   :  { %v2450_v2 = vmul.f32 %v3736_v1, %v3732_v54  ;;  %3545 = vmatprep.subr.bf16.mxu0 %v3747_v0 }
0x18a5   :  { %v3620_v5 = vpop.permute.xlu1 %3619 }
0x18a6   :  { %v2453_v39 = vpack.c.bf16 %v2450_v2, %v2450_v2  ;;  %v3622_v38 = vunpack.i.h.bf16 %v3620_v5  ;;  %v3621_v34 = vunpack.i.l.bf16 %v3620_v5  ;;  %v3663_v5 = vld [vmem:[%s4545_s15 + $0x40] sm:$0xff]  }
0x18a8   :  { %3528 = vmatmul.mubr.msk.bf16.vlgmr.msra.gmra.mxu1 %vm219_vm5, %v2453_v39  ;;  %v2576_v20 = vsel %vm219_vm5, %v4307_v49, %v3622_v38  ;;  %v2575_v21 = vsel %vm219_vm5, %v4305_v45, %v3621_v34  ;;  %v3141_v45 = vld [vmem:[%s4543_s10 + $0x1] ss:$0 sm:$0xff] }
0x18a9   :  { %3541 = vmatprep.mubr.msk.bf16.mxu1 %vm3748_vm0, %v3747_v0  ;;  %3538 = vmatpush3.bf16.msra.mxu1 %v3652_v7  ;;  %v2577_v30 = vsel %vm170_vm4, %v2575_v21, %v3626_v26  ;;  %v2578_v32 = vsel %vm170_vm4, %v2576_v20, %v3627_v24  ;;  %v3145_v7 = vld [vmem:[%s4546_s11 + $0x1] ss:$0 sm:$0xff] }
0x18aa   :  { %3539 = vmatprep.subr.bf16.mxu1 %v3747_v0  ;;  %v3147_v38 = vld [vmem:[%s4548_s14 + $0x1] ss:$0 sm:$0xff] }
0x18ab   :  { %v3738_v17 = vpop.eup %3737 }
0x18ac   :  { %v2452_v19 = vmul.f32 %v3738_v17, %v3734_v57  ;;  %v3655_v57 = vld [vmem:[%s4544_s13 + $0x10] sm:$0xff]  }
0x18ad   :  { %3540 = vmatpush3.bf16.msra.mxu1 %v3653_v8 }
0x18ae   :  { %v2454_v6 = vpack.c.bf16 %v2452_v19, %v2452_v19  ;;  %3553 = vmatprep.subr.bf16.mxu1 %v3747_v0 }
0x18b0   :  { %3534 = vmatmul.mubr.msk.bf16.vlgmr.msra.gmra.mxu0 %vm219_vm5, %v2454_v6 }
0x18b1   :  { %3549 = vmatprep.mubr.msk.bf16.mxu0 %vm3748_vm0, %v3747_v0 }
0x1968   :  { %v2497_v9 = vpop.f32.mrf.mxu1 }
0x196a   :  { %v3529_v10 = vpop.f32.mrf.mxu1 }
0x196c   :  { %v2500_v11 = vpop.f32.mrf.mxu1 }
0x196d   :  { %v3146_v11 = vld [vmem:[%s4547_s12 + $0x1] ss:$0 sm:$0xff] }
0x196e   :  { %v3530_v12 = vpop.f32.mrf.mxu1 }
0x1970   :  { %v2545_v13 = vpop.f32.mrf.mxu0 }
0x1971   :  { %v3628_v14 = vpack.i.bf16 %v2545_v13, %v2497_v9 }
0x1972   :  { %v3535_v15 = vpop.f32.mrf.mxu0 }
0x1973   :  { %3629 = vrot.lane.b32.xlu1 %v3628_v14, %s4601_s1 }
0x1974   :  { %v2548_v16 = vpop.f32.mrf.mxu0 }
0x1975   :  { %v3661_v16 = vld [vmem:[%s4545_s15 + $0x50] sm:$0xff]  }
0x1976   :  { %v3536_v31 = vpop.f32.mrf.mxu0 }
0x1977   :  { %v3662_v31 = vld [vmem:[%s4545_s15 + $0x48] sm:$0xff]  }
0x19e5   :  { %v3630_v27 = vpop.permute.xlu1 %3629 }
0x19e6   :  { %v3632_v28 = vunpack.i.h.bf16 %v3630_v27  ;;  %v3631_v29 = vunpack.i.l.bf16 %v3630_v27 }
0x19e8   :  { %v2580_v33 = vsel %vm1238_vm7, %v2578_v32, %v3632_v28  ;;  %v2579_v35 = vsel %vm1238_vm7, %v2577_v30, %v3631_v29  ;;  %v3151_v30 = vld [vmem:[%s4549_s16 + $0x1] ss:$0 sm:$0xff] }
0x19e9   :  { %v2581_v36 = vpack.c.bf16 %v2580_v33, %v2579_v35 }
0x19eb   :  { %3542 = vmatmul.mubr.msk.bf16.vlgmr.msra.gmra.mxu1 %vm103_vm1, %v2581_v36 }
0x19ec   :  { %3569 = vmatprep.mubr.msk.bf16.mxu1 %vm3748_vm0, %v3747_v0  ;;  %3554 = vmatpush3.bf16.msra.mxu1 %v3656_v58 }
0x19ed   :  { %3555 = vmatprep.subr.bf16.mxu1 %v3747_v0 }
0x19f0   :  { %3556 = vmatpush3.bf16.msra.mxu1 %v3657_v60 }
0x19f1   :  { %3557 = vmatprep.subr.bf16.mxu1 %v3747_v0 }
0x19f4   :  { %3558 = vmatpush3.bf16.msra.mxu1 %v3658_v61 }
0x19f5   :  { %3559 = vmatprep.subr.bf16.mxu1 %v3747_v0 }
0x19f8   :  { %3560 = vmatpush3.bf16.msra.mxu1 %v3659_v62  ;;  %v3160_v62 = vld [vmem:[%s4550_s17 + $0x1] ss:$0 sm:$0xff] }
0x19f9   :  { %3561 = vmatprep.subr.bf16.mxu1 %v3747_v0 }
0x19fc   :  { %3562 = vmatpush3.bf16.msra.mxu1 %v3660_v63 }
0x19fd   :  { %3563 = vmatprep.subr.bf16.mxu1 %v3747_v0 }
0x1a00   :  { %3564 = vmatpush3.bf16.msra.mxu1 %v3661_v16 }
0x1a01   :  { %3565 = vmatprep.subr.bf16.mxu1 %v3747_v0 }
0x1a04   :  { %3566 = vmatpush3.bf16.msra.mxu1 %v3662_v31 }
0x1a05   :  { %3567 = vmatprep.subr.bf16.mxu1 %v3747_v0 }
0x1a08   :  { %3568 = vmatpush3.bf16.msra.mxu1 %v3663_v5  ;;  %v3166_v5 = vld [vmem:[%s4555_s22] ss:$0 sm:$0xff] }
0x1aab   :  { %v2637_v49 = vpop.f32.mrf.mxu1 }
0x1aac   :  { %v2638_v37 = vadd.f32 %v3141_v45, %v2637_v49 }
0x1aad   :  { %v3543_v41 = vpop.f32.mrf.mxu1 }
0x1aae   :  { %v2644_v3 = vadd.f32 %v2638_v37, %v4233_v50 }
0x1aaf   :  { %v2640_v42 = vpop.f32.mrf.mxu1 }
0x1ab0   :  { %v2641_v4 = vadd.f32 %v3141_v45, %v2640_v42  ;;  %v2646_v22 = vsel %vm103_vm1, %v2644_v3, 0.0 }
0x1ab1   :  { %2647 = vadd.xlane.f32.xlu0 %v2646_v22  ;;  %v3544_v23 = vpop.f32.mrf.mxu1 }
0x1ab2   :  { %v2645_v43 = vadd.f32 %v2641_v4, %v4235_v51  ;;  %v3654_v51 = vld [vmem:[%s4544_s13 + $0x18] sm:$0xff]  }
0x1ab3   :  { %3546 = vmatpush3.bf16.msra.mxu0 %v3654_v51 }
0x1ab4   :  { %v2649_v44 = vsel %vm103_vm1, %v2645_v43, 0.0  ;;  %3547 = vmatprep.subr.bf16.mxu0 %v3747_v0 }
0x1ab5   :  { %2650 = vadd.xlane.f32.xlu1 %v2649_v44 }
0x1ab7   :  { %3548 = vmatpush3.bf16.msra.mxu0 %v3655_v57 }
0x1ab8   :  { %3573 = vmatprep.subr.bf16.mxu0 %v3747_v0 }
0x1b3a   :  { %v2648_v46 = vpop.xlane.xlu0 %2647 }
0x1b3b   :  { %v2652_v47 = vmul.f32 0.03125, %v2648_v46 }
0x1b3d   :  { %v2654_v48 = vsub.f32 %v2644_v3, %v2652_v47 }
0x1b3e   :  { %v2651_v52 = vpop.xlane.xlu1 %2650 }
0x1b3f   :  { %v2653_v25 = vmul.f32 0.03125, %v2651_v52  ;;  %v2656_v53 = vmul.f32 %v2654_v48, %v2654_v48 }
0x1b41   :  { %v2655_v40 = vsub.f32 %v2645_v43, %v2653_v25  ;;  %v2658_v50 = vsel %vm103_vm1, %v2656_v53, 0.0  ;;  %v3664_v53 = vld [vmem:[%s4552_s19 + $0x8] sm:$0xff]  }
0x1b42   :  { %2659 = vadd.xlane.f32.xlu0 %v2658_v50 }
0x1b43   :  { %v2657_v54 = vmul.f32 %v2655_v40, %v2655_v40 }
0x1b45   :  { %v2661_v56 = vsel %vm103_vm1, %v2657_v54, 0.0 }
0x1b46   :  { %2662 = vadd.xlane.f32.xlu0 %v2661_v56 }
0x1bcb   :  { %v2660_v55 = vpop.xlane.xlu0 %2659 }
0x1bcc   :  { %v2664_v59 = vmul.f32 0.03125, %v2660_v55 }
0x1bce   :  { %v2666_v1 = vadd.f32 1e-05, %v2664_v59 }
0x1bcf   :  { %v2663_v2 = vpop.xlane.xlu0 %2662 }
0x1bd0   :  { %3739 = vrsqrt.f32 %v2666_v1  ;;  %v2665_v39 = vmul.f32 0.03125, %v2663_v2  ;;  %v3161_v1 = vld [vmem:[%s4551_s18 + $0x1] ss:$0 sm:$0xff] }
0x1bd2   :  { %v2667_v17 = vadd.f32 1e-05, %v2665_v39 }
0x1bd4   :  { %3741 = vrsqrt.f32 %v2667_v17 }
0x1bdd   :  { %v3740_v19 = vpop.eup %3739 }
0x1bde   :  { %v2670_v6 = vmul.f32 %v3740_v19, %v2654_v48 }
0x1be0   :  { %v2678_v10 = vmul.f32 %v3145_v7, %v2670_v6  ;;  %v3666_v6 = vld [vmem:[%s4553_s21] sm:$0xff]  }
0x1be1   :  { %v3742_v8 = vpop.eup %3741 }
0x1be2   :  { %v2671_v9 = vmul.f32 %v3742_v8, %v2655_v40  ;;  %v2686_v13 = vadd.f32 %v3146_v11, %v2678_v10  ;;  %v3665_v40 = vld [vmem:[%s4552_s19] sm:$0xff]  }
0x1be4   :  { %v2679_v12 = vmul.f32 %v3145_v7, %v2671_v9  ;;  %v3162_v7 = vld [vmem:[%s4554_s20] ss:$0 sm:$0xff] }
0x1be6   :  { %v2687_v14 = vadd.f32 %v3146_v11, %v2679_v12 }
0x1be8   :  { %v2688_v15 = vpack.c.bf16 %v2687_v14, %v2686_v13 }
0x1bea   :  { %3550 = vmatmul.mubr.msk.bf16.vlgmr.msra.gmra.mxu0 %vm103_vm1, %v2688_v15 }
0x1beb   :  { %3577 = vmatprep.mubr.msk.bf16.mxu0 %vm3748_vm0, %v3747_v0  ;;  %3574 = vmatpush3.bf16.msra.mxu0 %v3664_v53 }
0x1bec   :  { %3575 = vmatprep.subr.bf16.mxu0 %v3747_v0 }
0x1bef   :  { %3576 = vmatpush3.bf16.msra.mxu0 %v3665_v40 }
0x1bf0   :  { %3581 = vmatprep.subr.bf16.mxu0 %v3747_v0 }
0x1caa   :  { %v2744_v34 = vpop.f32.mrf.mxu0 }
0x1cab   :  { %v2745_v20 = vadd.f32 %v3147_v38, %v2744_v34 }
0x1cac   :  { %v3551_v18 = vpop.f32.mrf.mxu0 }
0x1cad   :  { %v2751_v27 = vmax.f32 %v2745_v20, 0.0 }
0x1cae   :  { %v2747_v21 = vpop.f32.mrf.mxu0 }
0x1caf   :  { %v2748_v24 = vadd.f32 %v3147_v38, %v2747_v21 }
0x1cb0   :  { %v3552_v26 = vpop.f32.mrf.mxu0 }
0x1cb1   :  { %v2752_v28 = vmax.f32 %v2748_v24, 0.0 }
0x1cb3   :  { %v2753_v29 = vpack.c.bf16 %v2752_v28, %v2751_v27 }
0x1cb5   :  { %3570 = vmatmul.mubr.bf16.vlgmr.msra.gmra.mxu1 %v2753_v29 }
0x1d75   :  { %v2842_v32 = vpop.f32.mrf.mxu1 }
0x1d76   :  { %v2843_v33 = vadd.f32 %v3151_v30, %v2842_v32 }
0x1d77   :  { %v3571_v35 = vpop.f32.mrf.mxu1 }
0x1d78   :  { %v2849_v36 = vadd.f32 %v2843_v33, %v2686_v13 }
0x1d79   :  { %v2845_v45 = vpop.f32.mrf.mxu1 }
0x1d7a   :  { %v2846_v49 = vadd.f32 %v3151_v30, %v2845_v45  ;;  %v2851_v37 = vsel %vm103_vm1, %v2849_v36, 0.0 }
0x1d7b   :  { %2852 = vadd.xlane.f32.xlu1 %v2851_v37  ;;  %v3572_v41 = vpop.f32.mrf.mxu1 }
0x1d7c   :  { %v2850_v3 = vadd.f32 %v2846_v49, %v2687_v14 }
0x1d7e   :  { %v2854_v42 = vsel %vm103_vm1, %v2850_v3, 0.0 }
0x1d7f   :  { %2855 = vadd.xlane.f32.xlu0 %v2854_v42 }
0x1e04   :  { %v2853_v4 = vpop.xlane.xlu1 %2852 }
0x1e05   :  { %v2857_v22 = vmul.f32 0.03125, %v2853_v4 }
0x1e07   :  { %v2859_v23 = vsub.f32 %v2849_v36, %v2857_v22 }
0x1e08   :  { %v2856_v43 = vpop.xlane.xlu0 %2855 }
0x1e09   :  { %v2858_v44 = vmul.f32 0.03125, %v2856_v43  ;;  %v2861_v46 = vmul.f32 %v2859_v23, %v2859_v23 }
0x1e0b   :  { %v2860_v47 = vsub.f32 %v2850_v3, %v2858_v44  ;;  %v2863_v48 = vsel %vm103_vm1, %v2861_v46, 0.0 }
0x1e0c   :  { %2864 = vadd.xlane.f32.xlu1 %v2863_v48 }
0x1e0d   :  { %v2862_v52 = vmul.f32 %v2860_v47, %v2860_v47 }
0x1e0f   :  { %v2866_v25 = vsel %vm103_vm1, %v2862_v52, 0.0 }
0x1e10   :  { %2867 = vadd.xlane.f32.xlu0 %v2866_v25 }
0x1e95   :  { %v2865_v50 = vpop.xlane.xlu1 %2864 }
0x1e96   :  { %v2869_v54 = vmul.f32 0.03125, %v2865_v50 }
0x1e98   :  { %v2871_v56 = vadd.f32 1e-05, %v2869_v54 }
0x1e99   :  { %v2868_v51 = vpop.xlane.xlu0 %2867 }
0x1e9a   :  { %3743 = vrsqrt.f32 %v2871_v56  ;;  %v2870_v57 = vmul.f32 0.03125, %v2868_v51 }
0x1e9c   :  { %v2872_v58 = vadd.f32 1e-05, %v2870_v57 }
0x1e9e   :  { %3745 = vrsqrt.f32 %v2872_v58 }
0x1ea7   :  { %v3744_v60 = vpop.eup %3743 }
0x1ea8   :  { %v2875_v61 = vmul.f32 %v3744_v60, %v2859_v23 }
0x1eaa   :  { %v2883_v59 = vmul.f32 %v3160_v62, %v2875_v61 }
0x1eab   :  { %v3746_v63 = vpop.eup %3745 }
0x1eac   :  { %v2876_v55 = vmul.f32 %v3746_v63, %v2860_v47  ;;  %v2891_v39 = vadd.f32 %v3161_v1, %v2883_v59 }
0x1eae   :  { %v2884_v2 = vmul.f32 %v3160_v62, %v2876_v55 }
0x1eb0   :  { %v2892_v17 = vadd.f32 %v3161_v1, %v2884_v2 }
0x1eb2   :  { %v2893_v19 = vpack.c.bf16 %v2892_v17, %v2891_v39 }
0x1eb4   :  { %3578 = vmatmul.mubr.msk.bf16.vlgmr.msra.gmra.mxu0 %vm103_vm1, %v2893_v19 }
0x1eb5   :  { %3583 = vmatprep.mubr.msk.bf16.mxu0 %vm3748_vm0, %v3747_v0  ;;  %3582 = vmatpush3.bf16.msra.mxu0 %v3666_v6 }
0x1f74   :  { %v2954_v8 = vpop.f32.mrf.mxu0 }
0x1f75   :  { %v2955_v9 = vadd.f32 %v3162_v7, %v2954_v8 }
0x1f76   :  { %v3579_v10 = vpop.f32.mrf.mxu0 }
0x1f77   :  { %v2963_v12 = vmul.f32 0.01, %v2955_v9  ;;  %vm2961_vm8 = vcmp.gt.f32.partialorder %v2955_v9, 0.0 }
0x1f78   :  { %v2957_v11 = vpop.f32.mrf.mxu0 }
0x1f79   :  { %v2958_v13 = vadd.f32 %v3162_v7, %v2957_v11  ;;  %v2965_v0 = vsel %vm2961_vm8, %v2955_v9, %v2963_v12 }
0x1f7a   :  { %v3580_v14 = vpop.f32.mrf.mxu0 }
0x1f7b   :  { %vm2962_vm9 = vcmp.gt.f32.partialorder %v2958_v13, 0.0  ;;  %v2964_v15 = vmul.f32 0.01, %v2958_v13 }
0x1f7d   :  { %v2966_v16 = vsel %vm2962_vm9, %v2958_v13, %v2964_v15 }
0x1f7e   :  { %v2967_v31 = vpack.c.bf16 %v2966_v16, %v2965_v0 }
0x1f80   :  { %3584 = vmatmul.mubr.msk.bf16.vlgmr.msra.gmra.mxu0 %vm170_vm4, %v2967_v31 }
0x2040   :  { %v3020_v38 = vpop.f32.mrf.mxu0 }
0x2041   :  { %v3021_v34 = vadd.f32 %v3166_v5, %v3020_v38 }
0x2042   :  { %v3585_v18 = vpop.f32.mrf.mxu0 }
0x2043   :  { %3027 = vst.msk [vmem:[%s4556_s24] sm:$0xff] %vm219_vm5, %v3021_v34 }
0x2044   :  { %v3023_v20 = vpop.f32.mrf.mxu0 }
0x2045   :  { %v3024_v21 = vadd.f32 %v3166_v5, %v3023_v20 }
0x2046   :  { %v3586_v24 = vpop.f32.mrf.mxu0 }
0x2047   :  { %3028 = vst.msk [vmem:[%s4556_s24 + $0x8] sm:$0xff] %vm219_vm5, %v3024_v21 }

</bundles_post_ra>
